<compile_context>
chip_gen: v6e
topology: v6e:2x2x1
jax: 0.10.0
libtpu: 0.0.40
codegen_flags: <defaults>
</compile_context>

<pallas_src>
import math

import jax
import jax.numpy as jnp
from jax.experimental import pallas as pl
from jax.experimental.pallas import tpu as pltpu


P = 128   # lane-padded feature width for every hidden / input / output dim
G = 32    # lanes per gate inside the packed 128-lane gate tile (H <= 16 < 32)


# ----------------------------------------------------------------------------
# Fused Pallas kernel: 4 LSTM layers + linear head, whole sequence in VMEM
# ----------------------------------------------------------------------------
def _lstm_ae_kernel(x_ref,
                    wx1_ref, wh1_ref, b1_ref,
                    wx2_ref, wh2_ref, b2_ref,
                    wx3_ref, wh3_ref, b3_ref,
                    wx4_ref, wh4_ref, b4_ref,
                    wl_ref, bl_ref, out_ref):
    """Whole forward pass in one kernel invocation (no grid).

    x_ref   : (T*B, P) f32   lane-padded, time-major-flattened input sequence
    wxN_ref : (P, P)  bf16   input->gates weight, packed gate layout
                             (gate g in cols [g*G : g*G+H), rows [0:D) valid)
    whN_ref : (P, P)  bf16   hidden->gates weight, same packed layout (rows [0:H))
    bN_ref  : (1, P)  f32    combined bias (b_ih + b_hh), packed layout
    wl_ref  : (P, P)  bf16   linear head weight (y = h @ wl + bl), rows [0:D) valid
    bl_ref  : (1, P)  f32    linear head bias
    out_ref : (B, P)  f32    y_pred (valid columns [0:in_features))
    """
    TB = x_ref.shape[0]
    B = out_ref.shape[0]
    T = TB // B

    # Hoisted lane masks (JAX does not CSE broadcasts inside the unrolled loop).
    lane = jax.lax.broadcasted_iota(jnp.int32, (B, P), 1)
    is_g_lane = (lane >= 2 * G) & (lane < 3 * G)               # the "g" (cell) gate
    gate_scale = jnp.where(is_g_lane, 1.0, 0.5).astype(jnp.float32)

    def run_layer(x_bf, wx_ref, wh_ref, b_ref):
        # Hoisted input projection + bias: one (T*B, P) x (P, P) matmul, off the
        # sequential critical path of the recurrence.
        gx = jnp.dot(x_bf, wx_ref[...],
                     preferred_element_type=jnp.float32) + b_ref[...]   # (T*B, P) f32

        h = jnp.zeros((B, P), jnp.float32)
        c = jnp.zeros((B, P), jnp.float32)
        h_bf = h.astype(jnp.bfloat16)
        outs = []
        # T is a small static constant -> fully unrolled time loop (the recurrence
        # is inherently sequential; no grid steps needed).
        for t in range(T):
            # Per-step critical path: one (B,128)x(128,128) bf16 MXU dot.
            gates = gx[t * B:(t + 1) * B, :] + jnp.dot(
                h_bf, wh_ref[...], preferred_element_type=jnp.float32)   # (B, P)

            # Single EUP pass: sigmoid(x) = 0.5*(tanh(x/2)+1) for i/f/o lanes,
            # plain tanh for the g-gate lanes.
            tt = jnp.tanh(gates * gate_scale)
            act = jnp.where(is_g_lane, tt, 0.5 * (tt + 1.0))

            # Realign each gate's 32-lane block to lanes [0:32) (XLU rotations).
            i_g = act
            f_g = pltpu.roll(act, P - 1 * G, axis=1)
            g_g = pltpu.roll(act, P - 2 * G, axis=1)
            o_g = pltpu.roll(act, P - 3 * G, axis=1)

            c = f_g * c + i_g * g_g
            h = o_g * jnp.tanh(c)
            h_bf = h.astype(jnp.bfloat16)       # reused for next step & next layer
            outs.append(h_bf)

        # Sublane-dense (T*B, P) activation value for the next layer's projection.
        return jnp.concatenate(outs, axis=0), h_bf

    a1, _ = run_layer(x_ref[...].astype(jnp.bfloat16), wx1_ref, wh1_ref, b1_ref)
    a2, _ = run_layer(a1, wx2_ref, wh2_ref, b2_ref)
    a3, _ = run_layer(a2, wx3_ref, wh3_ref, b3_ref)
    _, h_last = run_layer(a3, wx4_ref, wh4_ref, b4_ref)

    # Final linear on the last timestep of lstm4.
    out_ref[...] = (jnp.dot(h_last, wl_ref[...],
                            preferred_element_type=jnp.float32) + bl_ref[...])


# ----------------------------------------------------------------------------
# One-time weight prepack (transpose, gate-pack, bias-combine, pad, bf16 cast)
# ----------------------------------------------------------------------------
def prepack_params(params):
    """Repack PyTorch-layout LSTM/linear params into the kernel layout."""
    packed = {}
    for idx in (1, 2, 3, 4):
        p = params[f"lstm{idx}"]
        w_ih, w_hh = p["w_ih"], p["w_hh"]          # (4H, D), (4H, H)
        bias = p["b_ih"] + p["b_hh"]               # (4H,)
        H = w_hh.shape[1]
        D = w_ih.shape[1]
        assert H <= G and D <= P
        w_ih_t = w_ih.T                            # (D, 4H)
        w_hh_t = w_hh.T                            # (H, 4H)
        wx = jnp.zeros((P, P), jnp.float32)
        wh = jnp.zeros((P, P), jnp.float32)
        bg = jnp.zeros((1, P), jnp.float32)
        for g in range(4):                         # PyTorch gate order i, f, g, o
            wx = wx.at[0:D, g * G:g * G + H].set(w_ih_t[:, g * H:(g + 1) * H])
            wh = wh.at[0:H, g * G:g * G + H].set(w_hh_t[:, g * H:(g + 1) * H])
            bg = bg.at[0, g * G:g * G + H].set(bias[g * H:(g + 1) * H])
        packed[f"wx{idx}"] = wx.astype(jnp.bfloat16)
        packed[f"wh{idx}"] = wh.astype(jnp.bfloat16)
        packed[f"b{idx}"] = bg                     # bias stays f32 (folded into gx)

    wl = params["linear"]["w"]                     # (O, D) PyTorch layout
    bl = params["linear"]["b"]                     # (O,)
    O, D = wl.shape
    packed["wl"] = (jnp.zeros((P, P), jnp.float32)
                    .at[0:D, 0:O].set(wl.T).astype(jnp.bfloat16))
    packed["bl"] = jnp.zeros((1, P), jnp.float32).at[0, 0:O].set(bl)
    return packed


# ----------------------------------------------------------------------------
# Forward wrapper (single pallas_call)
# ----------------------------------------------------------------------------
def lstm_ae_forward(packed, sequences):
    """Equivalent of lstm.forward(sequences) after initHidden (zero states).

    sequences: (B, T, in_features), batch_first (PyTorch convention).
    Returns y_pred: (B, in_features)."""
    B, T, D = sequences.shape
    # time-major, flattened (t, b) rows -> sublane-dense (T*B, P) input slab
    x = jnp.transpose(sequences, (1, 0, 2)).reshape(T * B, D)
    x = jnp.pad(x, ((0, 0), (0, P - D)))

    # TODO(synk): on v7x, shard a larger batch over the 2 TensorCores with a
    # batch grid axis + dimension_semantics=("parallel",); at B=2 it is not useful.
    out = pl.pallas_call(
        _lstm_ae_kernel,
        out_shape=jax.ShapeDtypeStruct((B, P), jnp.float32),
        compiler_params=pltpu.CompilerParams(
            vmem_limit_bytes=8 * 1024 * 1024),   # actual footprint < 1 MiB
    )(x,
      packed["wx1"], packed["wh1"], packed["b1"],
      packed["wx2"], packed["wh2"], packed["b2"],
      packed["wx3"], packed["wh3"], packed["b3"],
      packed["wx4"], packed["wh4"], packed["b4"],
      packed["wl"], packed["bl"])
    return out[:, :D]


# ----------------------------------------------------------------------------
# Deterministic parameter init (PyTorch default: U(-1/sqrt(H), 1/sqrt(H)))
# ----------------------------------------------------------------------------
def init_params(key, in_features, n_hidden):
    n_middle = int((in_features - n_hidden) / 2) + n_hidden
    layer_dims = [(in_features, n_middle), (n_middle, n_hidden),
                  (n_hidden, n_middle), (n_middle, in_features)]
    keys = jax.random.split(key, 4 * 4 + 2)
    params = {}
    ki = 0
    for idx, (din, h) in enumerate(layer_dims, start=1):
        bound = 1.0 / math.sqrt(h)
        params[f"lstm{idx}"] = {
            "w_ih": jax.random.uniform(keys[ki + 0], (4 * h, din), jnp.float32, -bound, bound),
            "w_hh": jax.random.uniform(keys[ki + 1], (4 * h, h), jnp.float32, -bound, bound),
            "b_ih": jax.random.uniform(keys[ki + 2], (4 * h,), jnp.float32, -bound, bound),
            "b_hh": jax.random.uniform(keys[ki + 3], (4 * h,), jnp.float32, -bound, bound),
        }
        ki += 4
    bound = 1.0 / math.sqrt(in_features)
    params["linear"] = {
        "w": jax.random.uniform(keys[ki + 0], (in_features, in_features), jnp.float32, -bound, bound),
        "b": jax.random.uniform(keys[ki + 1], (in_features,), jnp.float32, -bound, bound),
    }
    return params, n_middle


# ----------------------------------------------------------------------------
# Pure-JAX reference (lax.scan) for correctness check
# ----------------------------------------------------------------------------
def _ref_lstm_layer(x_tbd, w_ih, w_hh, b_ih, b_hh):
    H = w_hh.shape[1]
    B = x_tbd.shape[1]

    def step(carry, x_t):
        h, c = carry
        gates = x_t @ w_ih.T + h @ w_hh.T + b_ih + b_hh
        i, f, g, o = jnp.split(gates, 4, axis=-1)
        i, f, o = jax.nn.sigmoid(i), jax.nn.sigmoid(f), jax.nn.sigmoid(o)
        g = jnp.tanh(g)
        c = f * c + i * g
        h = o * jnp.tanh(c)
        return (h, c), h

    h0 = jnp.zeros((B, H), jnp.float32)
    c0 = jnp.zeros((B, H), jnp.float32)
    _, ys = jax.lax.scan(step, (h0, c0), x_tbd)
    return ys


def _ref_forward(params, sequences):
    x = jnp.transpose(sequences, (1, 0, 2))
    for name in ("lstm1", "lstm2", "lstm3", "lstm4"):
        p = params[name]
        x = _ref_lstm_layer(x, p["w_ih"], p["w_hh"], p["b_ih"], p["b_hh"])
    last = x[-1]
    return last @ params["linear"]["w"].T + params["linear"]["b"]


# ----------------------------------------------------------------------------
if __name__ == "__main__":
    in_features = 16
    n_hidden = 8
    batch = 2
    seq_len = 8

    key = jax.random.PRNGKey(0)
    pkey, xkey = jax.random.split(key)
    params, n_middle = init_params(pkey, in_features, n_hidden)
    packed = prepack_params(params)   # one-time repack, not in the forward path

    sequences = jax.random.normal(xkey, (batch, seq_len, in_features), jnp.float32)

    fwd = jax.jit(lambda s: lstm_ae_forward(packed, s))
    y_pred = jax.block_until_ready(fwd(sequences))

    y_ref = _ref_forward(params, sequences)
    assert y_pred.shape == (batch, in_features)
    # bf16 weights / bf16 matmul LHS (f32 accumulation) -> relaxed tolerance.
    assert jnp.allclose(y_pred, y_ref, atol=3e-2, rtol=3e-2), "mismatch vs reference"

    # TODO(synk): run_epoch (training loop / optimizer / DataLoader) is host-side
    # PyTorch glue, not part of the forward-pass kernel.
    print("KERNEL_OK")
</pallas_src>

<mosaic_0001>
module attributes {stable_mosaic.version = 11 : i64} {
  func.func @_lstm_ae_kernel(%arg0: memref<16x128xf32, #tpu.memory_space<vmem>>, %arg1: memref<128x128xbf16, #tpu.memory_space<vmem>>, %arg2: memref<128x128xbf16, #tpu.memory_space<vmem>>, %arg3: memref<1x128xf32, #tpu.memory_space<vmem>>, %arg4: memref<128x128xbf16, #tpu.memory_space<vmem>>, %arg5: memref<128x128xbf16, #tpu.memory_space<vmem>>, %arg6: memref<1x128xf32, #tpu.memory_space<vmem>>, %arg7: memref<128x128xbf16, #tpu.memory_space<vmem>>, %arg8: memref<128x128xbf16, #tpu.memory_space<vmem>>, %arg9: memref<1x128xf32, #tpu.memory_space<vmem>>, %arg10: memref<128x128xbf16, #tpu.memory_space<vmem>>, %arg11: memref<128x128xbf16, #tpu.memory_space<vmem>>, %arg12: memref<1x128xf32, #tpu.memory_space<vmem>>, %arg13: memref<128x128xbf16, #tpu.memory_space<vmem>>, %arg14: memref<1x128xf32, #tpu.memory_space<vmem>>, %arg15: memref<2x128xf32, #tpu.memory_space<vmem>>) attributes {dimension_semantics = [], scalar_prefetch = 0 : i64, scratch_operands = 0 : i64, tpu.core_type = #tpu.core_type<tc>} {
    %0 = tpu.iota {dimensions = array<i32: 1>} : vector<2x128xi32>
    %c64_i32 = arith.constant 64 : i32
    %1 = vector.broadcast %c64_i32 : i32 to vector<2x128xi32>
    %2 = arith.cmpi sge, %0, %1 : vector<2x128xi32>
    %c96_i32 = arith.constant 96 : i32
    %3 = vector.broadcast %c96_i32 : i32 to vector<2x128xi32>
    %4 = arith.cmpi slt, %0, %3 : vector<2x128xi32>
    %5 = arith.andi %2, %4 : vector<2x128xi1>
    %cst = arith.constant 1.000000e+00 : f32
    %cst_0 = arith.constant 5.000000e-01 : f32
    %6 = vector.broadcast %cst : f32 to vector<2x128xf32>
    %7 = vector.broadcast %cst_0 : f32 to vector<2x128xf32>
    %8 = arith.select %5, %6, %7 : vector<2x128xi1>, vector<2x128xf32>
    %c0 = arith.constant 0 : index
    %c0_1 = arith.constant 0 : index
    %9 = vector.load %arg0[%c0, %c0_1] : memref<16x128xf32, #tpu.memory_space<vmem>>, vector<16x128xf32>
    %10 = arith.truncf %9 : vector<16x128xf32> to vector<16x128xbf16>
    %c0_2 = arith.constant 0 : index
    %c0_3 = arith.constant 0 : index
    %11 = vector.load %arg1[%c0_2, %c0_3] : memref<128x128xbf16, #tpu.memory_space<vmem>>, vector<128x128xbf16>
    %cst_4 = arith.constant dense<0.000000e+00> : vector<16x128xf32>
    %12 = tpu.matmul %10, %11, %cst_4 {dimension_numbers = #tpu.dot_dimension_numbers<[1], [0], [0], [1], [0, 0, 1, 1], [], []>} : vector<16x128xbf16>, vector<128x128xbf16>, vector<16x128xf32> -> vector<16x128xf32>
    %c0_5 = arith.constant 0 : index
    %c0_6 = arith.constant 0 : index
    %13 = vector.load %arg3[%c0_5, %c0_6] : memref<1x128xf32, #tpu.memory_space<vmem>>, vector<1x128xf32>
    %14 = vector.broadcast %13 : vector<1x128xf32> to vector<16x128xf32>
    %15 = arith.addf %12, %14 : vector<16x128xf32>
    %cst_7 = arith.constant 0.000000e+00 : f32
    %16 = vector.broadcast %cst_7 : f32 to vector<2x128xf32>
    %cst_8 = arith.constant 0.000000e+00 : f32
    %17 = vector.broadcast %cst_8 : f32 to vector<2x128xf32>
    %18 = arith.truncf %16 : vector<2x128xf32> to vector<2x128xbf16>
    %19 = vector.extract_strided_slice %15 {offsets = [0, 0], sizes = [2, 128], strides = [1, 1]} : vector<16x128xf32> to vector<2x128xf32>
    %c0_9 = arith.constant 0 : index
    %c0_10 = arith.constant 0 : index
    %20 = vector.load %arg2[%c0_9, %c0_10] : memref<128x128xbf16, #tpu.memory_space<vmem>>, vector<128x128xbf16>
    %cst_11 = arith.constant dense<0.000000e+00> : vector<2x128xf32>
    %21 = tpu.matmul %18, %20, %cst_11 {dimension_numbers = #tpu.dot_dimension_numbers<[1], [0], [0], [1], [0, 0, 1, 1], [], []>} : vector<2x128xbf16>, vector<128x128xbf16>, vector<2x128xf32> -> vector<2x128xf32>
    %22 = arith.addf %19, %21 : vector<2x128xf32>
    %23 = arith.mulf %22, %8 : vector<2x128xf32>
    %24 = math.tanh %23 : vector<2x128xf32>
    %cst_12 = arith.constant 1.000000e+00 : f32
    %25 = vector.broadcast %cst_12 : f32 to vector<2x128xf32>
    %26 = arith.addf %24, %25 : vector<2x128xf32>
    %cst_13 = arith.constant 5.000000e-01 : f32
    %27 = vector.broadcast %cst_13 : f32 to vector<2x128xf32>
    %28 = arith.mulf %27, %26 : vector<2x128xf32>
    %29 = arith.select %5, %24, %28 : vector<2x128xi1>, vector<2x128xf32>
    %c96_i32_14 = arith.constant 96 : i32
    %30 = tpu.dynamic_rotate %29 by %c96_i32_14 dim 1 : vector<2x128xf32>, i32 -> vector<2x128xf32>
    %c64_i32_15 = arith.constant 64 : i32
    %31 = tpu.dynamic_rotate %29 by %c64_i32_15 dim 1 : vector<2x128xf32>, i32 -> vector<2x128xf32>
    %c32_i32 = arith.constant 32 : i32
    %32 = tpu.dynamic_rotate %29 by %c32_i32 dim 1 : vector<2x128xf32>, i32 -> vector<2x128xf32>
    %33 = arith.mulf %30, %17 : vector<2x128xf32>
    %34 = arith.mulf %29, %31 : vector<2x128xf32>
    %35 = arith.addf %33, %34 : vector<2x128xf32>
    %36 = math.tanh %35 : vector<2x128xf32>
    %37 = arith.mulf %32, %36 : vector<2x128xf32>
    %38 = arith.truncf %37 : vector<2x128xf32> to vector<2x128xbf16>
    %39 = vector.extract_strided_slice %15 {offsets = [2, 0], sizes = [2, 128], strides = [1, 1]} : vector<16x128xf32> to vector<2x128xf32>
    %c0_16 = arith.constant 0 : index
    %c0_17 = arith.constant 0 : index
    %40 = vector.load %arg2[%c0_16, %c0_17] : memref<128x128xbf16, #tpu.memory_space<vmem>>, vector<128x128xbf16>
    %cst_18 = arith.constant dense<0.000000e+00> : vector<2x128xf32>
    %41 = tpu.matmul %38, %40, %cst_18 {dimension_numbers = #tpu.dot_dimension_numbers<[1], [0], [0], [1], [0, 0, 1, 1], [], []>} : vector<2x128xbf16>, vector<128x128xbf16>, vector<2x128xf32> -> vector<2x128xf32>
    %42 = arith.addf %39, %41 : vector<2x128xf32>
    %43 = arith.mulf %42, %8 : vector<2x128xf32>
    %44 = math.tanh %43 : vector<2x128xf32>
    %cst_19 = arith.constant 1.000000e+00 : f32
    %45 = vector.broadcast %cst_19 : f32 to vector<2x128xf32>
    %46 = arith.addf %44, %45 : vector<2x128xf32>
    %cst_20 = arith.constant 5.000000e-01 : f32
    %47 = vector.broadcast %cst_20 : f32 to vector<2x128xf32>
    %48 = arith.mulf %47, %46 : vector<2x128xf32>
    %49 = arith.select %5, %44, %48 : vector<2x128xi1>, vector<2x128xf32>
    %c96_i32_21 = arith.constant 96 : i32
    %50 = tpu.dynamic_rotate %49 by %c96_i32_21 dim 1 : vector<2x128xf32>, i32 -> vector<2x128xf32>
    %c64_i32_22 = arith.constant 64 : i32
    %51 = tpu.dynamic_rotate %49 by %c64_i32_22 dim 1 : vector<2x128xf32>, i32 -> vector<2x128xf32>
    %c32_i32_23 = arith.constant 32 : i32
    %52 = tpu.dynamic_rotate %49 by %c32_i32_23 dim 1 : vector<2x128xf32>, i32 -> vector<2x128xf32>
    %53 = arith.mulf %50, %35 : vector<2x128xf32>
    %54 = arith.mulf %49, %51 : vector<2x128xf32>
    %55 = arith.addf %53, %54 : vector<2x128xf32>
    %56 = math.tanh %55 : vector<2x128xf32>
    %57 = arith.mulf %52, %56 : vector<2x128xf32>
    %58 = arith.truncf %57 : vector<2x128xf32> to vector<2x128xbf16>
    %59 = vector.extract_strided_slice %15 {offsets = [4, 0], sizes = [2, 128], strides = [1, 1]} : vector<16x128xf32> to vector<2x128xf32>
    %c0_24 = arith.constant 0 : index
    %c0_25 = arith.constant 0 : index
    %60 = vector.load %arg2[%c0_24, %c0_25] : memref<128x128xbf16, #tpu.memory_space<vmem>>, vector<128x128xbf16>
    %cst_26 = arith.constant dense<0.000000e+00> : vector<2x128xf32>
    %61 = tpu.matmul %58, %60, %cst_26 {dimension_numbers = #tpu.dot_dimension_numbers<[1], [0], [0], [1], [0, 0, 1, 1], [], []>} : vector<2x128xbf16>, vector<128x128xbf16>, vector<2x128xf32> -> vector<2x128xf32>
    %62 = arith.addf %59, %61 : vector<2x128xf32>
    %63 = arith.mulf %62, %8 : vector<2x128xf32>
    %64 = math.tanh %63 : vector<2x128xf32>
    %cst_27 = arith.constant 1.000000e+00 : f32
    %65 = vector.broadcast %cst_27 : f32 to vector<2x128xf32>
    %66 = arith.addf %64, %65 : vector<2x128xf32>
    %cst_28 = arith.constant 5.000000e-01 : f32
    %67 = vector.broadcast %cst_28 : f32 to vector<2x128xf32>
    %68 = arith.mulf %67, %66 : vector<2x128xf32>
    %69 = arith.select %5, %64, %68 : vector<2x128xi1>, vector<2x128xf32>
    %c96_i32_29 = arith.constant 96 : i32
    %70 = tpu.dynamic_rotate %69 by %c96_i32_29 dim 1 : vector<2x128xf32>, i32 -> vector<2x128xf32>
    %c64_i32_30 = arith.constant 64 : i32
    %71 = tpu.dynamic_rotate %69 by %c64_i32_30 dim 1 : vector<2x128xf32>, i32 -> vector<2x128xf32>
    %c32_i32_31 = arith.constant 32 : i32
    %72 = tpu.dynamic_rotate %69 by %c32_i32_31 dim 1 : vector<2x128xf32>, i32 -> vector<2x128xf32>
    %73 = arith.mulf %70, %55 : vector<2x128xf32>
    %74 = arith.mulf %69, %71 : vector<2x128xf32>
    %75 = arith.addf %73, %74 : vector<2x128xf32>
    %76 = math.tanh %75 : vector<2x128xf32>
    %77 = arith.mulf %72, %76 : vector<2x128xf32>
    %78 = arith.truncf %77 : vector<2x128xf32> to vector<2x128xbf16>
    %79 = vector.extract_strided_slice %15 {offsets = [6, 0], sizes = [2, 128], strides = [1, 1]} : vector<16x128xf32> to vector<2x128xf32>
    %c0_32 = arith.constant 0 : index
    %c0_33 = arith.constant 0 : index
    %80 = vector.load %arg2[%c0_32, %c0_33] : memref<128x128xbf16, #tpu.memory_space<vmem>>, vector<128x128xbf16>
    %cst_34 = arith.constant dense<0.000000e+00> : vector<2x128xf32>
    %81 = tpu.matmul %78, %80, %cst_34 {dimension_numbers = #tpu.dot_dimension_numbers<[1], [0], [0], [1], [0, 0, 1, 1], [], []>} : vector<2x128xbf16>, vector<128x128xbf16>, vector<2x128xf32> -> vector<2x128xf32>
    %82 = arith.addf %79, %81 : vector<2x128xf32>
    %83 = arith.mulf %82, %8 : vector<2x128xf32>
    %84 = math.tanh %83 : vector<2x128xf32>
    %cst_35 = arith.constant 1.000000e+00 : f32
    %85 = vector.broadcast %cst_35 : f32 to vector<2x128xf32>
    %86 = arith.addf %84, %85 : vector<2x128xf32>
    %cst_36 = arith.constant 5.000000e-01 : f32
    %87 = vector.broadcast %cst_36 : f32 to vector<2x128xf32>
    %88 = arith.mulf %87, %86 : vector<2x128xf32>
    %89 = arith.select %5, %84, %88 : vector<2x128xi1>, vector<2x128xf32>
    %c96_i32_37 = arith.constant 96 : i32
    %90 = tpu.dynamic_rotate %89 by %c96_i32_37 dim 1 : vector<2x128xf32>, i32 -> vector<2x128xf32>
    %c64_i32_38 = arith.constant 64 : i32
    %91 = tpu.dynamic_rotate %89 by %c64_i32_38 dim 1 : vector<2x128xf32>, i32 -> vector<2x128xf32>
    %c32_i32_39 = arith.constant 32 : i32
    %92 = tpu.dynamic_rotate %89 by %c32_i32_39 dim 1 : vector<2x128xf32>, i32 -> vector<2x128xf32>
    %93 = arith.mulf %90, %75 : vector<2x128xf32>
    %94 = arith.mulf %89, %91 : vector<2x128xf32>
    %95 = arith.addf %93, %94 : vector<2x128xf32>
    %96 = math.tanh %95 : vector<2x128xf32>
    %97 = arith.mulf %92, %96 : vector<2x128xf32>
    %98 = arith.truncf %97 : vector<2x128xf32> to vector<2x128xbf16>
    %99 = vector.extract_strided_slice %15 {offsets = [8, 0], sizes = [2, 128], strides = [1, 1]} : vector<16x128xf32> to vector<2x128xf32>
    %c0_40 = arith.constant 0 : index
    %c0_41 = arith.constant 0 : index
    %100 = vector.load %arg2[%c0_40, %c0_41] : memref<128x128xbf16, #tpu.memory_space<vmem>>, vector<128x128xbf16>
    %cst_42 = arith.constant dense<0.000000e+00> : vector<2x128xf32>
    %101 = tpu.matmul %98, %100, %cst_42 {dimension_numbers = #tpu.dot_dimension_numbers<[1], [0], [0], [1], [0, 0, 1, 1], [], []>} : vector<2x128xbf16>, vector<128x128xbf16>, vector<2x128xf32> -> vector<2x128xf32>
    %102 = arith.addf %99, %101 : vector<2x128xf32>
    %103 = arith.mulf %102, %8 : vector<2x128xf32>
    %104 = math.tanh %103 : vector<2x128xf32>
    %cst_43 = arith.constant 1.000000e+00 : f32
    %105 = vector.broadcast %cst_43 : f32 to vector<2x128xf32>
    %106 = arith.addf %104, %105 : vector<2x128xf32>
    %cst_44 = arith.constant 5.000000e-01 : f32
    %107 = vector.broadcast %cst_44 : f32 to vector<2x128xf32>
    %108 = arith.mulf %107, %106 : vector<2x128xf32>
    %109 = arith.select %5, %104, %108 : vector<2x128xi1>, vector<2x128xf32>
    %c96_i32_45 = arith.constant 96 : i32
    %110 = tpu.dynamic_rotate %109 by %c96_i32_45 dim 1 : vector<2x128xf32>, i32 -> vector<2x128xf32>
    %c64_i32_46 = arith.constant 64 : i32
    %111 = tpu.dynamic_rotate %109 by %c64_i32_46 dim 1 : vector<2x128xf32>, i32 -> vector<2x128xf32>
    %c32_i32_47 = arith.constant 32 : i32
    %112 = tpu.dynamic_rotate %109 by %c32_i32_47 dim 1 : vector<2x128xf32>, i32 -> vector<2x128xf32>
    %113 = arith.mulf %110, %95 : vector<2x128xf32>
    %114 = arith.mulf %109, %111 : vector<2x128xf32>
    %115 = arith.addf %113, %114 : vector<2x128xf32>
    %116 = math.tanh %115 : vector<2x128xf32>
    %117 = arith.mulf %112, %116 : vector<2x128xf32>
    %118 = arith.truncf %117 : vector<2x128xf32> to vector<2x128xbf16>
    %119 = vector.extract_strided_slice %15 {offsets = [10, 0], sizes = [2, 128], strides = [1, 1]} : vector<16x128xf32> to vector<2x128xf32>
    %c0_48 = arith.constant 0 : index
    %c0_49 = arith.constant 0 : index
    %120 = vector.load %arg2[%c0_48, %c0_49] : memref<128x128xbf16, #tpu.memory_space<vmem>>, vector<128x128xbf16>
    %cst_50 = arith.constant dense<0.000000e+00> : vector<2x128xf32>
    %121 = tpu.matmul %118, %120, %cst_50 {dimension_numbers = #tpu.dot_dimension_numbers<[1], [0], [0], [1], [0, 0, 1, 1], [], []>} : vector<2x128xbf16>, vector<128x128xbf16>, vector<2x128xf32> -> vector<2x128xf32>
    %122 = arith.addf %119, %121 : vector<2x128xf32>
    %123 = arith.mulf %122, %8 : vector<2x128xf32>
    %124 = math.tanh %123 : vector<2x128xf32>
    %cst_51 = arith.constant 1.000000e+00 : f32
    %125 = vector.broadcast %cst_51 : f32 to vector<2x128xf32>
    %126 = arith.addf %124, %125 : vector<2x128xf32>
    %cst_52 = arith.constant 5.000000e-01 : f32
    %127 = vector.broadcast %cst_52 : f32 to vector<2x128xf32>
    %128 = arith.mulf %127, %126 : vector<2x128xf32>
    %129 = arith.select %5, %124, %128 : vector<2x128xi1>, vector<2x128xf32>
    %c96_i32_53 = arith.constant 96 : i32
    %130 = tpu.dynamic_rotate %129 by %c96_i32_53 dim 1 : vector<2x128xf32>, i32 -> vector<2x128xf32>
    %c64_i32_54 = arith.constant 64 : i32
    %131 = tpu.dynamic_rotate %129 by %c64_i32_54 dim 1 : vector<2x128xf32>, i32 -> vector<2x128xf32>
    %c32_i32_55 = arith.constant 32 : i32
    %132 = tpu.dynamic_rotate %129 by %c32_i32_55 dim 1 : vector<2x128xf32>, i32 -> vector<2x128xf32>
    %133 = arith.mulf %130, %115 : vector<2x128xf32>
    %134 = arith.mulf %129, %131 : vector<2x128xf32>
    %135 = arith.addf %133, %134 : vector<2x128xf32>
    %136 = math.tanh %135 : vector<2x128xf32>
    %137 = arith.mulf %132, %136 : vector<2x128xf32>
    %138 = arith.truncf %137 : vector<2x128xf32> to vector<2x128xbf16>
    %139 = vector.extract_strided_slice %15 {offsets = [12, 0], sizes = [2, 128], strides = [1, 1]} : vector<16x128xf32> to vector<2x128xf32>
    %c0_56 = arith.constant 0 : index
    %c0_57 = arith.constant 0 : index
    %140 = vector.load %arg2[%c0_56, %c0_57] : memref<128x128xbf16, #tpu.memory_space<vmem>>, vector<128x128xbf16>
    %cst_58 = arith.constant dense<0.000000e+00> : vector<2x128xf32>
    %141 = tpu.matmul %138, %140, %cst_58 {dimension_numbers = #tpu.dot_dimension_numbers<[1], [0], [0], [1], [0, 0, 1, 1], [], []>} : vector<2x128xbf16>, vector<128x128xbf16>, vector<2x128xf32> -> vector<2x128xf32>
    %142 = arith.addf %139, %141 : vector<2x128xf32>
    %143 = arith.mulf %142, %8 : vector<2x128xf32>
    %144 = math.tanh %143 : vector<2x128xf32>
    %cst_59 = arith.constant 1.000000e+00 : f32
    %145 = vector.broadcast %cst_59 : f32 to vector<2x128xf32>
    %146 = arith.addf %144, %145 : vector<2x128xf32>
    %cst_60 = arith.constant 5.000000e-01 : f32
    %147 = vector.broadcast %cst_60 : f32 to vector<2x128xf32>
    %148 = arith.mulf %147, %146 : vector<2x128xf32>
    %149 = arith.select %5, %144, %148 : vector<2x128xi1>, vector<2x128xf32>
    %c96_i32_61 = arith.constant 96 : i32
    %150 = tpu.dynamic_rotate %149 by %c96_i32_61 dim 1 : vector<2x128xf32>, i32 -> vector<2x128xf32>
    %c64_i32_62 = arith.constant 64 : i32
    %151 = tpu.dynamic_rotate %149 by %c64_i32_62 dim 1 : vector<2x128xf32>, i32 -> vector<2x128xf32>
    %c32_i32_63 = arith.constant 32 : i32
    %152 = tpu.dynamic_rotate %149 by %c32_i32_63 dim 1 : vector<2x128xf32>, i32 -> vector<2x128xf32>
    %153 = arith.mulf %150, %135 : vector<2x128xf32>
    %154 = arith.mulf %149, %151 : vector<2x128xf32>
    %155 = arith.addf %153, %154 : vector<2x128xf32>
    %156 = math.tanh %155 : vector<2x128xf32>
    %157 = arith.mulf %152, %156 : vector<2x128xf32>
    %158 = arith.truncf %157 : vector<2x128xf32> to vector<2x128xbf16>
    %159 = vector.extract_strided_slice %15 {offsets = [14, 0], sizes = [2, 128], strides = [1, 1]} : vector<16x128xf32> to vector<2x128xf32>
    %c0_64 = arith.constant 0 : index
    %c0_65 = arith.constant 0 : index
    %160 = vector.load %arg2[%c0_64, %c0_65] : memref<128x128xbf16, #tpu.memory_space<vmem>>, vector<128x128xbf16>
    %cst_66 = arith.constant dense<0.000000e+00> : vector<2x128xf32>
    %161 = tpu.matmul %158, %160, %cst_66 {dimension_numbers = #tpu.dot_dimension_numbers<[1], [0], [0], [1], [0, 0, 1, 1], [], []>} : vector<2x128xbf16>, vector<128x128xbf16>, vector<2x128xf32> -> vector<2x128xf32>
    %162 = arith.addf %159, %161 : vector<2x128xf32>
    %163 = arith.mulf %162, %8 : vector<2x128xf32>
    %164 = math.tanh %163 : vector<2x128xf32>
    %cst_67 = arith.constant 1.000000e+00 : f32
    %165 = vector.broadcast %cst_67 : f32 to vector<2x128xf32>
    %166 = arith.addf %164, %165 : vector<2x128xf32>
    %cst_68 = arith.constant 5.000000e-01 : f32
    %167 = vector.broadcast %cst_68 : f32 to vector<2x128xf32>
    %168 = arith.mulf %167, %166 : vector<2x128xf32>
    %169 = arith.select %5, %164, %168 : vector<2x128xi1>, vector<2x128xf32>
    %c96_i32_69 = arith.constant 96 : i32
    %170 = tpu.dynamic_rotate %169 by %c96_i32_69 dim 1 : vector<2x128xf32>, i32 -> vector<2x128xf32>
    %c64_i32_70 = arith.constant 64 : i32
    %171 = tpu.dynamic_rotate %169 by %c64_i32_70 dim 1 : vector<2x128xf32>, i32 -> vector<2x128xf32>
    %c32_i32_71 = arith.constant 32 : i32
    %172 = tpu.dynamic_rotate %169 by %c32_i32_71 dim 1 : vector<2x128xf32>, i32 -> vector<2x128xf32>
    %173 = arith.mulf %170, %155 : vector<2x128xf32>
    %174 = arith.mulf %169, %171 : vector<2x128xf32>
    %175 = arith.addf %173, %174 : vector<2x128xf32>
    %176 = math.tanh %175 : vector<2x128xf32>
    %177 = arith.mulf %172, %176 : vector<2x128xf32>
    %178 = arith.truncf %177 : vector<2x128xf32> to vector<2x128xbf16>
    %179 = tpu.concatenate %38, %58, %78, %98, %118, %138, %158, %178 in 0 : vector<2x128xbf16>, vector<2x128xbf16>, vector<2x128xbf16>, vector<2x128xbf16>, vector<2x128xbf16>, vector<2x128xbf16>, vector<2x128xbf16>, vector<2x128xbf16> -> vector<16x128xbf16>
    %c0_72 = arith.constant 0 : index
    %c0_73 = arith.constant 0 : index
    %180 = vector.load %arg4[%c0_72, %c0_73] : memref<128x128xbf16, #tpu.memory_space<vmem>>, vector<128x128xbf16>
    %cst_74 = arith.constant dense<0.000000e+00> : vector<16x128xf32>
    %181 = tpu.matmul %179, %180, %cst_74 {dimension_numbers = #tpu.dot_dimension_numbers<[1], [0], [0], [1], [0, 0, 1, 1], [], []>} : vector<16x128xbf16>, vector<128x128xbf16>, vector<16x128xf32> -> vector<16x128xf32>
    %c0_75 = arith.constant 0 : index
    %c0_76 = arith.constant 0 : index
    %182 = vector.load %arg6[%c0_75, %c0_76] : memref<1x128xf32, #tpu.memory_space<vmem>>, vector<1x128xf32>
    %183 = vector.broadcast %182 : vector<1x128xf32> to vector<16x128xf32>
    %184 = arith.addf %181, %183 : vector<16x128xf32>
    %cst_77 = arith.constant 0.000000e+00 : f32
    %185 = vector.broadcast %cst_77 : f32 to vector<2x128xf32>
    %cst_78 = arith.constant 0.000000e+00 : f32
    %186 = vector.broadcast %cst_78 : f32 to vector<2x128xf32>
    %187 = arith.truncf %185 : vector<2x128xf32> to vector<2x128xbf16>
    %188 = vector.extract_strided_slice %184 {offsets = [0, 0], sizes = [2, 128], strides = [1, 1]} : vector<16x128xf32> to vector<2x128xf32>
    %c0_79 = arith.constant 0 : index
    %c0_80 = arith.constant 0 : index
    %189 = vector.load %arg5[%c0_79, %c0_80] : memref<128x128xbf16, #tpu.memory_space<vmem>>, vector<128x128xbf16>
    %cst_81 = arith.constant dense<0.000000e+00> : vector<2x128xf32>
    %190 = tpu.matmul %187, %189, %cst_81 {dimension_numbers = #tpu.dot_dimension_numbers<[1], [0], [0], [1], [0, 0, 1, 1], [], []>} : vector<2x128xbf16>, vector<128x128xbf16>, vector<2x128xf32> -> vector<2x128xf32>
    %191 = arith.addf %188, %190 : vector<2x128xf32>
    %192 = arith.mulf %191, %8 : vector<2x128xf32>
    %193 = math.tanh %192 : vector<2x128xf32>
    %cst_82 = arith.constant 1.000000e+00 : f32
    %194 = vector.broadcast %cst_82 : f32 to vector<2x128xf32>
    %195 = arith.addf %193, %194 : vector<2x128xf32>
    %cst_83 = arith.constant 5.000000e-01 : f32
    %196 = vector.broadcast %cst_83 : f32 to vector<2x128xf32>
    %197 = arith.mulf %196, %195 : vector<2x128xf32>
    %198 = arith.select %5, %193, %197 : vector<2x128xi1>, vector<2x128xf32>
    %c96_i32_84 = arith.constant 96 : i32
    %199 = tpu.dynamic_rotate %198 by %c96_i32_84 dim 1 : vector<2x128xf32>, i32 -> vector<2x128xf32>
    %c64_i32_85 = arith.constant 64 : i32
    %200 = tpu.dynamic_rotate %198 by %c64_i32_85 dim 1 : vector<2x128xf32>, i32 -> vector<2x128xf32>
    %c32_i32_86 = arith.constant 32 : i32
    %201 = tpu.dynamic_rotate %198 by %c32_i32_86 dim 1 : vector<2x128xf32>, i32 -> vector<2x128xf32>
    %202 = arith.mulf %199, %186 : vector<2x128xf32>
    %203 = arith.mulf %198, %200 : vector<2x128xf32>
    %204 = arith.addf %202, %203 : vector<2x128xf32>
    %205 = math.tanh %204 : vector<2x128xf32>
    %206 = arith.mulf %201, %205 : vector<2x128xf32>
    %207 = arith.truncf %206 : vector<2x128xf32> to vector<2x128xbf16>
    %208 = vector.extract_strided_slice %184 {offsets = [2, 0], sizes = [2, 128], strides = [1, 1]} : vector<16x128xf32> to vector<2x128xf32>
    %c0_87 = arith.constant 0 : index
    %c0_88 = arith.constant 0 : index
    %209 = vector.load %arg5[%c0_87, %c0_88] : memref<128x128xbf16, #tpu.memory_space<vmem>>, vector<128x128xbf16>
    %cst_89 = arith.constant dense<0.000000e+00> : vector<2x128xf32>
    %210 = tpu.matmul %207, %209, %cst_89 {dimension_numbers = #tpu.dot_dimension_numbers<[1], [0], [0], [1], [0, 0, 1, 1], [], []>} : vector<2x128xbf16>, vector<128x128xbf16>, vector<2x128xf32> -> vector<2x128xf32>
    %211 = arith.addf %208, %210 : vector<2x128xf32>
    %212 = arith.mulf %211, %8 : vector<2x128xf32>
    %213 = math.tanh %212 : vector<2x128xf32>
    %cst_90 = arith.constant 1.000000e+00 : f32
    %214 = vector.broadcast %cst_90 : f32 to vector<2x128xf32>
    %215 = arith.addf %213, %214 : vector<2x128xf32>
    %cst_91 = arith.constant 5.000000e-01 : f32
    %216 = vector.broadcast %cst_91 : f32 to vector<2x128xf32>
    %217 = arith.mulf %216, %215 : vector<2x128xf32>
    %218 = arith.select %5, %213, %217 : vector<2x128xi1>, vector<2x128xf32>
    %c96_i32_92 = arith.constant 96 : i32
    %219 = tpu.dynamic_rotate %218 by %c96_i32_92 dim 1 : vector<2x128xf32>, i32 -> vector<2x128xf32>
    %c64_i32_93 = arith.constant 64 : i32
    %220 = tpu.dynamic_rotate %218 by %c64_i32_93 dim 1 : vector<2x128xf32>, i32 -> vector<2x128xf32>
    %c32_i32_94 = arith.constant 32 : i32
    %221 = tpu.dynamic_rotate %218 by %c32_i32_94 dim 1 : vector<2x128xf32>, i32 -> vector<2x128xf32>
    %222 = arith.mulf %219, %204 : vector<2x128xf32>
    %223 = arith.mulf %218, %220 : vector<2x128xf32>
    %224 = arith.addf %222, %223 : vector<2x128xf32>
    %225 = math.tanh %224 : vector<2x128xf32>
    %226 = arith.mulf %221, %225 : vector<2x128xf32>
    %227 = arith.truncf %226 : vector<2x128xf32> to vector<2x128xbf16>
    %228 = vector.extract_strided_slice %184 {offsets = [4, 0], sizes = [2, 128], strides = [1, 1]} : vector<16x128xf32> to vector<2x128xf32>
    %c0_95 = arith.constant 0 : index
    %c0_96 = arith.constant 0 : index
    %229 = vector.load %arg5[%c0_95, %c0_96] : memref<128x128xbf16, #tpu.memory_space<vmem>>, vector<128x128xbf16>
    %cst_97 = arith.constant dense<0.000000e+00> : vector<2x128xf32>
    %230 = tpu.matmul %227, %229, %cst_97 {dimension_numbers = #tpu.dot_dimension_numbers<[1], [0], [0], [1], [0, 0, 1, 1], [], []>} : vector<2x128xbf16>, vector<128x128xbf16>, vector<2x128xf32> -> vector<2x128xf32>
    %231 = arith.addf %228, %230 : vector<2x128xf32>
    %232 = arith.mulf %231, %8 : vector<2x128xf32>
    %233 = math.tanh %232 : vector<2x128xf32>
    %cst_98 = arith.constant 1.000000e+00 : f32
    %234 = vector.broadcast %cst_98 : f32 to vector<2x128xf32>
    %235 = arith.addf %233, %234 : vector<2x128xf32>
    %cst_99 = arith.constant 5.000000e-01 : f32
    %236 = vector.broadcast %cst_99 : f32 to vector<2x128xf32>
    %237 = arith.mulf %236, %235 : vector<2x128xf32>
    %238 = arith.select %5, %233, %237 : vector<2x128xi1>, vector<2x128xf32>
    %c96_i32_100 = arith.constant 96 : i32
    %239 = tpu.dynamic_rotate %238 by %c96_i32_100 dim 1 : vector<2x128xf32>, i32 -> vector<2x128xf32>
    %c64_i32_101 = arith.constant 64 : i32
    %240 = tpu.dynamic_rotate %238 by %c64_i32_101 dim 1 : vector<2x128xf32>, i32 -> vector<2x128xf32>
    %c32_i32_102 = arith.constant 32 : i32
    %241 = tpu.dynamic_rotate %238 by %c32_i32_102 dim 1 : vector<2x128xf32>, i32 -> vector<2x128xf32>
    %242 = arith.mulf %239, %224 : vector<2x128xf32>
    %243 = arith.mulf %238, %240 : vector<2x128xf32>
    %244 = arith.addf %242, %243 : vector<2x128xf32>
    %245 = math.tanh %244 : vector<2x128xf32>
    %246 = arith.mulf %241, %245 : vector<2x128xf32>
    %247 = arith.truncf %246 : vector<2x128xf32> to vector<2x128xbf16>
    %248 = vector.extract_strided_slice %184 {offsets = [6, 0], sizes = [2, 128], strides = [1, 1]} : vector<16x128xf32> to vector<2x128xf32>
    %c0_103 = arith.constant 0 : index
    %c0_104 = arith.constant 0 : index
    %249 = vector.load %arg5[%c0_103, %c0_104] : memref<128x128xbf16, #tpu.memory_space<vmem>>, vector<128x128xbf16>
    %cst_105 = arith.constant dense<0.000000e+00> : vector<2x128xf32>
    %250 = tpu.matmul %247, %249, %cst_105 {dimension_numbers = #tpu.dot_dimension_numbers<[1], [0], [0], [1], [0, 0, 1, 1], [], []>} : vector<2x128xbf16>, vector<128x128xbf16>, vector<2x128xf32> -> vector<2x128xf32>
    %251 = arith.addf %248, %250 : vector<2x128xf32>
    %252 = arith.mulf %251, %8 : vector<2x128xf32>
    %253 = math.tanh %252 : vector<2x128xf32>
    %cst_106 = arith.constant 1.000000e+00 : f32
    %254 = vector.broadcast %cst_106 : f32 to vector<2x128xf32>
    %255 = arith.addf %253, %254 : vector<2x128xf32>
    %cst_107 = arith.constant 5.000000e-01 : f32
    %256 = vector.broadcast %cst_107 : f32 to vector<2x128xf32>
    %257 = arith.mulf %256, %255 : vector<2x128xf32>
    %258 = arith.select %5, %253, %257 : vector<2x128xi1>, vector<2x128xf32>
    %c96_i32_108 = arith.constant 96 : i32
    %259 = tpu.dynamic_rotate %258 by %c96_i32_108 dim 1 : vector<2x128xf32>, i32 -> vector<2x128xf32>
    %c64_i32_109 = arith.constant 64 : i32
    %260 = tpu.dynamic_rotate %258 by %c64_i32_109 dim 1 : vector<2x128xf32>, i32 -> vector<2x128xf32>
    %c32_i32_110 = arith.constant 32 : i32
    %261 = tpu.dynamic_rotate %258 by %c32_i32_110 dim 1 : vector<2x128xf32>, i32 -> vector<2x128xf32>
    %262 = arith.mulf %259, %244 : vector<2x128xf32>
    %263 = arith.mulf %258, %260 : vector<2x128xf32>
    %264 = arith.addf %262, %263 : vector<2x128xf32>
    %265 = math.tanh %264 : vector<2x128xf32>
    %266 = arith.mulf %261, %265 : vector<2x128xf32>
    %267 = arith.truncf %266 : vector<2x128xf32> to vector<2x128xbf16>
    %268 = vector.extract_strided_slice %184 {offsets = [8, 0], sizes = [2, 128], strides = [1, 1]} : vector<16x128xf32> to vector<2x128xf32>
    %c0_111 = arith.constant 0 : index
    %c0_112 = arith.constant 0 : index
    %269 = vector.load %arg5[%c0_111, %c0_112] : memref<128x128xbf16, #tpu.memory_space<vmem>>, vector<128x128xbf16>
    %cst_113 = arith.constant dense<0.000000e+00> : vector<2x128xf32>
    %270 = tpu.matmul %267, %269, %cst_113 {dimension_numbers = #tpu.dot_dimension_numbers<[1], [0], [0], [1], [0, 0, 1, 1], [], []>} : vector<2x128xbf16>, vector<128x128xbf16>, vector<2x128xf32> -> vector<2x128xf32>
    %271 = arith.addf %268, %270 : vector<2x128xf32>
    %272 = arith.mulf %271, %8 : vector<2x128xf32>
    %273 = math.tanh %272 : vector<2x128xf32>
    %cst_114 = arith.constant 1.000000e+00 : f32
    %274 = vector.broadcast %cst_114 : f32 to vector<2x128xf32>
    %275 = arith.addf %273, %274 : vector<2x128xf32>
    %cst_115 = arith.constant 5.000000e-01 : f32
    %276 = vector.broadcast %cst_115 : f32 to vector<2x128xf32>
    %277 = arith.mulf %276, %275 : vector<2x128xf32>
    %278 = arith.select %5, %273, %277 : vector<2x128xi1>, vector<2x128xf32>
    %c96_i32_116 = arith.constant 96 : i32
    %279 = tpu.dynamic_rotate %278 by %c96_i32_116 dim 1 : vector<2x128xf32>, i32 -> vector<2x128xf32>
    %c64_i32_117 = arith.constant 64 : i32
    %280 = tpu.dynamic_rotate %278 by %c64_i32_117 dim 1 : vector<2x128xf32>, i32 -> vector<2x128xf32>
    %c32_i32_118 = arith.constant 32 : i32
    %281 = tpu.dynamic_rotate %278 by %c32_i32_118 dim 1 : vector<2x128xf32>, i32 -> vector<2x128xf32>
    %282 = arith.mulf %279, %264 : vector<2x128xf32>
    %283 = arith.mulf %278, %280 : vector<2x128xf32>
    %284 = arith.addf %282, %283 : vector<2x128xf32>
    %285 = math.tanh %284 : vector<2x128xf32>
    %286 = arith.mulf %281, %285 : vector<2x128xf32>
    %287 = arith.truncf %286 : vector<2x128xf32> to vector<2x128xbf16>
    %288 = vector.extract_strided_slice %184 {offsets = [10, 0], sizes = [2, 128], strides = [1, 1]} : vector<16x128xf32> to vector<2x128xf32>
    %c0_119 = arith.constant 0 : index
    %c0_120 = arith.constant 0 : index
    %289 = vector.load %arg5[%c0_119, %c0_120] : memref<128x128xbf16, #tpu.memory_space<vmem>>, vector<128x128xbf16>
    %cst_121 = arith.constant dense<0.000000e+00> : vector<2x128xf32>
    %290 = tpu.matmul %287, %289, %cst_121 {dimension_numbers = #tpu.dot_dimension_numbers<[1], [0], [0], [1], [0, 0, 1, 1], [], []>} : vector<2x128xbf16>, vector<128x128xbf16>, vector<2x128xf32> -> vector<2x128xf32>
    %291 = arith.addf %288, %290 : vector<2x128xf32>
    %292 = arith.mulf %291, %8 : vector<2x128xf32>
    %293 = math.tanh %292 : vector<2x128xf32>
    %cst_122 = arith.constant 1.000000e+00 : f32
    %294 = vector.broadcast %cst_122 : f32 to vector<2x128xf32>
    %295 = arith.addf %293, %294 : vector<2x128xf32>
    %cst_123 = arith.constant 5.000000e-01 : f32
    %296 = vector.broadcast %cst_123 : f32 to vector<2x128xf32>
    %297 = arith.mulf %296, %295 : vector<2x128xf32>
    %298 = arith.select %5, %293, %297 : vector<2x128xi1>, vector<2x128xf32>
    %c96_i32_124 = arith.constant 96 : i32
    %299 = tpu.dynamic_rotate %298 by %c96_i32_124 dim 1 : vector<2x128xf32>, i32 -> vector<2x128xf32>
    %c64_i32_125 = arith.constant 64 : i32
    %300 = tpu.dynamic_rotate %298 by %c64_i32_125 dim 1 : vector<2x128xf32>, i32 -> vector<2x128xf32>
    %c32_i32_126 = arith.constant 32 : i32
    %301 = tpu.dynamic_rotate %298 by %c32_i32_126 dim 1 : vector<2x128xf32>, i32 -> vector<2x128xf32>
    %302 = arith.mulf %299, %284 : vector<2x128xf32>
    %303 = arith.mulf %298, %300 : vector<2x128xf32>
    %304 = arith.addf %302, %303 : vector<2x128xf32>
    %305 = math.tanh %304 : vector<2x128xf32>
    %306 = arith.mulf %301, %305 : vector<2x128xf32>
    %307 = arith.truncf %306 : vector<2x128xf32> to vector<2x128xbf16>
    %308 = vector.extract_strided_slice %184 {offsets = [12, 0], sizes = [2, 128], strides = [1, 1]} : vector<16x128xf32> to vector<2x128xf32>
    %c0_127 = arith.constant 0 : index
    %c0_128 = arith.constant 0 : index
    %309 = vector.load %arg5[%c0_127, %c0_128] : memref<128x128xbf16, #tpu.memory_space<vmem>>, vector<128x128xbf16>
    %cst_129 = arith.constant dense<0.000000e+00> : vector<2x128xf32>
    %310 = tpu.matmul %307, %309, %cst_129 {dimension_numbers = #tpu.dot_dimension_numbers<[1], [0], [0], [1], [0, 0, 1, 1], [], []>} : vector<2x128xbf16>, vector<128x128xbf16>, vector<2x128xf32> -> vector<2x128xf32>
    %311 = arith.addf %308, %310 : vector<2x128xf32>
    %312 = arith.mulf %311, %8 : vector<2x128xf32>
    %313 = math.tanh %312 : vector<2x128xf32>
    %cst_130 = arith.constant 1.000000e+00 : f32
    %314 = vector.broadcast %cst_130 : f32 to vector<2x128xf32>
    %315 = arith.addf %313, %314 : vector<2x128xf32>
    %cst_131 = arith.constant 5.000000e-01 : f32
    %316 = vector.broadcast %cst_131 : f32 to vector<2x128xf32>
    %317 = arith.mulf %316, %315 : vector<2x128xf32>
    %318 = arith.select %5, %313, %317 : vector<2x128xi1>, vector<2x128xf32>
    %c96_i32_132 = arith.constant 96 : i32
    %319 = tpu.dynamic_rotate %318 by %c96_i32_132 dim 1 : vector<2x128xf32>, i32 -> vector<2x128xf32>
    %c64_i32_133 = arith.constant 64 : i32
    %320 = tpu.dynamic_rotate %318 by %c64_i32_133 dim 1 : vector<2x128xf32>, i32 -> vector<2x128xf32>
    %c32_i32_134 = arith.constant 32 : i32
    %321 = tpu.dynamic_rotate %318 by %c32_i32_134 dim 1 : vector<2x128xf32>, i32 -> vector<2x128xf32>
    %322 = arith.mulf %319, %304 : vector<2x128xf32>
    %323 = arith.mulf %318, %320 : vector<2x128xf32>
    %324 = arith.addf %322, %323 : vector<2x128xf32>
    %325 = math.tanh %324 : vector<2x128xf32>
    %326 = arith.mulf %321, %325 : vector<2x128xf32>
    %327 = arith.truncf %326 : vector<2x128xf32> to vector<2x128xbf16>
    %328 = vector.extract_strided_slice %184 {offsets = [14, 0], sizes = [2, 128], strides = [1, 1]} : vector<16x128xf32> to vector<2x128xf32>
    %c0_135 = arith.constant 0 : index
    %c0_136 = arith.constant 0 : index
    %329 = vector.load %arg5[%c0_135, %c0_136] : memref<128x128xbf16, #tpu.memory_space<vmem>>, vector<128x128xbf16>
    %cst_137 = arith.constant dense<0.000000e+00> : vector<2x128xf32>
    %330 = tpu.matmul %327, %329, %cst_137 {dimension_numbers = #tpu.dot_dimension_numbers<[1], [0], [0], [1], [0, 0, 1, 1], [], []>} : vector<2x128xbf16>, vector<128x128xbf16>, vector<2x128xf32> -> vector<2x128xf32>
    %331 = arith.addf %328, %330 : vector<2x128xf32>
    %332 = arith.mulf %331, %8 : vector<2x128xf32>
    %333 = math.tanh %332 : vector<2x128xf32>
    %cst_138 = arith.constant 1.000000e+00 : f32
    %334 = vector.broadcast %cst_138 : f32 to vector<2x128xf32>
    %335 = arith.addf %333, %334 : vector<2x128xf32>
    %cst_139 = arith.constant 5.000000e-01 : f32
    %336 = vector.broadcast %cst_139 : f32 to vector<2x128xf32>
    %337 = arith.mulf %336, %335 : vector<2x128xf32>
    %338 = arith.select %5, %333, %337 : vector<2x128xi1>, vector<2x128xf32>
    %c96_i32_140 = arith.constant 96 : i32
    %339 = tpu.dynamic_rotate %338 by %c96_i32_140 dim 1 : vector<2x128xf32>, i32 -> vector<2x128xf32>
    %c64_i32_141 = arith.constant 64 : i32
    %340 = tpu.dynamic_rotate %338 by %c64_i32_141 dim 1 : vector<2x128xf32>, i32 -> vector<2x128xf32>
    %c32_i32_142 = arith.constant 32 : i32
    %341 = tpu.dynamic_rotate %338 by %c32_i32_142 dim 1 : vector<2x128xf32>, i32 -> vector<2x128xf32>
    %342 = arith.mulf %339, %324 : vector<2x128xf32>
    %343 = arith.mulf %338, %340 : vector<2x128xf32>
    %344 = arith.addf %342, %343 : vector<2x128xf32>
    %345 = math.tanh %344 : vector<2x128xf32>
    %346 = arith.mulf %341, %345 : vector<2x128xf32>
    %347 = arith.truncf %346 : vector<2x128xf32> to vector<2x128xbf16>
    %348 = tpu.concatenate %207, %227, %247, %267, %287, %307, %327, %347 in 0 : vector<2x128xbf16>, vector<2x128xbf16>, vector<2x128xbf16>, vector<2x128xbf16>, vector<2x128xbf16>, vector<2x128xbf16>, vector<2x128xbf16>, vector<2x128xbf16> -> vector<16x128xbf16>
    %c0_143 = arith.constant 0 : index
    %c0_144 = arith.constant 0 : index
    %349 = vector.load %arg7[%c0_143, %c0_144] : memref<128x128xbf16, #tpu.memory_space<vmem>>, vector<128x128xbf16>
    %cst_145 = arith.constant dense<0.000000e+00> : vector<16x128xf32>
    %350 = tpu.matmul %348, %349, %cst_145 {dimension_numbers = #tpu.dot_dimension_numbers<[1], [0], [0], [1], [0, 0, 1, 1], [], []>} : vector<16x128xbf16>, vector<128x128xbf16>, vector<16x128xf32> -> vector<16x128xf32>
    %c0_146 = arith.constant 0 : index
    %c0_147 = arith.constant 0 : index
    %351 = vector.load %arg9[%c0_146, %c0_147] : memref<1x128xf32, #tpu.memory_space<vmem>>, vector<1x128xf32>
    %352 = vector.broadcast %351 : vector<1x128xf32> to vector<16x128xf32>
    %353 = arith.addf %350, %352 : vector<16x128xf32>
    %cst_148 = arith.constant 0.000000e+00 : f32
    %354 = vector.broadcast %cst_148 : f32 to vector<2x128xf32>
    %cst_149 = arith.constant 0.000000e+00 : f32
    %355 = vector.broadcast %cst_149 : f32 to vector<2x128xf32>
    %356 = arith.truncf %354 : vector<2x128xf32> to vector<2x128xbf16>
    %357 = vector.extract_strided_slice %353 {offsets = [0, 0], sizes = [2, 128], strides = [1, 1]} : vector<16x128xf32> to vector<2x128xf32>
    %c0_150 = arith.constant 0 : index
    %c0_151 = arith.constant 0 : index
    %358 = vector.load %arg8[%c0_150, %c0_151] : memref<128x128xbf16, #tpu.memory_space<vmem>>, vector<128x128xbf16>
    %cst_152 = arith.constant dense<0.000000e+00> : vector<2x128xf32>
    %359 = tpu.matmul %356, %358, %cst_152 {dimension_numbers = #tpu.dot_dimension_numbers<[1], [0], [0], [1], [0, 0, 1, 1], [], []>} : vector<2x128xbf16>, vector<128x128xbf16>, vector<2x128xf32> -> vector<2x128xf32>
    %360 = arith.addf %357, %359 : vector<2x128xf32>
    %361 = arith.mulf %360, %8 : vector<2x128xf32>
    %362 = math.tanh %361 : vector<2x128xf32>
    %cst_153 = arith.constant 1.000000e+00 : f32
    %363 = vector.broadcast %cst_153 : f32 to vector<2x128xf32>
    %364 = arith.addf %362, %363 : vector<2x128xf32>
    %cst_154 = arith.constant 5.000000e-01 : f32
    %365 = vector.broadcast %cst_154 : f32 to vector<2x128xf32>
    %366 = arith.mulf %365, %364 : vector<2x128xf32>
    %367 = arith.select %5, %362, %366 : vector<2x128xi1>, vector<2x128xf32>
    %c96_i32_155 = arith.constant 96 : i32
    %368 = tpu.dynamic_rotate %367 by %c96_i32_155 dim 1 : vector<2x128xf32>, i32 -> vector<2x128xf32>
    %c64_i32_156 = arith.constant 64 : i32
    %369 = tpu.dynamic_rotate %367 by %c64_i32_156 dim 1 : vector<2x128xf32>, i32 -> vector<2x128xf32>
    %c32_i32_157 = arith.constant 32 : i32
    %370 = tpu.dynamic_rotate %367 by %c32_i32_157 dim 1 : vector<2x128xf32>, i32 -> vector<2x128xf32>
    %371 = arith.mulf %368, %355 : vector<2x128xf32>
    %372 = arith.mulf %367, %369 : vector<2x128xf32>
    %373 = arith.addf %371, %372 : vector<2x128xf32>
    %374 = math.tanh %373 : vector<2x128xf32>
    %375 = arith.mulf %370, %374 : vector<2x128xf32>
    %376 = arith.truncf %375 : vector<2x128xf32> to vector<2x128xbf16>
    %377 = vector.extract_strided_slice %353 {offsets = [2, 0], sizes = [2, 128], strides = [1, 1]} : vector<16x128xf32> to vector<2x128xf32>
    %c0_158 = arith.constant 0 : index
    %c0_159 = arith.constant 0 : index
    %378 = vector.load %arg8[%c0_158, %c0_159] : memref<128x128xbf16, #tpu.memory_space<vmem>>, vector<128x128xbf16>
    %cst_160 = arith.constant dense<0.000000e+00> : vector<2x128xf32>
    %379 = tpu.matmul %376, %378, %cst_160 {dimension_numbers = #tpu.dot_dimension_numbers<[1], [0], [0], [1], [0, 0, 1, 1], [], []>} : vector<2x128xbf16>, vector<128x128xbf16>, vector<2x128xf32> -> vector<2x128xf32>
    %380 = arith.addf %377, %379 : vector<2x128xf32>
    %381 = arith.mulf %380, %8 : vector<2x128xf32>
    %382 = math.tanh %381 : vector<2x128xf32>
    %cst_161 = arith.constant 1.000000e+00 : f32
    %383 = vector.broadcast %cst_161 : f32 to vector<2x128xf32>
    %384 = arith.addf %382, %383 : vector<2x128xf32>
    %cst_162 = arith.constant 5.000000e-01 : f32
    %385 = vector.broadcast %cst_162 : f32 to vector<2x128xf32>
    %386 = arith.mulf %385, %384 : vector<2x128xf32>
    %387 = arith.select %5, %382, %386 : vector<2x128xi1>, vector<2x128xf32>
    %c96_i32_163 = arith.constant 96 : i32
    %388 = tpu.dynamic_rotate %387 by %c96_i32_163 dim 1 : vector<2x128xf32>, i32 -> vector<2x128xf32>
    %c64_i32_164 = arith.constant 64 : i32
    %389 = tpu.dynamic_rotate %387 by %c64_i32_164 dim 1 : vector<2x128xf32>, i32 -> vector<2x128xf32>
    %c32_i32_165 = arith.constant 32 : i32
    %390 = tpu.dynamic_rotate %387 by %c32_i32_165 dim 1 : vector<2x128xf32>, i32 -> vector<2x128xf32>
    %391 = arith.mulf %388, %373 : vector<2x128xf32>
    %392 = arith.mulf %387, %389 : vector<2x128xf32>
    %393 = arith.addf %391, %392 : vector<2x128xf32>
    %394 = math.tanh %393 : vector<2x128xf32>
    %395 = arith.mulf %390, %394 : vector<2x128xf32>
    %396 = arith.truncf %395 : vector<2x128xf32> to vector<2x128xbf16>
    %397 = vector.extract_strided_slice %353 {offsets = [4, 0], sizes = [2, 128], strides = [1, 1]} : vector<16x128xf32> to vector<2x128xf32>
    %c0_166 = arith.constant 0 : index
    %c0_167 = arith.constant 0 : index
    %398 = vector.load %arg8[%c0_166, %c0_167] : memref<128x128xbf16, #tpu.memory_space<vmem>>, vector<128x128xbf16>
    %cst_168 = arith.constant dense<0.000000e+00> : vector<2x128xf32>
    %399 = tpu.matmul %396, %398, %cst_168 {dimension_numbers = #tpu.dot_dimension_numbers<[1], [0], [0], [1], [0, 0, 1, 1], [], []>} : vector<2x128xbf16>, vector<128x128xbf16>, vector<2x128xf32> -> vector<2x128xf32>
    %400 = arith.addf %397, %399 : vector<2x128xf32>
    %401 = arith.mulf %400, %8 : vector<2x128xf32>
    %402 = math.tanh %401 : vector<2x128xf32>
    %cst_169 = arith.constant 1.000000e+00 : f32
    %403 = vector.broadcast %cst_169 : f32 to vector<2x128xf32>
    %404 = arith.addf %402, %403 : vector<2x128xf32>
    %cst_170 = arith.constant 5.000000e-01 : f32
    %405 = vector.broadcast %cst_170 : f32 to vector<2x128xf32>
    %406 = arith.mulf %405, %404 : vector<2x128xf32>
    %407 = arith.select %5, %402, %406 : vector<2x128xi1>, vector<2x128xf32>
    %c96_i32_171 = arith.constant 96 : i32
    %408 = tpu.dynamic_rotate %407 by %c96_i32_171 dim 1 : vector<2x128xf32>, i32 -> vector<2x128xf32>
    %c64_i32_172 = arith.constant 64 : i32
    %409 = tpu.dynamic_rotate %407 by %c64_i32_172 dim 1 : vector<2x128xf32>, i32 -> vector<2x128xf32>
    %c32_i32_173 = arith.constant 32 : i32
    %410 = tpu.dynamic_rotate %407 by %c32_i32_173 dim 1 : vector<2x128xf32>, i32 -> vector<2x128xf32>
    %411 = arith.mulf %408, %393 : vector<2x128xf32>
    %412 = arith.mulf %407, %409 : vector<2x128xf32>
    %413 = arith.addf %411, %412 : vector<2x128xf32>
    %414 = math.tanh %413 : vector<2x128xf32>
    %415 = arith.mulf %410, %414 : vector<2x128xf32>
    %416 = arith.truncf %415 : vector<2x128xf32> to vector<2x128xbf16>
    %417 = vector.extract_strided_slice %353 {offsets = [6, 0], sizes = [2, 128], strides = [1, 1]} : vector<16x128xf32> to vector<2x128xf32>
    %c0_174 = arith.constant 0 : index
    %c0_175 = arith.constant 0 : index
    %418 = vector.load %arg8[%c0_174, %c0_175] : memref<128x128xbf16, #tpu.memory_space<vmem>>, vector<128x128xbf16>
    %cst_176 = arith.constant dense<0.000000e+00> : vector<2x128xf32>
    %419 = tpu.matmul %416, %418, %cst_176 {dimension_numbers = #tpu.dot_dimension_numbers<[1], [0], [0], [1], [0, 0, 1, 1], [], []>} : vector<2x128xbf16>, vector<128x128xbf16>, vector<2x128xf32> -> vector<2x128xf32>
    %420 = arith.addf %417, %419 : vector<2x128xf32>
    %421 = arith.mulf %420, %8 : vector<2x128xf32>
    %422 = math.tanh %421 : vector<2x128xf32>
    %cst_177 = arith.constant 1.000000e+00 : f32
    %423 = vector.broadcast %cst_177 : f32 to vector<2x128xf32>
    %424 = arith.addf %422, %423 : vector<2x128xf32>
    %cst_178 = arith.constant 5.000000e-01 : f32
    %425 = vector.broadcast %cst_178 : f32 to vector<2x128xf32>
    %426 = arith.mulf %425, %424 : vector<2x128xf32>
    %427 = arith.select %5, %422, %426 : vector<2x128xi1>, vector<2x128xf32>
    %c96_i32_179 = arith.constant 96 : i32
    %428 = tpu.dynamic_rotate %427 by %c96_i32_179 dim 1 : vector<2x128xf32>, i32 -> vector<2x128xf32>
    %c64_i32_180 = arith.constant 64 : i32
    %429 = tpu.dynamic_rotate %427 by %c64_i32_180 dim 1 : vector<2x128xf32>, i32 -> vector<2x128xf32>
    %c32_i32_181 = arith.constant 32 : i32
    %430 = tpu.dynamic_rotate %427 by %c32_i32_181 dim 1 : vector<2x128xf32>, i32 -> vector<2x128xf32>
    %431 = arith.mulf %428, %413 : vector<2x128xf32>
    %432 = arith.mulf %427, %429 : vector<2x128xf32>
    %433 = arith.addf %431, %432 : vector<2x128xf32>
    %434 = math.tanh %433 : vector<2x128xf32>
    %435 = arith.mulf %430, %434 : vector<2x128xf32>
    %436 = arith.truncf %435 : vector<2x128xf32> to vector<2x128xbf16>
    %437 = vector.extract_strided_slice %353 {offsets = [8, 0], sizes = [2, 128], strides = [1, 1]} : vector<16x128xf32> to vector<2x128xf32>
    %c0_182 = arith.constant 0 : index
    %c0_183 = arith.constant 0 : index
    %438 = vector.load %arg8[%c0_182, %c0_183] : memref<128x128xbf16, #tpu.memory_space<vmem>>, vector<128x128xbf16>
    %cst_184 = arith.constant dense<0.000000e+00> : vector<2x128xf32>
    %439 = tpu.matmul %436, %438, %cst_184 {dimension_numbers = #tpu.dot_dimension_numbers<[1], [0], [0], [1], [0, 0, 1, 1], [], []>} : vector<2x128xbf16>, vector<128x128xbf16>, vector<2x128xf32> -> vector<2x128xf32>
    %440 = arith.addf %437, %439 : vector<2x128xf32>
    %441 = arith.mulf %440, %8 : vector<2x128xf32>
    %442 = math.tanh %441 : vector<2x128xf32>
    %cst_185 = arith.constant 1.000000e+00 : f32
    %443 = vector.broadcast %cst_185 : f32 to vector<2x128xf32>
    %444 = arith.addf %442, %443 : vector<2x128xf32>
    %cst_186 = arith.constant 5.000000e-01 : f32
    %445 = vector.broadcast %cst_186 : f32 to vector<2x128xf32>
    %446 = arith.mulf %445, %444 : vector<2x128xf32>
    %447 = arith.select %5, %442, %446 : vector<2x128xi1>, vector<2x128xf32>
    %c96_i32_187 = arith.constant 96 : i32
    %448 = tpu.dynamic_rotate %447 by %c96_i32_187 dim 1 : vector<2x128xf32>, i32 -> vector<2x128xf32>
    %c64_i32_188 = arith.constant 64 : i32
    %449 = tpu.dynamic_rotate %447 by %c64_i32_188 dim 1 : vector<2x128xf32>, i32 -> vector<2x128xf32>
    %c32_i32_189 = arith.constant 32 : i32
    %450 = tpu.dynamic_rotate %447 by %c32_i32_189 dim 1 : vector<2x128xf32>, i32 -> vector<2x128xf32>
    %451 = arith.mulf %448, %433 : vector<2x128xf32>
    %452 = arith.mulf %447, %449 : vector<2x128xf32>
    %453 = arith.addf %451, %452 : vector<2x128xf32>
    %454 = math.tanh %453 : vector<2x128xf32>
    %455 = arith.mulf %450, %454 : vector<2x128xf32>
    %456 = arith.truncf %455 : vector<2x128xf32> to vector<2x128xbf16>
    %457 = vector.extract_strided_slice %353 {offsets = [10, 0], sizes = [2, 128], strides = [1, 1]} : vector<16x128xf32> to vector<2x128xf32>
    %c0_190 = arith.constant 0 : index
    %c0_191 = arith.constant 0 : index
    %458 = vector.load %arg8[%c0_190, %c0_191] : memref<128x128xbf16, #tpu.memory_space<vmem>>, vector<128x128xbf16>
    %cst_192 = arith.constant dense<0.000000e+00> : vector<2x128xf32>
    %459 = tpu.matmul %456, %458, %cst_192 {dimension_numbers = #tpu.dot_dimension_numbers<[1], [0], [0], [1], [0, 0, 1, 1], [], []>} : vector<2x128xbf16>, vector<128x128xbf16>, vector<2x128xf32> -> vector<2x128xf32>
    %460 = arith.addf %457, %459 : vector<2x128xf32>
    %461 = arith.mulf %460, %8 : vector<2x128xf32>
    %462 = math.tanh %461 : vector<2x128xf32>
    %cst_193 = arith.constant 1.000000e+00 : f32
    %463 = vector.broadcast %cst_193 : f32 to vector<2x128xf32>
    %464 = arith.addf %462, %463 : vector<2x128xf32>
    %cst_194 = arith.constant 5.000000e-01 : f32
    %465 = vector.broadcast %cst_194 : f32 to vector<2x128xf32>
    %466 = arith.mulf %465, %464 : vector<2x128xf32>
    %467 = arith.select %5, %462, %466 : vector<2x128xi1>, vector<2x128xf32>
    %c96_i32_195 = arith.constant 96 : i32
    %468 = tpu.dynamic_rotate %467 by %c96_i32_195 dim 1 : vector<2x128xf32>, i32 -> vector<2x128xf32>
    %c64_i32_196 = arith.constant 64 : i32
    %469 = tpu.dynamic_rotate %467 by %c64_i32_196 dim 1 : vector<2x128xf32>, i32 -> vector<2x128xf32>
    %c32_i32_197 = arith.constant 32 : i32
    %470 = tpu.dynamic_rotate %467 by %c32_i32_197 dim 1 : vector<2x128xf32>, i32 -> vector<2x128xf32>
    %471 = arith.mulf %468, %453 : vector<2x128xf32>
    %472 = arith.mulf %467, %469 : vector<2x128xf32>
    %473 = arith.addf %471, %472 : vector<2x128xf32>
    %474 = math.tanh %473 : vector<2x128xf32>
    %475 = arith.mulf %470, %474 : vector<2x128xf32>
    %476 = arith.truncf %475 : vector<2x128xf32> to vector<2x128xbf16>
    %477 = vector.extract_strided_slice %353 {offsets = [12, 0], sizes = [2, 128], strides = [1, 1]} : vector<16x128xf32> to vector<2x128xf32>
    %c0_198 = arith.constant 0 : index
    %c0_199 = arith.constant 0 : index
    %478 = vector.load %arg8[%c0_198, %c0_199] : memref<128x128xbf16, #tpu.memory_space<vmem>>, vector<128x128xbf16>
    %cst_200 = arith.constant dense<0.000000e+00> : vector<2x128xf32>
    %479 = tpu.matmul %476, %478, %cst_200 {dimension_numbers = #tpu.dot_dimension_numbers<[1], [0], [0], [1], [0, 0, 1, 1], [], []>} : vector<2x128xbf16>, vector<128x128xbf16>, vector<2x128xf32> -> vector<2x128xf32>
    %480 = arith.addf %477, %479 : vector<2x128xf32>
    %481 = arith.mulf %480, %8 : vector<2x128xf32>
    %482 = math.tanh %481 : vector<2x128xf32>
    %cst_201 = arith.constant 1.000000e+00 : f32
    %483 = vector.broadcast %cst_201 : f32 to vector<2x128xf32>
    %484 = arith.addf %482, %483 : vector<2x128xf32>
    %cst_202 = arith.constant 5.000000e-01 : f32
    %485 = vector.broadcast %cst_202 : f32 to vector<2x128xf32>
    %486 = arith.mulf %485, %484 : vector<2x128xf32>
    %487 = arith.select %5, %482, %486 : vector<2x128xi1>, vector<2x128xf32>
    %c96_i32_203 = arith.constant 96 : i32
    %488 = tpu.dynamic_rotate %487 by %c96_i32_203 dim 1 : vector<2x128xf32>, i32 -> vector<2x128xf32>
    %c64_i32_204 = arith.constant 64 : i32
    %489 = tpu.dynamic_rotate %487 by %c64_i32_204 dim 1 : vector<2x128xf32>, i32 -> vector<2x128xf32>
    %c32_i32_205 = arith.constant 32 : i32
    %490 = tpu.dynamic_rotate %487 by %c32_i32_205 dim 1 : vector<2x128xf32>, i32 -> vector<2x128xf32>
    %491 = arith.mulf %488, %473 : vector<2x128xf32>
    %492 = arith.mulf %487, %489 : vector<2x128xf32>
    %493 = arith.addf %491, %492 : vector<2x128xf32>
    %494 = math.tanh %493 : vector<2x128xf32>
    %495 = arith.mulf %490, %494 : vector<2x128xf32>
    %496 = arith.truncf %495 : vector<2x128xf32> to vector<2x128xbf16>
    %497 = vector.extract_strided_slice %353 {offsets = [14, 0], sizes = [2, 128], strides = [1, 1]} : vector<16x128xf32> to vector<2x128xf32>
    %c0_206 = arith.constant 0 : index
    %c0_207 = arith.constant 0 : index
    %498 = vector.load %arg8[%c0_206, %c0_207] : memref<128x128xbf16, #tpu.memory_space<vmem>>, vector<128x128xbf16>
    %cst_208 = arith.constant dense<0.000000e+00> : vector<2x128xf32>
    %499 = tpu.matmul %496, %498, %cst_208 {dimension_numbers = #tpu.dot_dimension_numbers<[1], [0], [0], [1], [0, 0, 1, 1], [], []>} : vector<2x128xbf16>, vector<128x128xbf16>, vector<2x128xf32> -> vector<2x128xf32>
    %500 = arith.addf %497, %499 : vector<2x128xf32>
    %501 = arith.mulf %500, %8 : vector<2x128xf32>
    %502 = math.tanh %501 : vector<2x128xf32>
    %cst_209 = arith.constant 1.000000e+00 : f32
    %503 = vector.broadcast %cst_209 : f32 to vector<2x128xf32>
    %504 = arith.addf %502, %503 : vector<2x128xf32>
    %cst_210 = arith.constant 5.000000e-01 : f32
    %505 = vector.broadcast %cst_210 : f32 to vector<2x128xf32>
    %506 = arith.mulf %505, %504 : vector<2x128xf32>
    %507 = arith.select %5, %502, %506 : vector<2x128xi1>, vector<2x128xf32>
    %c96_i32_211 = arith.constant 96 : i32
    %508 = tpu.dynamic_rotate %507 by %c96_i32_211 dim 1 : vector<2x128xf32>, i32 -> vector<2x128xf32>
    %c64_i32_212 = arith.constant 64 : i32
    %509 = tpu.dynamic_rotate %507 by %c64_i32_212 dim 1 : vector<2x128xf32>, i32 -> vector<2x128xf32>
    %c32_i32_213 = arith.constant 32 : i32
    %510 = tpu.dynamic_rotate %507 by %c32_i32_213 dim 1 : vector<2x128xf32>, i32 -> vector<2x128xf32>
    %511 = arith.mulf %508, %493 : vector<2x128xf32>
    %512 = arith.mulf %507, %509 : vector<2x128xf32>
    %513 = arith.addf %511, %512 : vector<2x128xf32>
    %514 = math.tanh %513 : vector<2x128xf32>
    %515 = arith.mulf %510, %514 : vector<2x128xf32>
    %516 = arith.truncf %515 : vector<2x128xf32> to vector<2x128xbf16>
    %517 = tpu.concatenate %376, %396, %416, %436, %456, %476, %496, %516 in 0 : vector<2x128xbf16>, vector<2x128xbf16>, vector<2x128xbf16>, vector<2x128xbf16>, vector<2x128xbf16>, vector<2x128xbf16>, vector<2x128xbf16>, vector<2x128xbf16> -> vector<16x128xbf16>
    %c0_214 = arith.constant 0 : index
    %c0_215 = arith.constant 0 : index
    %518 = vector.load %arg10[%c0_214, %c0_215] : memref<128x128xbf16, #tpu.memory_space<vmem>>, vector<128x128xbf16>
    %cst_216 = arith.constant dense<0.000000e+00> : vector<16x128xf32>
    %519 = tpu.matmul %517, %518, %cst_216 {dimension_numbers = #tpu.dot_dimension_numbers<[1], [0], [0], [1], [0, 0, 1, 1], [], []>} : vector<16x128xbf16>, vector<128x128xbf16>, vector<16x128xf32> -> vector<16x128xf32>
    %c0_217 = arith.constant 0 : index
    %c0_218 = arith.constant 0 : index
    %520 = vector.load %arg12[%c0_217, %c0_218] : memref<1x128xf32, #tpu.memory_space<vmem>>, vector<1x128xf32>
    %521 = vector.broadcast %520 : vector<1x128xf32> to vector<16x128xf32>
    %522 = arith.addf %519, %521 : vector<16x128xf32>
    %cst_219 = arith.constant 0.000000e+00 : f32
    %523 = vector.broadcast %cst_219 : f32 to vector<2x128xf32>
    %cst_220 = arith.constant 0.000000e+00 : f32
    %524 = vector.broadcast %cst_220 : f32 to vector<2x128xf32>
    %525 = arith.truncf %523 : vector<2x128xf32> to vector<2x128xbf16>
    %526 = vector.extract_strided_slice %522 {offsets = [0, 0], sizes = [2, 128], strides = [1, 1]} : vector<16x128xf32> to vector<2x128xf32>
    %c0_221 = arith.constant 0 : index
    %c0_222 = arith.constant 0 : index
    %527 = vector.load %arg11[%c0_221, %c0_222] : memref<128x128xbf16, #tpu.memory_space<vmem>>, vector<128x128xbf16>
    %cst_223 = arith.constant dense<0.000000e+00> : vector<2x128xf32>
    %528 = tpu.matmul %525, %527, %cst_223 {dimension_numbers = #tpu.dot_dimension_numbers<[1], [0], [0], [1], [0, 0, 1, 1], [], []>} : vector<2x128xbf16>, vector<128x128xbf16>, vector<2x128xf32> -> vector<2x128xf32>
    %529 = arith.addf %526, %528 : vector<2x128xf32>
    %530 = arith.mulf %529, %8 : vector<2x128xf32>
    %531 = math.tanh %530 : vector<2x128xf32>
    %cst_224 = arith.constant 1.000000e+00 : f32
    %532 = vector.broadcast %cst_224 : f32 to vector<2x128xf32>
    %533 = arith.addf %531, %532 : vector<2x128xf32>
    %cst_225 = arith.constant 5.000000e-01 : f32
    %534 = vector.broadcast %cst_225 : f32 to vector<2x128xf32>
    %535 = arith.mulf %534, %533 : vector<2x128xf32>
    %536 = arith.select %5, %531, %535 : vector<2x128xi1>, vector<2x128xf32>
    %c96_i32_226 = arith.constant 96 : i32
    %537 = tpu.dynamic_rotate %536 by %c96_i32_226 dim 1 : vector<2x128xf32>, i32 -> vector<2x128xf32>
    %c64_i32_227 = arith.constant 64 : i32
    %538 = tpu.dynamic_rotate %536 by %c64_i32_227 dim 1 : vector<2x128xf32>, i32 -> vector<2x128xf32>
    %c32_i32_228 = arith.constant 32 : i32
    %539 = tpu.dynamic_rotate %536 by %c32_i32_228 dim 1 : vector<2x128xf32>, i32 -> vector<2x128xf32>
    %540 = arith.mulf %537, %524 : vector<2x128xf32>
    %541 = arith.mulf %536, %538 : vector<2x128xf32>
    %542 = arith.addf %540, %541 : vector<2x128xf32>
    %543 = math.tanh %542 : vector<2x128xf32>
    %544 = arith.mulf %539, %543 : vector<2x128xf32>
    %545 = arith.truncf %544 : vector<2x128xf32> to vector<2x128xbf16>
    %546 = vector.extract_strided_slice %522 {offsets = [2, 0], sizes = [2, 128], strides = [1, 1]} : vector<16x128xf32> to vector<2x128xf32>
    %c0_229 = arith.constant 0 : index
    %c0_230 = arith.constant 0 : index
    %547 = vector.load %arg11[%c0_229, %c0_230] : memref<128x128xbf16, #tpu.memory_space<vmem>>, vector<128x128xbf16>
    %cst_231 = arith.constant dense<0.000000e+00> : vector<2x128xf32>
    %548 = tpu.matmul %545, %547, %cst_231 {dimension_numbers = #tpu.dot_dimension_numbers<[1], [0], [0], [1], [0, 0, 1, 1], [], []>} : vector<2x128xbf16>, vector<128x128xbf16>, vector<2x128xf32> -> vector<2x128xf32>
    %549 = arith.addf %546, %548 : vector<2x128xf32>
    %550 = arith.mulf %549, %8 : vector<2x128xf32>
    %551 = math.tanh %550 : vector<2x128xf32>
    %cst_232 = arith.constant 1.000000e+00 : f32
    %552 = vector.broadcast %cst_232 : f32 to vector<2x128xf32>
    %553 = arith.addf %551, %552 : vector<2x128xf32>
    %cst_233 = arith.constant 5.000000e-01 : f32
    %554 = vector.broadcast %cst_233 : f32 to vector<2x128xf32>
    %555 = arith.mulf %554, %553 : vector<2x128xf32>
    %556 = arith.select %5, %551, %555 : vector<2x128xi1>, vector<2x128xf32>
    %c96_i32_234 = arith.constant 96 : i32
    %557 = tpu.dynamic_rotate %556 by %c96_i32_234 dim 1 : vector<2x128xf32>, i32 -> vector<2x128xf32>
    %c64_i32_235 = arith.constant 64 : i32
    %558 = tpu.dynamic_rotate %556 by %c64_i32_235 dim 1 : vector<2x128xf32>, i32 -> vector<2x128xf32>
    %c32_i32_236 = arith.constant 32 : i32
    %559 = tpu.dynamic_rotate %556 by %c32_i32_236 dim 1 : vector<2x128xf32>, i32 -> vector<2x128xf32>
    %560 = arith.mulf %557, %542 : vector<2x128xf32>
    %561 = arith.mulf %556, %558 : vector<2x128xf32>
    %562 = arith.addf %560, %561 : vector<2x128xf32>
    %563 = math.tanh %562 : vector<2x128xf32>
    %564 = arith.mulf %559, %563 : vector<2x128xf32>
    %565 = arith.truncf %564 : vector<2x128xf32> to vector<2x128xbf16>
    %566 = vector.extract_strided_slice %522 {offsets = [4, 0], sizes = [2, 128], strides = [1, 1]} : vector<16x128xf32> to vector<2x128xf32>
    %c0_237 = arith.constant 0 : index
    %c0_238 = arith.constant 0 : index
    %567 = vector.load %arg11[%c0_237, %c0_238] : memref<128x128xbf16, #tpu.memory_space<vmem>>, vector<128x128xbf16>
    %cst_239 = arith.constant dense<0.000000e+00> : vector<2x128xf32>
    %568 = tpu.matmul %565, %567, %cst_239 {dimension_numbers = #tpu.dot_dimension_numbers<[1], [0], [0], [1], [0, 0, 1, 1], [], []>} : vector<2x128xbf16>, vector<128x128xbf16>, vector<2x128xf32> -> vector<2x128xf32>
    %569 = arith.addf %566, %568 : vector<2x128xf32>
    %570 = arith.mulf %569, %8 : vector<2x128xf32>
    %571 = math.tanh %570 : vector<2x128xf32>
    %cst_240 = arith.constant 1.000000e+00 : f32
    %572 = vector.broadcast %cst_240 : f32 to vector<2x128xf32>
    %573 = arith.addf %571, %572 : vector<2x128xf32>
    %cst_241 = arith.constant 5.000000e-01 : f32
    %574 = vector.broadcast %cst_241 : f32 to vector<2x128xf32>
    %575 = arith.mulf %574, %573 : vector<2x128xf32>
    %576 = arith.select %5, %571, %575 : vector<2x128xi1>, vector<2x128xf32>
    %c96_i32_242 = arith.constant 96 : i32
    %577 = tpu.dynamic_rotate %576 by %c96_i32_242 dim 1 : vector<2x128xf32>, i32 -> vector<2x128xf32>
    %c64_i32_243 = arith.constant 64 : i32
    %578 = tpu.dynamic_rotate %576 by %c64_i32_243 dim 1 : vector<2x128xf32>, i32 -> vector<2x128xf32>
    %c32_i32_244 = arith.constant 32 : i32
    %579 = tpu.dynamic_rotate %576 by %c32_i32_244 dim 1 : vector<2x128xf32>, i32 -> vector<2x128xf32>
    %580 = arith.mulf %577, %562 : vector<2x128xf32>
    %581 = arith.mulf %576, %578 : vector<2x128xf32>
    %582 = arith.addf %580, %581 : vector<2x128xf32>
    %583 = math.tanh %582 : vector<2x128xf32>
    %584 = arith.mulf %579, %583 : vector<2x128xf32>
    %585 = arith.truncf %584 : vector<2x128xf32> to vector<2x128xbf16>
    %586 = vector.extract_strided_slice %522 {offsets = [6, 0], sizes = [2, 128], strides = [1, 1]} : vector<16x128xf32> to vector<2x128xf32>
    %c0_245 = arith.constant 0 : index
    %c0_246 = arith.constant 0 : index
    %587 = vector.load %arg11[%c0_245, %c0_246] : memref<128x128xbf16, #tpu.memory_space<vmem>>, vector<128x128xbf16>
    %cst_247 = arith.constant dense<0.000000e+00> : vector<2x128xf32>
    %588 = tpu.matmul %585, %587, %cst_247 {dimension_numbers = #tpu.dot_dimension_numbers<[1], [0], [0], [1], [0, 0, 1, 1], [], []>} : vector<2x128xbf16>, vector<128x128xbf16>, vector<2x128xf32> -> vector<2x128xf32>
    %589 = arith.addf %586, %588 : vector<2x128xf32>
    %590 = arith.mulf %589, %8 : vector<2x128xf32>
    %591 = math.tanh %590 : vector<2x128xf32>
    %cst_248 = arith.constant 1.000000e+00 : f32
    %592 = vector.broadcast %cst_248 : f32 to vector<2x128xf32>
    %593 = arith.addf %591, %592 : vector<2x128xf32>
    %cst_249 = arith.constant 5.000000e-01 : f32
    %594 = vector.broadcast %cst_249 : f32 to vector<2x128xf32>
    %595 = arith.mulf %594, %593 : vector<2x128xf32>
    %596 = arith.select %5, %591, %595 : vector<2x128xi1>, vector<2x128xf32>
    %c96_i32_250 = arith.constant 96 : i32
    %597 = tpu.dynamic_rotate %596 by %c96_i32_250 dim 1 : vector<2x128xf32>, i32 -> vector<2x128xf32>
    %c64_i32_251 = arith.constant 64 : i32
    %598 = tpu.dynamic_rotate %596 by %c64_i32_251 dim 1 : vector<2x128xf32>, i32 -> vector<2x128xf32>
    %c32_i32_252 = arith.constant 32 : i32
    %599 = tpu.dynamic_rotate %596 by %c32_i32_252 dim 1 : vector<2x128xf32>, i32 -> vector<2x128xf32>
    %600 = arith.mulf %597, %582 : vector<2x128xf32>
    %601 = arith.mulf %596, %598 : vector<2x128xf32>
    %602 = arith.addf %600, %601 : vector<2x128xf32>
    %603 = math.tanh %602 : vector<2x128xf32>
    %604 = arith.mulf %599, %603 : vector<2x128xf32>
    %605 = arith.truncf %604 : vector<2x128xf32> to vector<2x128xbf16>
    %606 = vector.extract_strided_slice %522 {offsets = [8, 0], sizes = [2, 128], strides = [1, 1]} : vector<16x128xf32> to vector<2x128xf32>
    %c0_253 = arith.constant 0 : index
    %c0_254 = arith.constant 0 : index
    %607 = vector.load %arg11[%c0_253, %c0_254] : memref<128x128xbf16, #tpu.memory_space<vmem>>, vector<128x128xbf16>
    %cst_255 = arith.constant dense<0.000000e+00> : vector<2x128xf32>
    %608 = tpu.matmul %605, %607, %cst_255 {dimension_numbers = #tpu.dot_dimension_numbers<[1], [0], [0], [1], [0, 0, 1, 1], [], []>} : vector<2x128xbf16>, vector<128x128xbf16>, vector<2x128xf32> -> vector<2x128xf32>
    %609 = arith.addf %606, %608 : vector<2x128xf32>
    %610 = arith.mulf %609, %8 : vector<2x128xf32>
    %611 = math.tanh %610 : vector<2x128xf32>
    %cst_256 = arith.constant 1.000000e+00 : f32
    %612 = vector.broadcast %cst_256 : f32 to vector<2x128xf32>
    %613 = arith.addf %611, %612 : vector<2x128xf32>
    %cst_257 = arith.constant 5.000000e-01 : f32
    %614 = vector.broadcast %cst_257 : f32 to vector<2x128xf32>
    %615 = arith.mulf %614, %613 : vector<2x128xf32>
    %616 = arith.select %5, %611, %615 : vector<2x128xi1>, vector<2x128xf32>
    %c96_i32_258 = arith.constant 96 : i32
    %617 = tpu.dynamic_rotate %616 by %c96_i32_258 dim 1 : vector<2x128xf32>, i32 -> vector<2x128xf32>
    %c64_i32_259 = arith.constant 64 : i32
    %618 = tpu.dynamic_rotate %616 by %c64_i32_259 dim 1 : vector<2x128xf32>, i32 -> vector<2x128xf32>
    %c32_i32_260 = arith.constant 32 : i32
    %619 = tpu.dynamic_rotate %616 by %c32_i32_260 dim 1 : vector<2x128xf32>, i32 -> vector<2x128xf32>
    %620 = arith.mulf %617, %602 : vector<2x128xf32>
    %621 = arith.mulf %616, %618 : vector<2x128xf32>
    %622 = arith.addf %620, %621 : vector<2x128xf32>
    %623 = math.tanh %622 : vector<2x128xf32>
    %624 = arith.mulf %619, %623 : vector<2x128xf32>
    %625 = arith.truncf %624 : vector<2x128xf32> to vector<2x128xbf16>
    %626 = vector.extract_strided_slice %522 {offsets = [10, 0], sizes = [2, 128], strides = [1, 1]} : vector<16x128xf32> to vector<2x128xf32>
    %c0_261 = arith.constant 0 : index
    %c0_262 = arith.constant 0 : index
    %627 = vector.load %arg11[%c0_261, %c0_262] : memref<128x128xbf16, #tpu.memory_space<vmem>>, vector<128x128xbf16>
    %cst_263 = arith.constant dense<0.000000e+00> : vector<2x128xf32>
    %628 = tpu.matmul %625, %627, %cst_263 {dimension_numbers = #tpu.dot_dimension_numbers<[1], [0], [0], [1], [0, 0, 1, 1], [], []>} : vector<2x128xbf16>, vector<128x128xbf16>, vector<2x128xf32> -> vector<2x128xf32>
    %629 = arith.addf %626, %628 : vector<2x128xf32>
    %630 = arith.mulf %629, %8 : vector<2x128xf32>
    %631 = math.tanh %630 : vector<2x128xf32>
    %cst_264 = arith.constant 1.000000e+00 : f32
    %632 = vector.broadcast %cst_264 : f32 to vector<2x128xf32>
    %633 = arith.addf %631, %632 : vector<2x128xf32>
    %cst_265 = arith.constant 5.000000e-01 : f32
    %634 = vector.broadcast %cst_265 : f32 to vector<2x128xf32>
    %635 = arith.mulf %634, %633 : vector<2x128xf32>
    %636 = arith.select %5, %631, %635 : vector<2x128xi1>, vector<2x128xf32>
    %c96_i32_266 = arith.constant 96 : i32
    %637 = tpu.dynamic_rotate %636 by %c96_i32_266 dim 1 : vector<2x128xf32>, i32 -> vector<2x128xf32>
    %c64_i32_267 = arith.constant 64 : i32
    %638 = tpu.dynamic_rotate %636 by %c64_i32_267 dim 1 : vector<2x128xf32>, i32 -> vector<2x128xf32>
    %c32_i32_268 = arith.constant 32 : i32
    %639 = tpu.dynamic_rotate %636 by %c32_i32_268 dim 1 : vector<2x128xf32>, i32 -> vector<2x128xf32>
    %640 = arith.mulf %637, %622 : vector<2x128xf32>
    %641 = arith.mulf %636, %638 : vector<2x128xf32>
    %642 = arith.addf %640, %641 : vector<2x128xf32>
    %643 = math.tanh %642 : vector<2x128xf32>
    %644 = arith.mulf %639, %643 : vector<2x128xf32>
    %645 = arith.truncf %644 : vector<2x128xf32> to vector<2x128xbf16>
    %646 = vector.extract_strided_slice %522 {offsets = [12, 0], sizes = [2, 128], strides = [1, 1]} : vector<16x128xf32> to vector<2x128xf32>
    %c0_269 = arith.constant 0 : index
    %c0_270 = arith.constant 0 : index
    %647 = vector.load %arg11[%c0_269, %c0_270] : memref<128x128xbf16, #tpu.memory_space<vmem>>, vector<128x128xbf16>
    %cst_271 = arith.constant dense<0.000000e+00> : vector<2x128xf32>
    %648 = tpu.matmul %645, %647, %cst_271 {dimension_numbers = #tpu.dot_dimension_numbers<[1], [0], [0], [1], [0, 0, 1, 1], [], []>} : vector<2x128xbf16>, vector<128x128xbf16>, vector<2x128xf32> -> vector<2x128xf32>
    %649 = arith.addf %646, %648 : vector<2x128xf32>
    %650 = arith.mulf %649, %8 : vector<2x128xf32>
    %651 = math.tanh %650 : vector<2x128xf32>
    %cst_272 = arith.constant 1.000000e+00 : f32
    %652 = vector.broadcast %cst_272 : f32 to vector<2x128xf32>
    %653 = arith.addf %651, %652 : vector<2x128xf32>
    %cst_273 = arith.constant 5.000000e-01 : f32
    %654 = vector.broadcast %cst_273 : f32 to vector<2x128xf32>
    %655 = arith.mulf %654, %653 : vector<2x128xf32>
    %656 = arith.select %5, %651, %655 : vector<2x128xi1>, vector<2x128xf32>
    %c96_i32_274 = arith.constant 96 : i32
    %657 = tpu.dynamic_rotate %656 by %c96_i32_274 dim 1 : vector<2x128xf32>, i32 -> vector<2x128xf32>
    %c64_i32_275 = arith.constant 64 : i32
    %658 = tpu.dynamic_rotate %656 by %c64_i32_275 dim 1 : vector<2x128xf32>, i32 -> vector<2x128xf32>
    %c32_i32_276 = arith.constant 32 : i32
    %659 = tpu.dynamic_rotate %656 by %c32_i32_276 dim 1 : vector<2x128xf32>, i32 -> vector<2x128xf32>
    %660 = arith.mulf %657, %642 : vector<2x128xf32>
    %661 = arith.mulf %656, %658 : vector<2x128xf32>
    %662 = arith.addf %660, %661 : vector<2x128xf32>
    %663 = math.tanh %662 : vector<2x128xf32>
    %664 = arith.mulf %659, %663 : vector<2x128xf32>
    %665 = arith.truncf %664 : vector<2x128xf32> to vector<2x128xbf16>
    %666 = vector.extract_strided_slice %522 {offsets = [14, 0], sizes = [2, 128], strides = [1, 1]} : vector<16x128xf32> to vector<2x128xf32>
    %c0_277 = arith.constant 0 : index
    %c0_278 = arith.constant 0 : index
    %667 = vector.load %arg11[%c0_277, %c0_278] : memref<128x128xbf16, #tpu.memory_space<vmem>>, vector<128x128xbf16>
    %cst_279 = arith.constant dense<0.000000e+00> : vector<2x128xf32>
    %668 = tpu.matmul %665, %667, %cst_279 {dimension_numbers = #tpu.dot_dimension_numbers<[1], [0], [0], [1], [0, 0, 1, 1], [], []>} : vector<2x128xbf16>, vector<128x128xbf16>, vector<2x128xf32> -> vector<2x128xf32>
    %669 = arith.addf %666, %668 : vector<2x128xf32>
    %670 = arith.mulf %669, %8 : vector<2x128xf32>
    %671 = math.tanh %670 : vector<2x128xf32>
    %cst_280 = arith.constant 1.000000e+00 : f32
    %672 = vector.broadcast %cst_280 : f32 to vector<2x128xf32>
    %673 = arith.addf %671, %672 : vector<2x128xf32>
    %cst_281 = arith.constant 5.000000e-01 : f32
    %674 = vector.broadcast %cst_281 : f32 to vector<2x128xf32>
    %675 = arith.mulf %674, %673 : vector<2x128xf32>
    %676 = arith.select %5, %671, %675 : vector<2x128xi1>, vector<2x128xf32>
    %c96_i32_282 = arith.constant 96 : i32
    %677 = tpu.dynamic_rotate %676 by %c96_i32_282 dim 1 : vector<2x128xf32>, i32 -> vector<2x128xf32>
    %c64_i32_283 = arith.constant 64 : i32
    %678 = tpu.dynamic_rotate %676 by %c64_i32_283 dim 1 : vector<2x128xf32>, i32 -> vector<2x128xf32>
    %c32_i32_284 = arith.constant 32 : i32
    %679 = tpu.dynamic_rotate %676 by %c32_i32_284 dim 1 : vector<2x128xf32>, i32 -> vector<2x128xf32>
    %680 = arith.mulf %677, %662 : vector<2x128xf32>
    %681 = arith.mulf %676, %678 : vector<2x128xf32>
    %682 = arith.addf %680, %681 : vector<2x128xf32>
    %683 = math.tanh %682 : vector<2x128xf32>
    %684 = arith.mulf %679, %683 : vector<2x128xf32>
    %685 = arith.truncf %684 : vector<2x128xf32> to vector<2x128xbf16>
    %c0_285 = arith.constant 0 : index
    %c0_286 = arith.constant 0 : index
    %686 = vector.load %arg13[%c0_285, %c0_286] : memref<128x128xbf16, #tpu.memory_space<vmem>>, vector<128x128xbf16>
    %cst_287 = arith.constant dense<0.000000e+00> : vector<2x128xf32>
    %687 = tpu.matmul %685, %686, %cst_287 {dimension_numbers = #tpu.dot_dimension_numbers<[1], [0], [0], [1], [0, 0, 1, 1], [], []>} : vector<2x128xbf16>, vector<128x128xbf16>, vector<2x128xf32> -> vector<2x128xf32>
    %c0_288 = arith.constant 0 : index
    %c0_289 = arith.constant 0 : index
    %688 = vector.load %arg14[%c0_288, %c0_289] : memref<1x128xf32, #tpu.memory_space<vmem>>, vector<1x128xf32>
    %689 = vector.broadcast %688 : vector<1x128xf32> to vector<2x128xf32>
    %690 = arith.addf %687, %689 : vector<2x128xf32>
    %c0_290 = arith.constant 0 : index
    %c0_291 = arith.constant 0 : index
    %691 = vector.load %arg15[%c0_290, %c0_291] : memref<2x128xf32, #tpu.memory_space<vmem>>, vector<2x128xf32>
    tpu.vector_store %arg15[%c0_290, %c0_291], %690 {strides = array<i32>} : memref<2x128xf32, #tpu.memory_space<vmem>>, vector<2x128xf32>,
    return
  }
}

</mosaic_0001>

<bundles_post_ra>
// kernel: _lambda_.1
= control target key start
LH: loop header
LB: loop body
LE: loop exit
PB: predicated region body
PF: predicated region fallthrough
CT: control target
= control target key end

     0   :  { %20 = vsyncpa [#allocation3], 0  ;;  %s5994_s0 = inlined_call_operand.vmem [shape: f32[16,128], index: 0, kind: input, shape index: {}]   ;;  %s5995_s1 = inlined_call_operand.hbm [shape: bf16[128,128], index: 1, kind: input, shape index: {}]   ;;  %s5996_s2 = inlined_call_operand.hbm [shape: bf16[128,128], index: 2, kind: input, shape index: {}]   ;;  %s5997_s3 = inlined_call_operand.vmem [shape: f32[1,128], index: 3, kind: input, shape index: {}]   ;;  %s5998_s4 = inlined_call_operand.hbm [shape: bf16[128,128], index: 4, kind: input, shape index: {}]   ;;  %s5999_s5 = inlined_call_operand.hbm [shape: bf16[128,128], index: 5, kind: input, shape index: {}]   ;;  %s6000_s6 = inlined_call_operand.vmem [shape: f32[1,128], index: 6, kind: input, shape index: {}]   ;;  %s6001_s7 = inlined_call_operand.hbm [shape: bf16[128,128], index: 7, kind: input, shape index: {}]   ;;  %s6002_s8 = inlined_call_operand.hbm [shape: bf16[128,128], index: 8, kind: input, shape index: {}]   ;;  %s6003_s9 = inlined_call_operand.vmem [shape: f32[1,128], index: 9, kind: input, shape index: {}]   ;;  %s6004_s10 = inlined_call_operand.hbm [shape: bf16[128,128], index: 10, kind: input, shape index: {}]   ;;  %s6005_s11 = inlined_call_operand.hbm [shape: bf16[128,128], index: 11, kind: input, shape index: {}]   ;;  %s6006_s12 = inlined_call_operand.vmem [shape: f32[1,128], index: 12, kind: input, shape index: {}]   ;;  %s6007_s13 = inlined_call_operand.vmem [shape: bf16[128,128], index: 13, kind: input, shape index: {}]   ;;  %s6008_s14 = inlined_call_operand.vmem [shape: f32[1,128], index: 14, kind: input, shape index: {}]   ;;  %s6009_s15 = inlined_call_operand.hbm [shape: f32[2,128], index: 15, kind: output, shape index: {}]  }
   0x1   :  { %21 = vsyncpa [#allocation6], 0 }
   0x2   :  { %22 = vsyncpa [#allocation9], 0 }
   0x3   :  { %23 = vsyncpa [#allocation12], 0 }
   0x4   :  { %24 = vsyncpa [#allocation15], 0 }
   0x5   :  { %25 = vsyncpa [#allocation4], 0  ;;  %s4805_s18 = smov [#allocation5]   ;;  %s4806_s20 = smov [#allocation8]  }
   0x6   :  { %s45_s19 = sshll.u32 %s4805_s18, 4  ;;  %s71_s21 = sshll.u32 %s4806_s20, 4  ;;  %s46_s19 = int_to_ptr.vmem [resolvable:$true] %s45_s19  ;;  %s72_s21 = int_to_ptr.vmem [resolvable:$true] %s71_s21 }
   0x7   :  { %s4621_s22 = scalar_lea.vmem %s46_s19, 1024  ;;  %p4626_p1 = scmp.lt.s32.totalorder %s46_s19, %s46_s19 }
   0x8   :  { %p4622_p0 = scmp.ne.s32.totalorder %s46_s19, %s4621_s22  ;;  %p4627_p2 = scmp.lt.s32.totalorder %s4621_s22, %s4621_s22 }
   0xa   :  { %p4628_p3 = por %p4627_p2, %p4626_p1 }
   0xc   :  { %p4629_p4 = pnand %p4628_p3, %p4622_p0 }
   0xe   :  { %4632 = shalt.err (!%p4629_p4)
}
   0xf   :  { %s4807_s23 = smov 64   ;;  %s4808_s24 = smov 4  }
  0x10   :  { %51 = dma.hbm_to_vmem [thread:$0]  %s5996_s2, 1024, %s46_s19, [#allocation6], %s4807_s23, %s4807_s23, %s4808_s24  }
  0x11   :  { %s4641_s27 = scalar_lea.vmem %s72_s21, 1024  ;;  %p4646_p6 = scmp.lt.s32.totalorder %s72_s21, %s72_s21 }
  0x12   :  { %p4642_p5 = scmp.ne.s32.totalorder %s72_s21, %s4641_s27  ;;  %p4647_p7 = scmp.lt.s32.totalorder %s4641_s27, %s4641_s27 }
  0x14   :  { %p4648_p8 = por %p4647_p7, %p4646_p6 }
  0x16   :  { %p4649_p9 = pnand %p4648_p8, %p4642_p5 }
  0x18   :  { %4652 = shalt.err (!%p4649_p9)
}
  0x19   :  { %77 = dma.hbm_to_vmem [thread:$0]  %s5999_s5, 1024, %s72_s21, [#allocation9], %s4807_s23, %s4807_s23, %s4808_s24  }
  0x1a   :  { %s4809_s30 = smov [#allocation11]   ;;  %s4810_s17 = smov [#allocation2]  }
  0x1b   :  { %s97_s16 = sshll.u32 %s4809_s30, 4  ;;  %s33_s18 = sshll.u32 %s4810_s17, 4  ;;  %s98_s16 = int_to_ptr.vmem [resolvable:$true] %s97_s16  ;;  %s34_s18 = int_to_ptr.vmem [resolvable:$true] %s33_s18 }
  0x1c   :  { %s4661_s2 = scalar_lea.vmem %s98_s16, 1024  ;;  %p4666_p11 = scmp.lt.s32.totalorder %s98_s16, %s98_s16 }
  0x1d   :  { %p4662_p10 = scmp.ne.s32.totalorder %s98_s16, %s4661_s2  ;;  %p4667_p12 = scmp.lt.s32.totalorder %s4661_s2, %s4661_s2 }
  0x1f   :  { %p4668_p13 = por %p4667_p12, %p4666_p11 }
  0x21   :  { %p4669_p0 = pnand %p4668_p13, %p4662_p10 }
  0x23   :  { %4672 = shalt.err (!%p4669_p0)
}
  0x24   :  { %103 = dma.hbm_to_vmem [thread:$0]  %s6002_s8, 1024, %s98_s16, [#allocation12], %s4807_s23, %s4807_s23, %s4808_s24  }
  0x25   :  { %s4681_s5 = scalar_lea.vmem %s34_s18, 1024  ;;  %p4686_p2 = scmp.lt.s32.totalorder %s34_s18, %s34_s18 }
  0x26   :  { %p4682_p1 = scmp.ne.s32.totalorder %s34_s18, %s4681_s5  ;;  %p4687_p3 = scmp.lt.s32.totalorder %s4681_s5, %s4681_s5 }
  0x28   :  { %p4688_p4 = por %p4687_p3, %p4686_p2 }
  0x2a   :  { %p4689_p5 = pnand %p4688_p4, %p4682_p1 }
  0x2c   :  { %4692 = shalt.err (!%p4689_p5)
}
  0x2d   :  { %39 = dma.hbm_to_vmem [thread:$0]  %s5995_s1, 1024, %s34_s18, [#allocation3], %s4807_s23, %s4807_s23, %s4808_s24  }
  0x2e   :  { %s4811_s25 = smov [#allocation7]   ;;  %s4812_s27 = smov [#allocation10]  }
  0x2f   :  { %s59_s26 = sshll.u32 %s4811_s25, 4  ;;  %s85_s28 = sshll.u32 %s4812_s27, 4  ;;  %s60_s26 = int_to_ptr.vmem [resolvable:$true] %s59_s26  ;;  %s86_s28 = int_to_ptr.vmem [resolvable:$true] %s85_s28 }
  0x30   :  { %s4701_s8 = scalar_lea.vmem %s60_s26, 1024  ;;  %p4706_p7 = scmp.lt.s32.totalorder %s60_s26, %s60_s26 }
  0x31   :  { %p4702_p6 = scmp.ne.s32.totalorder %s60_s26, %s4701_s8  ;;  %p4707_p8 = scmp.lt.s32.totalorder %s4701_s8, %s4701_s8 }
  0x33   :  { %p4708_p9 = por %p4707_p8, %p4706_p7 }
  0x35   :  { %p4709_p10 = pnand %p4708_p9, %p4702_p6 }
  0x37   :  { %4712 = shalt.err (!%p4709_p10)
}
  0x38   :  { %65 = dma.hbm_to_vmem [thread:$0]  %s5998_s4, 1024, %s60_s26, [#allocation6], %s4807_s23, %s4807_s23, %s4808_s24  }
  0x39   :  { %s4721_s1 = scalar_lea.vmem %s86_s28, 1024  ;;  %p4726_p12 = scmp.lt.s32.totalorder %s86_s28, %s86_s28 }
  0x3a   :  { %p4722_p11 = scmp.ne.s32.totalorder %s86_s28, %s4721_s1  ;;  %p4727_p13 = scmp.lt.s32.totalorder %s4721_s1, %s4721_s1 }
  0x3c   :  { %p4728_p0 = por %p4727_p13, %p4726_p12 }
  0x3e   :  { %p4729_p1 = pnand %p4728_p0, %p4722_p11 }
  0x40   :  { %4732 = shalt.err (!%p4729_p1)
}
  0x41   :  { %91 = dma.hbm_to_vmem [thread:$0]  %s6001_s7, 1024, %s86_s28, [#allocation9], %s4807_s23, %s4807_s23, %s4808_s24  }
  0x42   :  { %s4813_s18 = smov [#allocation13]   ;;  %s4814_s19 = smov [#allocation14]  }
  0x43   :  { %s111_s2 = sshll.u32 %s4813_s18, 4  ;;  %s123_s20 = sshll.u32 %s4814_s19, 4  ;;  %s112_s2 = int_to_ptr.vmem [resolvable:$true] %s111_s2  ;;  %s124_s20 = int_to_ptr.vmem [resolvable:$true] %s123_s20 }
  0x44   :  { %s4741_s4 = scalar_lea.vmem %s112_s2, 1024  ;;  %p4746_p3 = scmp.lt.s32.totalorder %s112_s2, %s112_s2 }
  0x45   :  { %p4742_p2 = scmp.ne.s32.totalorder %s112_s2, %s4741_s4  ;;  %p4747_p4 = scmp.lt.s32.totalorder %s4741_s4, %s4741_s4 }
  0x47   :  { %p4748_p5 = por %p4747_p4, %p4746_p3 }
  0x49   :  { %p4749_p6 = pnand %p4748_p5, %p4742_p2 }
  0x4b   :  { %4752 = shalt.err (!%p4749_p6)
}
  0x4c   :  { %117 = dma.hbm_to_vmem [thread:$0]  %s6004_s10, 1024, %s112_s2, [#allocation12], %s4807_s23, %s4807_s23, %s4808_s24  }
  0x4d   :  { %s4761_s7 = scalar_lea.vmem %s124_s20, 1024  ;;  %p4766_p8 = scmp.lt.s32.totalorder %s124_s20, %s124_s20 }
  0x4e   :  { %p4762_p7 = scmp.ne.s32.totalorder %s124_s20, %s4761_s7  ;;  %p4767_p9 = scmp.lt.s32.totalorder %s4761_s7, %s4761_s7 }
  0x50   :  { %p4768_p10 = por %p4767_p9, %p4766_p8 }
  0x52   :  { %p4769_p11 = pnand %p4768_p10, %p4762_p7 }
  0x54   :  { %4772 = shalt.err (!%p4769_p11)
}
  0x55   :  { %129 = dma.hbm_to_vmem [thread:$0]  %s6005_s11, 1024, %s124_s20, [#allocation15], %s4807_s23, %s4807_s23, %s4808_s24  }
  0x56   :  { %4793 = dma.done.wait [#allocation3], 1024  }
  0x57   :  { %4794 = vsyncadd [#allocation3], 4294966272 }
  0x58   :  { %4795 = dma.done.wait [#allocation6], 2048  }
  0x59   :  { %4796 = vsyncadd [#allocation6], 4294965248 }
  0x5a   :  { %4797 = dma.done.wait [#allocation9], 2048  }
  0x5b   :  { %4798 = vsyncadd [#allocation9], 4294965248 }
  0x5c   :  { %4799 = dma.done.wait [#allocation12], 2048  }
  0x5d   :  { %4800 = vsyncadd [#allocation12], 4294965248 }
  0x5e   :  { %4801 = dma.done.wait [#allocation15], 1024  }
  0x5f   :  { %4802 = vsyncadd [#allocation15], 4294966272  ;;  %v4815_v0 = vmov 0.0   ;;  %vm4816_vm0 = vmmov 0   ;;  %v4413_v1 = vld [vmem:[#allocation2 + $0x38] sm:$0xff]   ;;  %v4415_v3 = vld [vmem:[#allocation2 + $0x30] sm:$0xff]   ;;  %v161_v21 = vlaneseq }
  0x60   :  { %3656 = vmatprep.subr.bf16.mxu0 %v4815_v0  ;;  %3676 = vmatprep.subr.bf16.mxu1 %v4815_v0  ;;  %v4956_v2 = vld [vmem:[#allocation5 + $0x38] sm:$0xff]   ;;  %v4960_v4 = vld [vmem:[#allocation5 + $0x30] sm:$0xff]   ;;  %v4417_v5 = vld [vmem:[#allocation2 + $0x28] sm:$0xff]   ;;  %v4817_v20 = vmov 0   ;;  %v4818_v28 = vmov 0.5   ;;  %s4820_s28 = smov 96  }
  0x61   :  { %3672 = vmatprep.mubr.msk.bf16.mxu0 %vm4816_vm0, %v4815_v0  ;;  %3692 = vmatprep.mubr.msk.bf16.mxu1 %vm4816_vm0, %v4815_v0  ;;  %v4965_v6 = vld [vmem:[#allocation5 + $0x28] sm:$0xff]   ;;  %v4419_v7 = vld [vmem:[#allocation2 + $0x20] sm:$0xff]   ;;  %v4421_v9 = vld [vmem:[#allocation2 + $0x18] sm:$0xff]   ;;  %v162_v22 = vand.u32 127, %v161_v21  ;;  %vm896_vm4 = vcmask 1040384   ;;  %vm900_vm5 = vcmask 1041408  }
  0x62   :  { %3657 = vmatpush3.bf16.msra.mxu0 %v4413_v1  ;;  %3677 = vmatpush3.bf16.msra.mxu1 %v4956_v2  ;;  %v4970_v8 = vld [vmem:[#allocation5 + $0x20] sm:$0xff]   ;;  %v4975_v10 = vld [vmem:[#allocation5 + $0x18] sm:$0xff]   ;;  %v4423_v11 = vld [vmem:[#allocation2 + $0x10] sm:$0xff]   ;;  %vm903_vm6 = vcmask 1042432   ;;  %vm906_vm7 = vcmask 1043456   ;;  %vm909_vm8 = vcmask 1044480  }
  0x63   :  { %3658 = vmatprep.subr.bf16.mxu0 %v4815_v0  ;;  %3678 = vmatprep.subr.bf16.mxu1 %v4815_v0  ;;  %v4978_v12 = vld [vmem:[#allocation5 + $0x10] sm:$0xff]   ;;  %v4425_v13 = vld [vmem:[#allocation2 + $0x8] sm:$0xff]   ;;  %v4427_v15 = vld [vmem:[#allocation2] sm:$0xff]   ;;  %vm163_vm1 = vcmp.ge.s32.totalorder %v162_v22, 64  ;;  %vm164_vm2 = vcmp.lt.s32.totalorder %v162_v22, 96  ;;  %vm912_vm9 = vcmask 1045504  }
  0x64   :  { %v4983_v14 = vld [vmem:[#allocation5 + $0x8] sm:$0xff]   ;;  %v167_v16 = vld [vmem:[%s5994_s0] sm:$0xff]  ;;  %vm5042_vm3 = vmand %vm163_vm1, %vm164_vm2  ;;  %vm915_vm10 = vcmask 1046528  }
  0x65   :  { %v168_v17 = vld [vmem:[%s5994_s0 + $0x8] sm:$0xff]  ;;  %v4994_v18 = vld [vmem:[#allocation5] sm:$0xff]   ;;  %v5050_v29 = vsel %vm5042_vm3, 1.0, %v4818_v28  ;;  %s4821_s0 = smov [#allocation16]  }
  0x66   :  { %3659 = vmatpush3.bf16.msra.mxu0 %v4415_v3  ;;  %3679 = vmatpush3.bf16.msra.mxu1 %v4960_v4  ;;  %v169_v19 = vpack.c.bf16 %v168_v17, %v167_v16  ;;  %v3246_v23 = vld [vmem:[%s5997_s3] ss:$0 sm:$0xff]  ;;  %s4819_s3 = smov 32   ;;  %v4483_v24 = vld [vmem:[%s6007_s13 + $0x8] sm:$0xff]  }
  0x67   :  { %3660 = vmatprep.subr.bf16.mxu0 %v4815_v0  ;;  %3680 = vmatprep.subr.bf16.mxu1 %v4815_v0 }
  0x6a   :  { %3661 = vmatpush3.bf16.msra.mxu0 %v4417_v5  ;;  %3681 = vmatpush3.bf16.msra.mxu1 %v4965_v6 }
  0x6b   :  { %3662 = vmatprep.subr.bf16.mxu0 %v4815_v0  ;;  %3682 = vmatprep.subr.bf16.mxu1 %v4815_v0 }
  0x6e   :  { %3663 = vmatpush3.bf16.msra.mxu0 %v4419_v7  ;;  %3683 = vmatpush3.bf16.msra.mxu1 %v4970_v8 }
  0x6f   :  { %3664 = vmatprep.subr.bf16.mxu0 %v4815_v0  ;;  %3684 = vmatprep.subr.bf16.mxu1 %v4815_v0 }
  0x72   :  { %3665 = vmatpush3.bf16.msra.mxu0 %v4421_v9  ;;  %3685 = vmatpush3.bf16.msra.mxu1 %v4975_v10 }
  0x73   :  { %3666 = vmatprep.subr.bf16.mxu0 %v4815_v0  ;;  %3686 = vmatprep.subr.bf16.mxu1 %v4815_v0 }
  0x76   :  { %3667 = vmatpush3.bf16.msra.mxu0 %v4423_v11  ;;  %3687 = vmatpush3.bf16.msra.mxu1 %v4978_v12 }
  0x77   :  { %3668 = vmatprep.subr.bf16.mxu0 %v4815_v0  ;;  %3688 = vmatprep.subr.bf16.mxu1 %v4815_v0 }
  0x7a   :  { %3669 = vmatpush3.bf16.msra.mxu0 %v4425_v13  ;;  %3689 = vmatpush3.bf16.msra.mxu1 %v4983_v14 }
  0x7b   :  { %3670 = vmatprep.subr.bf16.mxu0 %v4815_v0  ;;  %3690 = vmatprep.subr.bf16.mxu1 %v4815_v0 }
  0x7e   :  { %3671 = vmatpush3.bf16.msra.mxu0 %v4427_v15  ;;  %3691 = vmatpush3.bf16.msra.mxu1 %v4994_v18 }
  0x7f   :  { %3696 = vmatprep.subr.bf16.mxu0 %v4815_v0  ;;  %3716 = vmatprep.subr.bf16.mxu1 %v4815_v0 }
  0x81   :  { %3673 = vmatmul.mubr.bf16.vlgmr.msra.gmra.mxu0 %v169_v19  ;;  %3693 = vmatmul.mubr.bf16.vlgmr.msra.gmra.mxu1 %v4817_v20 }
  0x82   :  { %3697 = vmatpush3.bf16.msra.mxu0 %v4956_v2  ;;  %3712 = vmatprep.mubr.msk.bf16.mxu0 %vm4816_vm0, %v4815_v0 }
  0x83   :  { %3698 = vmatprep.subr.bf16.mxu0 %v4815_v0  ;;  %3717 = vmatpush3.bf16.msra.mxu1 %v4956_v2 }
  0x84   :  { %3732 = vmatprep.mubr.msk.bf16.mxu1 %vm4816_vm0, %v4815_v0  ;;  %3718 = vmatprep.subr.bf16.mxu1 %v4815_v0 }
  0x86   :  { %3699 = vmatpush3.bf16.msra.mxu0 %v4960_v4 }
  0x87   :  { %3700 = vmatprep.subr.bf16.mxu0 %v4815_v0  ;;  %3719 = vmatpush3.bf16.msra.mxu1 %v4960_v4 }
  0x88   :  { %3720 = vmatprep.subr.bf16.mxu1 %v4815_v0 }
  0x8a   :  { %3701 = vmatpush3.bf16.msra.mxu0 %v4965_v6 }
  0x8b   :  { %3702 = vmatprep.subr.bf16.mxu0 %v4815_v0  ;;  %3721 = vmatpush3.bf16.msra.mxu1 %v4965_v6 }
  0x8c   :  { %3722 = vmatprep.subr.bf16.mxu1 %v4815_v0 }
  0x8e   :  { %3703 = vmatpush3.bf16.msra.mxu0 %v4970_v8 }
  0x8f   :  { %3704 = vmatprep.subr.bf16.mxu0 %v4815_v0  ;;  %3723 = vmatpush3.bf16.msra.mxu1 %v4970_v8 }
  0x90   :  { %3724 = vmatprep.subr.bf16.mxu1 %v4815_v0 }
  0x92   :  { %3705 = vmatpush3.bf16.msra.mxu0 %v4975_v10 }
  0x93   :  { %3706 = vmatprep.subr.bf16.mxu0 %v4815_v0  ;;  %3725 = vmatpush3.bf16.msra.mxu1 %v4975_v10 }
  0x94   :  { %3726 = vmatprep.subr.bf16.mxu1 %v4815_v0 }
  0x96   :  { %3707 = vmatpush3.bf16.msra.mxu0 %v4978_v12 }
  0x97   :  { %3708 = vmatprep.subr.bf16.mxu0 %v4815_v0  ;;  %3727 = vmatpush3.bf16.msra.mxu1 %v4978_v12 }
  0x98   :  { %3728 = vmatprep.subr.bf16.mxu1 %v4815_v0 }
  0x9a   :  { %3709 = vmatpush3.bf16.msra.mxu0 %v4983_v14 }
  0x9b   :  { %3710 = vmatprep.subr.bf16.mxu0 %v4815_v0  ;;  %3729 = vmatpush3.bf16.msra.mxu1 %v4983_v14 }
  0x9c   :  { %3730 = vmatprep.subr.bf16.mxu1 %v4815_v0 }
  0x9e   :  { %3711 = vmatpush3.bf16.msra.mxu0 %v4994_v18 }
  0x9f   :  { %3736 = vmatprep.subr.bf16.mxu0 %v4815_v0  ;;  %3731 = vmatpush3.bf16.msra.mxu1 %v4994_v18 }
  0xa0   :  { %3756 = vmatprep.subr.bf16.mxu1 %v4815_v0 }
 0x141   :  { %v275_v25 = vpop.f32.mrf.mxu0  ;;  %v380_v27 = vpop.f32.mrf.mxu1 }
 0x142   :  { %v5046_v26 = vadd.f32 %v3246_v23, %v275_v25 }
 0x143   :  { %v3674_v30 = vpop.f32.mrf.mxu0  ;;  %v3694_v32 = vpop.f32.mrf.mxu1 }
 0x144   :  { %v386_v31 = vadd.f32 %v380_v27, %v5046_v26 }
 0x145   :  { %v278_v33 = vpop.f32.mrf.mxu0  ;;  %v383_v36 = vpop.f32.mrf.mxu1 }
 0x146   :  { %v387_v34 = vmul.f32 %v386_v31, %v5050_v29  ;;  %v5054_v35 = vadd.f32 %v3246_v23, %v278_v33 }
 0x147   :  { %v3675_v37 = vpop.f32.mrf.mxu0  ;;  %v3695_v38 = vpop.f32.mrf.mxu1 }
 0x148   :  { %4485 = vtanh.f32 %v387_v34 }
 0x155   :  { %v4486_v39 = vpop.eup %4485 }
 0x156   :  { %v389_v40 = vadd.f32 1.0, %v4486_v39 }
 0x158   :  { %v390_v41 = vmul.f32 0.5, %v389_v40 }
 0x15a   :  { %v391_v42 = vsel %vm5042_vm3, %v4486_v39, %v390_v41 }
 0x15b   :  { %396 = vrot.lane.b32.xlu1 %v391_v42, %s4819_s3  ;;  %392 = vrot.lane.b32.xlu0 %v391_v42, %s4820_s28 }
 0x15f   :  { %394 = vrot.lane.b32.xlu0 %v391_v42, %s4807_s23 }
 0x1cd   :  { %v393_v43 = vpop.permute.xlu0 %392  ;;  %v397_v49 = vpop.permute.xlu1 %396 }
 0x1ce   :  { %v398_v45 = vmul.f32 0.0, %v393_v43 }
 0x1d1   :  { %v395_v44 = vpop.permute.xlu0 %394 }
 0x1d2   :  { %v399_v46 = vmul.f32 %v395_v44, %v391_v42 }
 0x1d4   :  { %v400_v47 = vadd.f32 %v399_v46, %v398_v45 }
 0x1d6   :  { %4487 = vtanh.f32 %v400_v47 }
 0x1e3   :  { %v4488_v48 = vpop.eup %4487 }
 0x1e4   :  { %v402_v50 = vmul.f32 %v4488_v48, %v397_v49 }
 0x1e6   :  { %v5061_v51 = vpack.c.bf16 %v402_v50, %v402_v50 }
 0x1e8   :  { %3713 = vmatmul.mubr.bf16.vlgmr.msra.gmra.mxu0 %v5061_v51 }
 0x1e9   :  { %3737 = vmatpush3.bf16.msra.mxu0 %v4956_v2  ;;  %3752 = vmatprep.mubr.msk.bf16.mxu0 %vm4816_vm0, %v4815_v0 }
 0x1ea   :  { %3738 = vmatprep.subr.bf16.mxu0 %v4815_v0 }
 0x1ed   :  { %3739 = vmatpush3.bf16.msra.mxu0 %v4960_v4 }
 0x1ee   :  { %3740 = vmatprep.subr.bf16.mxu0 %v4815_v0 }
 0x1f1   :  { %3741 = vmatpush3.bf16.msra.mxu0 %v4965_v6 }
 0x1f2   :  { %3742 = vmatprep.subr.bf16.mxu0 %v4815_v0 }
 0x1f5   :  { %3743 = vmatpush3.bf16.msra.mxu0 %v4970_v8 }
 0x1f6   :  { %3744 = vmatprep.subr.bf16.mxu0 %v4815_v0 }
 0x1f9   :  { %3745 = vmatpush3.bf16.msra.mxu0 %v4975_v10 }
 0x1fa   :  { %3746 = vmatprep.subr.bf16.mxu0 %v4815_v0 }
 0x1fd   :  { %3747 = vmatpush3.bf16.msra.mxu0 %v4978_v12 }
 0x1fe   :  { %3748 = vmatprep.subr.bf16.mxu0 %v4815_v0 }
 0x201   :  { %3749 = vmatpush3.bf16.msra.mxu0 %v4983_v14 }
 0x202   :  { %3750 = vmatprep.subr.bf16.mxu0 %v4815_v0 }
 0x205   :  { %3751 = vmatpush3.bf16.msra.mxu0 %v4994_v18 }
 0x206   :  { %3776 = vmatprep.subr.bf16.mxu0 %v4815_v0 }
 0x2a8   :  { %v438_v52 = vpop.f32.mrf.mxu0 }
 0x2a9   :  { %v445_v53 = vrot.slane %v438_v52, 6 }
 0x2aa   :  { %v3714_v54 = vpop.f32.mrf.mxu0 }
 0x2ab   :  { %v447_v55 = vadd.f32 %v445_v53, %v5046_v26 }
 0x2ac   :  { %v441_v56 = vpop.f32.mrf.mxu0 }
 0x2ad   :  { %v448_v57 = vmul.f32 %v447_v55, %v5050_v29 }
 0x2ae   :  { %v3715_v58 = vpop.f32.mrf.mxu0 }
 0x2af   :  { %4489 = vtanh.f32 %v448_v57 }
 0x2bc   :  { %v4490_v59 = vpop.eup %4489 }
 0x2bd   :  { %v450_v60 = vadd.f32 1.0, %v4490_v59 }
 0x2bf   :  { %v451_v61 = vmul.f32 0.5, %v450_v60 }
 0x2c1   :  { %v452_v62 = vsel %vm5042_vm3, %v4490_v59, %v451_v61 }
 0x2c2   :  { %v454_v63 = vrot.slane %v452_v62, 2 }
 0x2c4   :  { %456 = vrot.lane.b32.xlu0 %v454_v63, %s4820_s28  ;;  %458 = vrot.lane.b32.xlu1 %v454_v63, %s4807_s23 }
 0x2c8   :  { %460 = vrot.lane.b32.xlu1 %v454_v63, %s4819_s3 }
 0x336   :  { %v459_v1 = vpop.permute.xlu1 %458  ;;  %v457_v5 = vpop.permute.xlu0 %456 }
 0x337   :  { %v464_v3 = vrot.slane %v459_v1, 6  ;;  %v462_v9 = vmul.f32 %v457_v5, %v400_v47 }
 0x339   :  { %v466_v7 = vmul.f32 %v464_v3, %v452_v62 }
 0x33a   :  { %v461_v16 = vpop.permute.xlu1 %460 }
 0x33b   :  { %v468_v11 = vrot.slane %v466_v7, 2 }
 0x33d   :  { %v470_v13 = vadd.f32 %v468_v11, %v462_v9 }
 0x33f   :  { %4491 = vtanh.f32 %v470_v13 }
 0x34c   :  { %v4492_v15 = vpop.eup %4491 }
 0x34d   :  { %v472_v17 = vmul.f32 %v4492_v15, %v461_v16 }
 0x34f   :  { %v473_v19 = vpack.c.bf16 %v472_v17, %v472_v17 }
 0x351   :  { %3733 = vmatmul.mubr.bf16.vlgmr.msra.gmra.mxu1 %v473_v19  ;;  %v883_v47 = vrot.slane %v473_v19, 7 }
 0x352   :  { %3757 = vmatpush3.bf16.msra.mxu1 %v4956_v2  ;;  %3772 = vmatprep.mubr.msk.bf16.mxu1 %vm4816_vm0, %v4815_v0 }
 0x353   :  { %3758 = vmatprep.subr.bf16.mxu1 %v4815_v0  ;;  %v899_v50 = vsel %vm896_vm4, %v5061_v51, %v883_v47 }
 0x356   :  { %3759 = vmatpush3.bf16.msra.mxu1 %v4960_v4 }
 0x357   :  { %3760 = vmatprep.subr.bf16.mxu1 %v4815_v0 }
 0x35a   :  { %3761 = vmatpush3.bf16.msra.mxu1 %v4965_v6 }
 0x35b   :  { %3762 = vmatprep.subr.bf16.mxu1 %v4815_v0 }
 0x35e   :  { %3763 = vmatpush3.bf16.msra.mxu1 %v4970_v8 }
 0x35f   :  { %3764 = vmatprep.subr.bf16.mxu1 %v4815_v0 }
 0x362   :  { %3765 = vmatpush3.bf16.msra.mxu1 %v4975_v10 }
 0x363   :  { %3766 = vmatprep.subr.bf16.mxu1 %v4815_v0 }
 0x366   :  { %3767 = vmatpush3.bf16.msra.mxu1 %v4978_v12 }
 0x367   :  { %3768 = vmatprep.subr.bf16.mxu1 %v4815_v0 }
 0x36a   :  { %3769 = vmatpush3.bf16.msra.mxu1 %v4983_v14 }
 0x36b   :  { %3770 = vmatprep.subr.bf16.mxu1 %v4815_v0 }
 0x36e   :  { %3771 = vmatpush3.bf16.msra.mxu1 %v4994_v18 }
 0x36f   :  { %3796 = vmatprep.subr.bf16.mxu1 %v4815_v0 }
 0x411   :  { %v508_v21 = vpop.f32.mrf.mxu1 }
 0x412   :  { %v515_v22 = vrot.slane %v508_v21, 4 }
 0x413   :  { %v3734_v23 = vpop.f32.mrf.mxu1 }
 0x414   :  { %v517_v25 = vadd.f32 %v515_v22, %v5046_v26 }
 0x415   :  { %v511_v27 = vpop.f32.mrf.mxu1 }
 0x416   :  { %v518_v28 = vmul.f32 %v517_v25, %v5050_v29 }
 0x417   :  { %v3735_v30 = vpop.f32.mrf.mxu1 }
 0x418   :  { %4493 = vtanh.f32 %v518_v28 }
 0x425   :  { %v4494_v31 = vpop.eup %4493 }
 0x426   :  { %v520_v32 = vadd.f32 1.0, %v4494_v31 }
 0x428   :  { %v521_v33 = vmul.f32 0.5, %v520_v32 }
 0x42a   :  { %v522_v34 = vsel %vm5042_vm3, %v4494_v31, %v521_v33 }
 0x42b   :  { %v524_v36 = vrot.slane %v522_v34, 4 }
 0x42d   :  { %526 = vrot.lane.b32.xlu1 %v524_v36, %s4820_s28  ;;  %528 = vrot.lane.b32.xlu0 %v524_v36, %s4807_s23 }
 0x431   :  { %530 = vrot.lane.b32.xlu0 %v524_v36, %s4819_s3 }
 0x49f   :  { %v529_v37 = vpop.permute.xlu0 %528  ;;  %v527_v39 = vpop.permute.xlu1 %526 }
 0x4a0   :  { %v534_v38 = vrot.slane %v529_v37, 4  ;;  %v532_v41 = vmul.f32 %v527_v39, %v470_v13 }
 0x4a2   :  { %v536_v40 = vmul.f32 %v534_v38, %v522_v34 }
 0x4a3   :  { %v531_v45 = vpop.permute.xlu0 %530 }
 0x4a4   :  { %v538_v42 = vrot.slane %v536_v40, 4 }
 0x4a6   :  { %v540_v43 = vadd.f32 %v538_v42, %v532_v41 }
 0x4a8   :  { %4495 = vtanh.f32 %v540_v43 }
 0x4b5   :  { %v4496_v44 = vpop.eup %4495 }
 0x4b6   :  { %v542_v46 = vmul.f32 %v4496_v44, %v531_v45 }
 0x4b8   :  { %v543_v48 = vpack.c.bf16 %v542_v46, %v542_v46 }
 0x4ba   :  { %v885_v49 = vrot.slane %v543_v48, 6  ;;  %3753 = vmatmul.mubr.bf16.vlgmr.msra.gmra.mxu0 %v543_v48 }
 0x4bb   :  { %3777 = vmatpush3.bf16.msra.mxu0 %v4956_v2  ;;  %3792 = vmatprep.mubr.msk.bf16.mxu0 %vm4816_vm0, %v4815_v0 }
 0x4bc   :  { %v902_v52 = vsel %vm900_vm5, %v899_v50, %v885_v49  ;;  %3778 = vmatprep.subr.bf16.mxu0 %v4815_v0 }
 0x4bf   :  { %3779 = vmatpush3.bf16.msra.mxu0 %v4960_v4 }
 0x4c0   :  { %3780 = vmatprep.subr.bf16.mxu0 %v4815_v0 }
 0x4c3   :  { %3781 = vmatpush3.bf16.msra.mxu0 %v4965_v6 }
 0x4c4   :  { %3782 = vmatprep.subr.bf16.mxu0 %v4815_v0 }
 0x4c7   :  { %3783 = vmatpush3.bf16.msra.mxu0 %v4970_v8 }
 0x4c8   :  { %3784 = vmatprep.subr.bf16.mxu0 %v4815_v0 }
 0x4cb   :  { %3785 = vmatpush3.bf16.msra.mxu0 %v4975_v10 }
 0x4cc   :  { %3786 = vmatprep.subr.bf16.mxu0 %v4815_v0 }
 0x4cf   :  { %3787 = vmatpush3.bf16.msra.mxu0 %v4978_v12 }
 0x4d0   :  { %3788 = vmatprep.subr.bf16.mxu0 %v4815_v0 }
 0x4d3   :  { %3789 = vmatpush3.bf16.msra.mxu0 %v4983_v14 }
 0x4d4   :  { %3790 = vmatprep.subr.bf16.mxu0 %v4815_v0 }
 0x4d7   :  { %3791 = vmatpush3.bf16.msra.mxu0 %v4994_v18 }
 0x4d8   :  { %3816 = vmatprep.subr.bf16.mxu0 %v4815_v0 }
 0x57a   :  { %v578_v51 = vpop.f32.mrf.mxu0 }
 0x57b   :  { %v585_v53 = vrot.slane %v578_v51, 2 }
 0x57c   :  { %v3754_v54 = vpop.f32.mrf.mxu0 }
 0x57d   :  { %v587_v55 = vadd.f32 %v585_v53, %v5046_v26 }
 0x57e   :  { %v581_v56 = vpop.f32.mrf.mxu0 }
 0x57f   :  { %v588_v57 = vmul.f32 %v587_v55, %v5050_v29 }
 0x580   :  { %v3755_v58 = vpop.f32.mrf.mxu0 }
 0x581   :  { %4497 = vtanh.f32 %v588_v57 }
 0x58e   :  { %v4498_v59 = vpop.eup %4497 }
 0x58f   :  { %v590_v60 = vadd.f32 1.0, %v4498_v59 }
 0x591   :  { %v591_v61 = vmul.f32 0.5, %v590_v60 }
 0x593   :  { %v592_v62 = vsel %vm5042_vm3, %v4498_v59, %v591_v61 }
 0x594   :  { %v594_v63 = vrot.slane %v592_v62, 6 }
 0x596   :  { %596 = vrot.lane.b32.xlu0 %v594_v63, %s4820_s28  ;;  %598 = vrot.lane.b32.xlu1 %v594_v63, %s4807_s23 }
 0x59a   :  { %600 = vrot.lane.b32.xlu1 %v594_v63, %s4819_s3 }
 0x608   :  { %v599_v1 = vpop.permute.xlu1 %598  ;;  %v597_v3 = vpop.permute.xlu0 %596 }
 0x609   :  { %v604_v26 = vrot.slane %v599_v1, 2  ;;  %v602_v7 = vmul.f32 %v597_v3, %v540_v43 }
 0x60b   :  { %v606_v5 = vmul.f32 %v604_v26, %v592_v62 }
 0x60c   :  { %v601_v15 = vpop.permute.xlu1 %600 }
 0x60d   :  { %v608_v9 = vrot.slane %v606_v5, 6 }
 0x60f   :  { %v610_v11 = vadd.f32 %v608_v9, %v602_v7 }
 0x611   :  { %4499 = vtanh.f32 %v610_v11 }
 0x61e   :  { %v4500_v13 = vpop.eup %4499 }
 0x61f   :  { %v612_v16 = vmul.f32 %v4500_v13, %v601_v15 }
 0x621   :  { %v613_v17 = vpack.c.bf16 %v612_v16, %v612_v16 }
 0x623   :  { %v887_v19 = vrot.slane %v613_v17, 5  ;;  %3773 = vmatmul.mubr.bf16.vlgmr.msra.gmra.mxu1 %v613_v17 }
 0x624   :  { %3797 = vmatpush3.bf16.msra.mxu1 %v4956_v2  ;;  %3812 = vmatprep.mubr.msk.bf16.mxu1 %vm4816_vm0, %v4815_v0 }
 0x625   :  { %v905_v21 = vsel %vm903_vm6, %v902_v52, %v887_v19  ;;  %3798 = vmatprep.subr.bf16.mxu1 %v4815_v0 }
 0x628   :  { %3799 = vmatpush3.bf16.msra.mxu1 %v4960_v4 }
 0x629   :  { %3800 = vmatprep.subr.bf16.mxu1 %v4815_v0 }
 0x62c   :  { %3801 = vmatpush3.bf16.msra.mxu1 %v4965_v6 }
 0x62d   :  { %3802 = vmatprep.subr.bf16.mxu1 %v4815_v0 }
 0x630   :  { %3803 = vmatpush3.bf16.msra.mxu1 %v4970_v8 }
 0x631   :  { %3804 = vmatprep.subr.bf16.mxu1 %v4815_v0 }
 0x634   :  { %3805 = vmatpush3.bf16.msra.mxu1 %v4975_v10 }
 0x635   :  { %3806 = vmatprep.subr.bf16.mxu1 %v4815_v0 }
 0x638   :  { %3807 = vmatpush3.bf16.msra.mxu1 %v4978_v12 }
 0x639   :  { %3808 = vmatprep.subr.bf16.mxu1 %v4815_v0 }
 0x63c   :  { %3809 = vmatpush3.bf16.msra.mxu1 %v4983_v14 }
 0x63d   :  { %3810 = vmatprep.subr.bf16.mxu1 %v4815_v0 }
 0x640   :  { %3811 = vmatpush3.bf16.msra.mxu1 %v4994_v18 }
 0x641   :  { %3836 = vmatprep.subr.bf16.mxu1 %v4815_v0 }
 0x6e3   :  { %v648_v22 = vpop.f32.mrf.mxu1 }
 0x6e4   :  { %v654_v23 = vadd.f32 %v648_v22, %v5054_v35 }
 0x6e5   :  { %v3774_v25 = vpop.f32.mrf.mxu1 }
 0x6e6   :  { %v655_v27 = vmul.f32 %v654_v23, %v5050_v29 }
 0x6e7   :  { %v651_v28 = vpop.f32.mrf.mxu1 }
 0x6e8   :  { %4501 = vtanh.f32 %v655_v27 }
 0x6e9   :  { %v3775_v30 = vpop.f32.mrf.mxu1 }
 0x6f5   :  { %v4502_v31 = vpop.eup %4501 }
 0x6f6   :  { %v657_v32 = vadd.f32 1.0, %v4502_v31 }
 0x6f8   :  { %v658_v33 = vmul.f32 0.5, %v657_v32 }
 0x6fa   :  { %v659_v34 = vsel %vm5042_vm3, %v4502_v31, %v658_v33 }
 0x6fb   :  { %662 = vrot.lane.b32.xlu1 %v659_v34, %s4807_s23  ;;  %660 = vrot.lane.b32.xlu0 %v659_v34, %s4820_s28 }
 0x6ff   :  { %664 = vrot.lane.b32.xlu0 %v659_v34, %s4819_s3 }
 0x76d   :  { %v663_v36 = vpop.permute.xlu1 %662  ;;  %v661_v37 = vpop.permute.xlu0 %660 }
 0x76e   :  { %v667_v38 = vmul.f32 %v663_v36, %v659_v34  ;;  %v666_v39 = vmul.f32 %v661_v37, %v610_v11 }
 0x770   :  { %v668_v40 = vadd.f32 %v667_v38, %v666_v39  ;;  %v5212_v38 = vld [vmem:[#allocation8 + $0x38] sm:$0xff]  }
 0x771   :  { %v665_v42 = vpop.permute.xlu0 %664  ;;  %v4430_v39 = vld [vmem:[#allocation7 + $0x38] sm:$0xff]  }
 0x772   :  { %4503 = vtanh.f32 %v668_v40 }
 0x77f   :  { %v4504_v41 = vpop.eup %4503 }
 0x780   :  { %v670_v43 = vmul.f32 %v4504_v41, %v665_v42 }
 0x782   :  { %v671_v44 = vpack.c.bf16 %v670_v43, %v670_v43 }
 0x784   :  { %v889_v45 = vrot.slane %v671_v44, 4  ;;  %3793 = vmatmul.mubr.bf16.vlgmr.msra.gmra.mxu0 %v671_v44 }
 0x785   :  { %3817 = vmatpush3.bf16.msra.mxu0 %v4956_v2  ;;  %3832 = vmatprep.mubr.msk.bf16.mxu0 %vm4816_vm0, %v4815_v0 }
 0x786   :  { %v908_v46 = vsel %vm906_vm7, %v905_v21, %v889_v45  ;;  %3818 = vmatprep.subr.bf16.mxu0 %v4815_v0 }
 0x789   :  { %3819 = vmatpush3.bf16.msra.mxu0 %v4960_v4 }
 0x78a   :  { %3820 = vmatprep.subr.bf16.mxu0 %v4815_v0 }
 0x78d   :  { %3821 = vmatpush3.bf16.msra.mxu0 %v4965_v6 }
 0x78e   :  { %3822 = vmatprep.subr.bf16.mxu0 %v4815_v0 }
 0x791   :  { %3823 = vmatpush3.bf16.msra.mxu0 %v4970_v8 }
 0x792   :  { %3824 = vmatprep.subr.bf16.mxu0 %v4815_v0 }
 0x795   :  { %3825 = vmatpush3.bf16.msra.mxu0 %v4975_v10 }
 0x796   :  { %3826 = vmatprep.subr.bf16.mxu0 %v4815_v0 }
 0x799   :  { %3827 = vmatpush3.bf16.msra.mxu0 %v4978_v12 }
 0x79a   :  { %3828 = vmatprep.subr.bf16.mxu0 %v4815_v0 }
 0x79d   :  { %3829 = vmatpush3.bf16.msra.mxu0 %v4983_v14 }
 0x79e   :  { %3830 = vmatprep.subr.bf16.mxu0 %v4815_v0 }
 0x7a1   :  { %3831 = vmatpush3.bf16.msra.mxu0 %v4994_v18 }
 0x7a2   :  { %3856 = vmatprep.subr.bf16.mxu0 %v4815_v0 }
 0x844   :  { %v706_v2 = vpop.f32.mrf.mxu0 }
 0x845   :  { %v713_v4 = vrot.slane %v706_v2, 6 }
 0x846   :  { %v3794_v6 = vpop.f32.mrf.mxu0 }
 0x847   :  { %v715_v8 = vadd.f32 %v713_v4, %v5054_v35  ;;  %v4432_v4 = vld [vmem:[#allocation7 + $0x30] sm:$0xff]   ;;  %v5223_v6 = vld [vmem:[#allocation8 + $0x28] sm:$0xff]  }
 0x848   :  { %v709_v10 = vpop.f32.mrf.mxu0 }
 0x849   :  { %v716_v47 = vmul.f32 %v715_v8, %v5050_v29  ;;  %v4434_v10 = vld [vmem:[#allocation7 + $0x28] sm:$0xff]  }
 0x84a   :  { %v3795_v48 = vpop.f32.mrf.mxu0 }
 0x84b   :  { %4505 = vtanh.f32 %v716_v47  ;;  %v5228_v47 = vld [vmem:[#allocation8 + $0x20] sm:$0xff]  }
 0x858   :  { %v4506_v12 = vpop.eup %4505 }
 0x859   :  { %v718_v49 = vadd.f32 1.0, %v4506_v12 }
 0x85b   :  { %v719_v50 = vmul.f32 0.5, %v718_v49  ;;  %v5233_v49 = vld [vmem:[#allocation8 + $0x18] sm:$0xff]  }
 0x85d   :  { %v720_v14 = vsel %vm5042_vm3, %v4506_v12, %v719_v50  ;;  %v4436_v12 = vld [vmem:[#allocation7 + $0x20] sm:$0xff]  }
 0x85e   :  { %v722_v52 = vrot.slane %v720_v14, 2 }
 0x860   :  { %724 = vrot.lane.b32.xlu0 %v722_v52, %s4820_s28  ;;  %726 = vrot.lane.b32.xlu1 %v722_v52, %s4807_s23 }
 0x864   :  { %728 = vrot.lane.b32.xlu1 %v722_v52, %s4819_s3  ;;  %v4438_v52 = vld [vmem:[#allocation7 + $0x18] sm:$0xff]  }
 0x8d2   :  { %v727_v18 = vpop.permute.xlu1 %726  ;;  %v725_v53 = vpop.permute.xlu0 %724 }
 0x8d3   :  { %v732_v51 = vrot.slane %v727_v18, 6  ;;  %v730_v55 = vmul.f32 %v725_v53, %v668_v40  ;;  %v5215_v40 = vld [vmem:[#allocation8 + $0x30] sm:$0xff]   ;;  %v5248_v53 = vld [vmem:[#allocation8 + $0x8] sm:$0xff]  }
 0x8d4   :  { %v5242_v18 = vld [vmem:[#allocation8 + $0x10] sm:$0xff]  }
 0x8d5   :  { %v734_v54 = vmul.f32 %v732_v51, %v720_v14  ;;  %v4440_v51 = vld [vmem:[#allocation7 + $0x10] sm:$0xff]  }
 0x8d6   :  { %v729_v59 = vpop.permute.xlu1 %728 }
 0x8d7   :  { %v736_v56 = vrot.slane %v734_v54, 2  ;;  %v4442_v54 = vld [vmem:[#allocation7 + $0x8] sm:$0xff]  }
 0x8d9   :  { %v738_v57 = vadd.f32 %v736_v56, %v730_v55  ;;  %v5253_v55 = vld [vmem:[#allocation8] sm:$0xff]  }
 0x8da   :  { %v4444_v56 = vld [vmem:[#allocation7] sm:$0xff]  }
 0x8db   :  { %4507 = vtanh.f32 %v738_v57 }
 0x8e8   :  { %v4508_v58 = vpop.eup %4507 }
 0x8e9   :  { %v740_v60 = vmul.f32 %v4508_v58, %v729_v59 }
 0x8eb   :  { %v741_v61 = vpack.c.bf16 %v740_v60, %v740_v60 }
 0x8ed   :  { %v891_v62 = vrot.slane %v741_v61, 3  ;;  %3813 = vmatmul.mubr.bf16.vlgmr.msra.gmra.mxu1 %v741_v61 }
 0x8ee   :  { %3852 = vmatprep.mubr.msk.bf16.mxu1 %vm4816_vm0, %v4815_v0  ;;  %3837 = vmatpush3.bf16.msra.mxu1 %v4430_v39 }
 0x8ef   :  { %v911_v63 = vsel %vm909_vm8, %v908_v46, %v891_v62  ;;  %3838 = vmatprep.subr.bf16.mxu1 %v4815_v0 }
 0x8f2   :  { %3839 = vmatpush3.bf16.msra.mxu1 %v4432_v4 }
 0x8f3   :  { %3840 = vmatprep.subr.bf16.mxu1 %v4815_v0 }
 0x8f6   :  { %3841 = vmatpush3.bf16.msra.mxu1 %v4434_v10 }
 0x8f7   :  { %3842 = vmatprep.subr.bf16.mxu1 %v4815_v0 }
 0x8fa   :  { %3843 = vmatpush3.bf16.msra.mxu1 %v4436_v12 }
 0x8fb   :  { %3844 = vmatprep.subr.bf16.mxu1 %v4815_v0 }
 0x8fe   :  { %3845 = vmatpush3.bf16.msra.mxu1 %v4438_v52 }
 0x8ff   :  { %3846 = vmatprep.subr.bf16.mxu1 %v4815_v0 }
 0x902   :  { %3847 = vmatpush3.bf16.msra.mxu1 %v4440_v51 }
 0x903   :  { %3848 = vmatprep.subr.bf16.mxu1 %v4815_v0 }
 0x906   :  { %3849 = vmatpush3.bf16.msra.mxu1 %v4442_v54 }
 0x907   :  { %3850 = vmatprep.subr.bf16.mxu1 %v4815_v0 }
 0x90a   :  { %3851 = vmatpush3.bf16.msra.mxu1 %v4444_v56 }
 0x90b   :  { %3876 = vmatprep.subr.bf16.mxu1 %v4815_v0 }
 0x9ad   :  { %v776_v1 = vpop.f32.mrf.mxu1 }
 0x9ae   :  { %v783_v26 = vrot.slane %v776_v1, 4 }
 0x9af   :  { %v3814_v3 = vpop.f32.mrf.mxu1 }
 0x9b0   :  { %v785_v5 = vadd.f32 %v783_v26, %v5054_v35 }
 0x9b1   :  { %v779_v7 = vpop.f32.mrf.mxu1 }
 0x9b2   :  { %v786_v9 = vmul.f32 %v785_v5, %v5050_v29 }
 0x9b3   :  { %v3815_v11 = vpop.f32.mrf.mxu1 }
 0x9b4   :  { %4509 = vtanh.f32 %v786_v9 }
 0x9c1   :  { %v4510_v13 = vpop.eup %4509 }
 0x9c2   :  { %v788_v15 = vadd.f32 1.0, %v4510_v13 }
 0x9c4   :  { %v789_v16 = vmul.f32 0.5, %v788_v15 }
 0x9c6   :  { %v790_v17 = vsel %vm5042_vm3, %v4510_v13, %v789_v16 }
 0x9c7   :  { %v792_v19 = vrot.slane %v790_v17, 4 }
 0x9c9   :  { %794 = vrot.lane.b32.xlu1 %v792_v19, %s4820_s28  ;;  %796 = vrot.lane.b32.xlu0 %v792_v19, %s4807_s23 }
 0x9cd   :  { %798 = vrot.lane.b32.xlu0 %v792_v19, %s4819_s3 }
 0xa3b   :  { %v797_v21 = vpop.permute.xlu0 %796  ;;  %v795_v23 = vpop.permute.xlu1 %794 }
 0xa3c   :  { %v802_v22 = vrot.slane %v797_v21, 4  ;;  %v800_v27 = vmul.f32 %v795_v23, %v738_v57 }
 0xa3e   :  { %v804_v25 = vmul.f32 %v802_v22, %v790_v17  ;;  %v3263_v17 = vld [vmem:[%s6000_s6] ss:$0 sm:$0xff] }
 0xa3f   :  { %v799_v32 = vpop.permute.xlu0 %798 }
 0xa40   :  { %v806_v28 = vrot.slane %v804_v25, 4 }
 0xa42   :  { %v5204_v30 = vadd.f32 %v806_v28, %v800_v27 }
 0xa44   :  { %4511 = vtanh.f32 %v5204_v30 }
 0xa51   :  { %v4512_v31 = vpop.eup %4511 }
 0xa52   :  { %v810_v33 = vmul.f32 %v4512_v31, %v799_v32 }
 0xa54   :  { %v811_v34 = vpack.c.bf16 %v810_v33, %v810_v33 }
 0xa56   :  { %v893_v36 = vrot.slane %v811_v34, 2  ;;  %3833 = vmatmul.mubr.bf16.vlgmr.msra.gmra.mxu0 %v811_v34 }
 0xa57   :  { %3872 = vmatprep.mubr.msk.bf16.mxu0 %vm4816_vm0, %v4815_v0  ;;  %3857 = vmatpush3.bf16.msra.mxu0 %v5212_v38 }
 0xa58   :  { %v5210_v37 = vsel %vm912_vm9, %v911_v63, %v893_v36  ;;  %3858 = vmatprep.subr.bf16.mxu0 %v4815_v0 }
 0xa5b   :  { %3859 = vmatpush3.bf16.msra.mxu0 %v5215_v40 }
 0xa5c   :  { %3860 = vmatprep.subr.bf16.mxu0 %v4815_v0 }
 0xa5f   :  { %3861 = vmatpush3.bf16.msra.mxu0 %v5223_v6 }
 0xa60   :  { %3862 = vmatprep.subr.bf16.mxu0 %v4815_v0 }
 0xa63   :  { %3863 = vmatpush3.bf16.msra.mxu0 %v5228_v47 }
 0xa64   :  { %3864 = vmatprep.subr.bf16.mxu0 %v4815_v0 }
 0xa67   :  { %3865 = vmatpush3.bf16.msra.mxu0 %v5233_v49 }
 0xa68   :  { %3866 = vmatprep.subr.bf16.mxu0 %v4815_v0 }
 0xa6b   :  { %3867 = vmatpush3.bf16.msra.mxu0 %v5242_v18 }
 0xa6c   :  { %3868 = vmatprep.subr.bf16.mxu0 %v4815_v0 }
 0xa6f   :  { %3869 = vmatpush3.bf16.msra.mxu0 %v5248_v53 }
 0xa70   :  { %3870 = vmatprep.subr.bf16.mxu0 %v4815_v0 }
 0xa73   :  { %3871 = vmatpush3.bf16.msra.mxu0 %v5253_v55 }
 0xa74   :  { %3896 = vmatprep.subr.bf16.mxu0 %v4815_v0 }
 0xa76   :  { %3873 = vmatmul.mubr.bf16.vlgmr.msra.gmra.mxu0 %v4817_v20 }
 0xa77   :  { %3897 = vmatpush3.bf16.msra.mxu0 %v5212_v38  ;;  %3912 = vmatprep.mubr.msk.bf16.mxu0 %vm4816_vm0, %v4815_v0 }
 0xa78   :  { %3898 = vmatprep.subr.bf16.mxu0 %v4815_v0 }
 0xa7b   :  { %3899 = vmatpush3.bf16.msra.mxu0 %v5215_v40 }
 0xa7c   :  { %3900 = vmatprep.subr.bf16.mxu0 %v4815_v0 }
 0xa7f   :  { %3901 = vmatpush3.bf16.msra.mxu0 %v5223_v6 }
 0xa80   :  { %3902 = vmatprep.subr.bf16.mxu0 %v4815_v0 }
 0xa83   :  { %3903 = vmatpush3.bf16.msra.mxu0 %v5228_v47 }
 0xa84   :  { %3904 = vmatprep.subr.bf16.mxu0 %v4815_v0 }
 0xa87   :  { %3905 = vmatpush3.bf16.msra.mxu0 %v5233_v49 }
 0xa88   :  { %3906 = vmatprep.subr.bf16.mxu0 %v4815_v0 }
 0xa8b   :  { %3907 = vmatpush3.bf16.msra.mxu0 %v5242_v18 }
 0xa8c   :  { %3908 = vmatprep.subr.bf16.mxu0 %v4815_v0 }
 0xa8f   :  { %3909 = vmatpush3.bf16.msra.mxu0 %v5248_v53 }
 0xa90   :  { %3910 = vmatprep.subr.bf16.mxu0 %v4815_v0 }
 0xa93   :  { %3911 = vmatpush3.bf16.msra.mxu0 %v5253_v55 }
 0xa94   :  { %3936 = vmatprep.subr.bf16.mxu0 %v4815_v0 }
 0xb16   :  { %v846_v41 = vpop.f32.mrf.mxu0 }
 0xb17   :  { %v853_v42 = vrot.slane %v846_v41, 2 }
 0xb18   :  { %v3834_v43 = vpop.f32.mrf.mxu0 }
 0xb19   :  { %v855_v44 = vadd.f32 %v853_v42, %v5054_v35 }
 0xb1a   :  { %v849_v45 = vpop.f32.mrf.mxu0 }
 0xb1b   :  { %v856_v46 = vmul.f32 %v855_v44, %v5050_v29 }
 0xb1c   :  { %v3835_v2 = vpop.f32.mrf.mxu0 }
 0xb1d   :  { %4513 = vtanh.f32 %v856_v46 }
 0xb2a   :  { %v4514_v8 = vpop.eup %4513 }
 0xb2b   :  { %v858_v35 = vadd.f32 1.0, %v4514_v8 }
 0xb2d   :  { %v859_v48 = vmul.f32 0.5, %v858_v35 }
 0xb2f   :  { %v860_v50 = vsel %vm5042_vm3, %v4514_v8, %v859_v48 }
 0xb30   :  { %v862_v14 = vrot.slane %v860_v50, 6 }
 0xb32   :  { %864 = vrot.lane.b32.xlu0 %v862_v14, %s4820_s28  ;;  %866 = vrot.lane.b32.xlu1 %v862_v14, %s4807_s23 }
 0xb36   :  { %868 = vrot.lane.b32.xlu1 %v862_v14, %s4819_s3  ;;  %v1129_v11 = vpop.f32.mrf.mxu0 }
 0xb38   :  { %v3874_v13 = vpop.f32.mrf.mxu0 }
 0xb3a   :  { %v1132_v15 = vpop.f32.mrf.mxu0 }
 0xb3c   :  { %v3875_v16 = vpop.f32.mrf.mxu0 }
 0xba4   :  { %v867_v57 = vpop.permute.xlu1 %866  ;;  %v865_v59 = vpop.permute.xlu0 %864 }
 0xba5   :  { %v872_v58 = vrot.slane %v867_v57, 2  ;;  %v870_v61 = vmul.f32 %v865_v59, %v5204_v30 }
 0xba7   :  { %v874_v60 = vmul.f32 %v872_v58, %v860_v50 }
 0xba8   :  { %v869_v26 = vpop.permute.xlu1 %868 }
 0xba9   :  { %v876_v62 = vrot.slane %v874_v60, 6 }
 0xbab   :  { %v878_v63 = vadd.f32 %v876_v62, %v870_v61 }
 0xbad   :  { %4515 = vtanh.f32 %v878_v63 }
 0xbba   :  { %v4516_v1 = vpop.eup %4515 }
 0xbbb   :  { %v880_v3 = vmul.f32 %v4516_v1, %v869_v26 }
 0xbbd   :  { %v881_v5 = vpack.c.bf16 %v880_v3, %v880_v3 }
 0xbbf   :  { %v895_v7 = vrot.slane %v881_v5, 1 }
 0xbc1   :  { %v917_v9 = vsel %vm915_vm10, %v5210_v37, %v895_v7 }
 0xbc2   :  { %3853 = vmatmul.mubr.bf16.vlgmr.msra.gmra.mxu1 %v917_v9 }
 0xbc3   :  { %3877 = vmatpush3.bf16.msra.mxu1 %v5212_v38  ;;  %3892 = vmatprep.mubr.msk.bf16.mxu1 %vm4816_vm0, %v4815_v0 }
 0xbc4   :  { %3878 = vmatprep.subr.bf16.mxu1 %v4815_v0 }
 0xbc7   :  { %3879 = vmatpush3.bf16.msra.mxu1 %v5215_v40 }
 0xbc8   :  { %3880 = vmatprep.subr.bf16.mxu1 %v4815_v0 }
 0xbcb   :  { %3881 = vmatpush3.bf16.msra.mxu1 %v5223_v6 }
 0xbcc   :  { %3882 = vmatprep.subr.bf16.mxu1 %v4815_v0 }
 0xbcf   :  { %3883 = vmatpush3.bf16.msra.mxu1 %v5228_v47 }
 0xbd0   :  { %3884 = vmatprep.subr.bf16.mxu1 %v4815_v0 }
 0xbd3   :  { %3885 = vmatpush3.bf16.msra.mxu1 %v5233_v49 }
 0xbd4   :  { %3886 = vmatprep.subr.bf16.mxu1 %v4815_v0 }
 0xbd7   :  { %3887 = vmatpush3.bf16.msra.mxu1 %v5242_v18 }
 0xbd8   :  { %3888 = vmatprep.subr.bf16.mxu1 %v4815_v0 }
 0xbdb   :  { %3889 = vmatpush3.bf16.msra.mxu1 %v5248_v53 }
 0xbdc   :  { %3890 = vmatprep.subr.bf16.mxu1 %v4815_v0 }
 0xbdf   :  { %3891 = vmatpush3.bf16.msra.mxu1 %v5253_v55 }
 0xbe0   :  { %3916 = vmatprep.subr.bf16.mxu1 %v4815_v0 }
 0xc82   :  { %v1024_v19 = vpop.f32.mrf.mxu1 }
 0xc83   :  { %v5302_v21 = vadd.f32 %v3263_v17, %v1024_v19 }
 0xc84   :  { %v3854_v22 = vpop.f32.mrf.mxu1 }
 0xc85   :  { %v1135_v23 = vadd.f32 %v1129_v11, %v5302_v21 }
 0xc86   :  { %v1027_v25 = vpop.f32.mrf.mxu1 }
 0xc87   :  { %v1136_v27 = vmul.f32 %v1135_v23, %v5050_v29  ;;  %v5306_v28 = vadd.f32 %v3263_v17, %v1027_v25 }
 0xc88   :  { %v3855_v30 = vpop.f32.mrf.mxu1 }
 0xc89   :  { %4517 = vtanh.f32 %v1136_v27 }
 0xc96   :  { %v4518_v31 = vpop.eup %4517 }
 0xc97   :  { %v1138_v32 = vadd.f32 1.0, %v4518_v31 }
 0xc99   :  { %v1139_v33 = vmul.f32 0.5, %v1138_v32 }
 0xc9b   :  { %v1140_v34 = vsel %vm5042_vm3, %v4518_v31, %v1139_v33 }
 0xc9c   :  { %1143 = vrot.lane.b32.xlu1 %v1140_v34, %s4807_s23  ;;  %1141 = vrot.lane.b32.xlu0 %v1140_v34, %s4820_s28 }
 0xca0   :  { %1145 = vrot.lane.b32.xlu0 %v1140_v34, %s4819_s3 }
 0xd0e   :  { %v1144_v36 = vpop.permute.xlu1 %1143  ;;  %v1142_v37 = vpop.permute.xlu0 %1141 }
 0xd0f   :  { %v1148_v39 = vmul.f32 %v1144_v36, %v1140_v34  ;;  %v1147_v41 = vmul.f32 0.0, %v1142_v37 }
 0xd11   :  { %v1149_v42 = vadd.f32 %v1148_v39, %v1147_v41 }
 0xd12   :  { %v1146_v44 = vpop.permute.xlu0 %1145 }
 0xd13   :  { %4519 = vtanh.f32 %v1149_v42 }
 0xd20   :  { %v4520_v43 = vpop.eup %4519 }
 0xd21   :  { %v1151_v45 = vmul.f32 %v4520_v43, %v1146_v44 }
 0xd23   :  { %v5313_v46 = vpack.c.bf16 %v1151_v45, %v1151_v45 }
 0xd25   :  { %3893 = vmatmul.mubr.bf16.vlgmr.msra.gmra.mxu1 %v5313_v46 }
 0xd26   :  { %3917 = vmatpush3.bf16.msra.mxu1 %v5212_v38  ;;  %3932 = vmatprep.mubr.msk.bf16.mxu1 %vm4816_vm0, %v4815_v0 }
 0xd27   :  { %3918 = vmatprep.subr.bf16.mxu1 %v4815_v0 }
 0xd2a   :  { %3919 = vmatpush3.bf16.msra.mxu1 %v5215_v40 }
 0xd2b   :  { %3920 = vmatprep.subr.bf16.mxu1 %v4815_v0 }
 0xd2e   :  { %3921 = vmatpush3.bf16.msra.mxu1 %v5223_v6 }
 0xd2f   :  { %3922 = vmatprep.subr.bf16.mxu1 %v4815_v0 }
 0xd32   :  { %3923 = vmatpush3.bf16.msra.mxu1 %v5228_v47 }
 0xd33   :  { %3924 = vmatprep.subr.bf16.mxu1 %v4815_v0 }
 0xd36   :  { %3925 = vmatpush3.bf16.msra.mxu1 %v5233_v49 }
 0xd37   :  { %3926 = vmatprep.subr.bf16.mxu1 %v4815_v0 }
 0xd3a   :  { %3927 = vmatpush3.bf16.msra.mxu1 %v5242_v18 }
 0xd3b   :  { %3928 = vmatprep.subr.bf16.mxu1 %v4815_v0 }
 0xd3e   :  { %3929 = vmatpush3.bf16.msra.mxu1 %v5248_v53 }
 0xd3f   :  { %3930 = vmatprep.subr.bf16.mxu1 %v4815_v0 }
 0xd42   :  { %3931 = vmatpush3.bf16.msra.mxu1 %v5253_v55 }
 0xd43   :  { %3956 = vmatprep.subr.bf16.mxu1 %v4815_v0 }
 0xde5   :  { %v1187_v2 = vpop.f32.mrf.mxu1 }
 0xde6   :  { %v1194_v4 = vrot.slane %v1187_v2, 6 }
 0xde7   :  { %v3894_v8 = vpop.f32.mrf.mxu1 }
 0xde8   :  { %v1196_v10 = vadd.f32 %v1194_v4, %v5302_v21 }
 0xde9   :  { %v1190_v35 = vpop.f32.mrf.mxu1 }
 0xdea   :  { %v1197_v48 = vmul.f32 %v1196_v10, %v5050_v29 }
 0xdeb   :  { %v3895_v12 = vpop.f32.mrf.mxu1 }
 0xdec   :  { %4521 = vtanh.f32 %v1197_v48 }
 0xdf9   :  { %v4522_v50 = vpop.eup %4521 }
 0xdfa   :  { %v1199_v14 = vadd.f32 1.0, %v4522_v50 }
 0xdfc   :  { %v1200_v52 = vmul.f32 0.5, %v1199_v14 }
 0xdfe   :  { %v1201_v51 = vsel %vm5042_vm3, %v4522_v50, %v1200_v52 }
 0xdff   :  { %v1203_v54 = vrot.slane %v1201_v51, 2 }
 0xe01   :  { %1205 = vrot.lane.b32.xlu0 %v1203_v54, %s4820_s28  ;;  %1207 = vrot.lane.b32.xlu1 %v1203_v54, %s4807_s23 }
 0xe05   :  { %1209 = vrot.lane.b32.xlu1 %v1203_v54, %s4819_s3 }
 0xe73   :  { %v1208_v56 = vpop.permute.xlu1 %1207  ;;  %v1206_v58 = vpop.permute.xlu0 %1205 }
 0xe74   :  { %v1213_v57 = vrot.slane %v1208_v56, 6  ;;  %v1211_v60 = vmul.f32 %v1206_v58, %v1149_v42 }
 0xe76   :  { %v1215_v59 = vmul.f32 %v1213_v57, %v1201_v51 }
 0xe77   :  { %v1210_v1 = vpop.permute.xlu1 %1209 }
 0xe78   :  { %v1217_v61 = vrot.slane %v1215_v59, 2 }
 0xe7a   :  { %v1219_v62 = vadd.f32 %v1217_v61, %v1211_v60 }
 0xe7c   :  { %4523 = vtanh.f32 %v1219_v62 }
 0xe89   :  { %v4524_v63 = vpop.eup %4523 }
 0xe8a   :  { %v1221_v26 = vmul.f32 %v4524_v63, %v1210_v1 }
 0xe8c   :  { %v1222_v3 = vpack.c.bf16 %v1221_v26, %v1221_v26 }
 0xe8e   :  { %3913 = vmatmul.mubr.bf16.vlgmr.msra.gmra.mxu0 %v1222_v3  ;;  %v1632_v42 = vrot.slane %v1222_v3, 7 }
 0xe8f   :  { %3937 = vmatpush3.bf16.msra.mxu0 %v5212_v38  ;;  %3952 = vmatprep.mubr.msk.bf16.mxu0 %vm4816_vm0, %v4815_v0 }
 0xe90   :  { %3938 = vmatprep.subr.bf16.mxu0 %v4815_v0  ;;  %v1647_v45 = vsel %vm896_vm4, %v5313_v46, %v1632_v42 }
 0xe93   :  { %3939 = vmatpush3.bf16.msra.mxu0 %v5215_v40 }
 0xe94   :  { %3940 = vmatprep.subr.bf16.mxu0 %v4815_v0 }
 0xe97   :  { %3941 = vmatpush3.bf16.msra.mxu0 %v5223_v6 }
 0xe98   :  { %3942 = vmatprep.subr.bf16.mxu0 %v4815_v0 }
 0xe9b   :  { %3943 = vmatpush3.bf16.msra.mxu0 %v5228_v47 }
 0xe9c   :  { %3944 = vmatprep.subr.bf16.mxu0 %v4815_v0 }
 0xe9f   :  { %3945 = vmatpush3.bf16.msra.mxu0 %v5233_v49 }
 0xea0   :  { %3946 = vmatprep.subr.bf16.mxu0 %v4815_v0 }
 0xea3   :  { %3947 = vmatpush3.bf16.msra.mxu0 %v5242_v18 }
 0xea4   :  { %3948 = vmatprep.subr.bf16.mxu0 %v4815_v0 }
 0xea7   :  { %3949 = vmatpush3.bf16.msra.mxu0 %v5248_v53 }
 0xea8   :  { %3950 = vmatprep.subr.bf16.mxu0 %v4815_v0 }
 0xeab   :  { %3951 = vmatpush3.bf16.msra.mxu0 %v5253_v55 }
 0xeac   :  { %3976 = vmatprep.subr.bf16.mxu0 %v4815_v0 }
 0xf4e   :  { %v1257_v5 = vpop.f32.mrf.mxu0 }
 0xf4f   :  { %v1264_v7 = vrot.slane %v1257_v5, 4 }
 0xf50   :  { %v3914_v9 = vpop.f32.mrf.mxu0 }
 0xf51   :  { %v1266_v11 = vadd.f32 %v1264_v7, %v5302_v21 }
 0xf52   :  { %v1260_v13 = vpop.f32.mrf.mxu0 }
 0xf53   :  { %v1267_v15 = vmul.f32 %v1266_v11, %v5050_v29 }
 0xf54   :  { %v3915_v16 = vpop.f32.mrf.mxu0 }
 0xf55   :  { %4525 = vtanh.f32 %v1267_v15 }
 0xf62   :  { %v4526_v17 = vpop.eup %4525 }
 0xf63   :  { %v1269_v19 = vadd.f32 1.0, %v4526_v17 }
 0xf65   :  { %v1270_v22 = vmul.f32 0.5, %v1269_v19 }
 0xf67   :  { %v1271_v23 = vsel %vm5042_vm3, %v4526_v17, %v1270_v22 }
 0xf68   :  { %v1273_v25 = vrot.slane %v1271_v23, 4 }
 0xf6a   :  { %1275 = vrot.lane.b32.xlu1 %v1273_v25, %s4820_s28  ;;  %1277 = vrot.lane.b32.xlu0 %v1273_v25, %s4807_s23 }
 0xf6e   :  { %1279 = vrot.lane.b32.xlu0 %v1273_v25, %s4819_s3 }
 0xfdc   :  { %v1278_v27 = vpop.permute.xlu0 %1277  ;;  %v1276_v31 = vpop.permute.xlu1 %1275 }
 0xfdd   :  { %v1283_v30 = vrot.slane %v1278_v27, 4  ;;  %v1281_v33 = vmul.f32 %v1276_v31, %v1219_v62 }
 0xfdf   :  { %v1285_v32 = vmul.f32 %v1283_v30, %v1271_v23 }
 0xfe0   :  { %v1280_v39 = vpop.permute.xlu0 %1279 }
 0xfe1   :  { %v1287_v34 = vrot.slane %v1285_v32, 4 }
 0xfe3   :  { %v1289_v36 = vadd.f32 %v1287_v34, %v1281_v33 }
 0xfe5   :  { %4527 = vtanh.f32 %v1289_v36 }
 0xff2   :  { %v4528_v37 = vpop.eup %4527 }
 0xff3   :  { %v1291_v41 = vmul.f32 %v4528_v37, %v1280_v39 }
 0xff5   :  { %v1292_v43 = vpack.c.bf16 %v1291_v41, %v1291_v41 }
 0xff7   :  { %v1634_v44 = vrot.slane %v1292_v43, 6  ;;  %3933 = vmatmul.mubr.bf16.vlgmr.msra.gmra.mxu1 %v1292_v43 }
 0xff8   :  { %3957 = vmatpush3.bf16.msra.mxu1 %v5212_v38  ;;  %3972 = vmatprep.mubr.msk.bf16.mxu1 %vm4816_vm0, %v4815_v0 }
 0xff9   :  { %v1649_v2 = vsel %vm900_vm5, %v1647_v45, %v1634_v44  ;;  %3958 = vmatprep.subr.bf16.mxu1 %v4815_v0 }
 0xffc   :  { %3959 = vmatpush3.bf16.msra.mxu1 %v5215_v40 }
 0xffd   :  { %3960 = vmatprep.subr.bf16.mxu1 %v4815_v0 }
0x1000   :  { %3961 = vmatpush3.bf16.msra.mxu1 %v5223_v6 }
0x1001   :  { %3962 = vmatprep.subr.bf16.mxu1 %v4815_v0 }
0x1004   :  { %3963 = vmatpush3.bf16.msra.mxu1 %v5228_v47 }
0x1005   :  { %3964 = vmatprep.subr.bf16.mxu1 %v4815_v0 }
0x1008   :  { %3965 = vmatpush3.bf16.msra.mxu1 %v5233_v49 }
0x1009   :  { %3966 = vmatprep.subr.bf16.mxu1 %v4815_v0 }
0x100c   :  { %3967 = vmatpush3.bf16.msra.mxu1 %v5242_v18 }
0x100d   :  { %3968 = vmatprep.subr.bf16.mxu1 %v4815_v0 }
0x1010   :  { %3969 = vmatpush3.bf16.msra.mxu1 %v5248_v53 }
0x1011   :  { %3970 = vmatprep.subr.bf16.mxu1 %v4815_v0 }
0x1014   :  { %3971 = vmatpush3.bf16.msra.mxu1 %v5253_v55 }
0x1015   :  { %3996 = vmatprep.subr.bf16.mxu1 %v4815_v0 }
0x10b7   :  { %v1327_v46 = vpop.f32.mrf.mxu1 }
0x10b8   :  { %v1334_v4 = vrot.slane %v1327_v46, 2 }
0x10b9   :  { %v3934_v8 = vpop.f32.mrf.mxu1 }
0x10ba   :  { %v1336_v10 = vadd.f32 %v1334_v4, %v5302_v21 }
0x10bb   :  { %v1330_v35 = vpop.f32.mrf.mxu1 }
0x10bc   :  { %v1337_v48 = vmul.f32 %v1336_v10, %v5050_v29 }
0x10bd   :  { %v3935_v12 = vpop.f32.mrf.mxu1 }
0x10be   :  { %4529 = vtanh.f32 %v1337_v48 }
0x10cb   :  { %v4530_v50 = vpop.eup %4529 }
0x10cc   :  { %v1339_v14 = vadd.f32 1.0, %v4530_v50 }
0x10ce   :  { %v1340_v52 = vmul.f32 0.5, %v1339_v14 }
0x10d0   :  { %v1341_v51 = vsel %vm5042_vm3, %v4530_v50, %v1340_v52 }
0x10d1   :  { %v1343_v54 = vrot.slane %v1341_v51, 6 }
0x10d3   :  { %1345 = vrot.lane.b32.xlu0 %v1343_v54, %s4820_s28  ;;  %1347 = vrot.lane.b32.xlu1 %v1343_v54, %s4807_s23 }
0x10d7   :  { %1349 = vrot.lane.b32.xlu1 %v1343_v54, %s4819_s3 }
0x1145   :  { %v1348_v56 = vpop.permute.xlu1 %1347  ;;  %v1346_v57 = vpop.permute.xlu0 %1345 }
0x1146   :  { %v1353_v21 = vrot.slane %v1348_v56, 2  ;;  %v1351_v59 = vmul.f32 %v1346_v57, %v1289_v36 }
0x1148   :  { %v1355_v58 = vmul.f32 %v1353_v21, %v1341_v51 }
0x1149   :  { %v1350_v63 = vpop.permute.xlu1 %1349 }
0x114a   :  { %v1357_v60 = vrot.slane %v1355_v58, 6 }
0x114c   :  { %v1359_v61 = vadd.f32 %v1357_v60, %v1351_v59 }
0x114e   :  { %4531 = vtanh.f32 %v1359_v61 }
0x115b   :  { %v4532_v62 = vpop.eup %4531 }
0x115c   :  { %v1361_v1 = vmul.f32 %v4532_v62, %v1350_v63 }
0x115e   :  { %v1362_v26 = vpack.c.bf16 %v1361_v1, %v1361_v1 }
0x1160   :  { %v1636_v3 = vrot.slane %v1362_v26, 5  ;;  %3953 = vmatmul.mubr.bf16.vlgmr.msra.gmra.mxu0 %v1362_v26 }
0x1161   :  { %3977 = vmatpush3.bf16.msra.mxu0 %v5212_v38  ;;  %3992 = vmatprep.mubr.msk.bf16.mxu0 %vm4816_vm0, %v4815_v0 }
0x1162   :  { %v1651_v5 = vsel %vm903_vm6, %v1649_v2, %v1636_v3  ;;  %3978 = vmatprep.subr.bf16.mxu0 %v4815_v0 }
0x1165   :  { %3979 = vmatpush3.bf16.msra.mxu0 %v5215_v40 }
0x1166   :  { %3980 = vmatprep.subr.bf16.mxu0 %v4815_v0 }
0x1169   :  { %3981 = vmatpush3.bf16.msra.mxu0 %v5223_v6 }
0x116a   :  { %3982 = vmatprep.subr.bf16.mxu0 %v4815_v0 }
0x116d   :  { %3983 = vmatpush3.bf16.msra.mxu0 %v5228_v47 }
0x116e   :  { %3984 = vmatprep.subr.bf16.mxu0 %v4815_v0 }
0x1171   :  { %3985 = vmatpush3.bf16.msra.mxu0 %v5233_v49 }
0x1172   :  { %3986 = vmatprep.subr.bf16.mxu0 %v4815_v0 }
0x1175   :  { %3987 = vmatpush3.bf16.msra.mxu0 %v5242_v18 }
0x1176   :  { %3988 = vmatprep.subr.bf16.mxu0 %v4815_v0 }
0x1179   :  { %3989 = vmatpush3.bf16.msra.mxu0 %v5248_v53 }
0x117a   :  { %3990 = vmatprep.subr.bf16.mxu0 %v4815_v0 }
0x117d   :  { %3991 = vmatpush3.bf16.msra.mxu0 %v5253_v55 }
0x117e   :  { %4016 = vmatprep.subr.bf16.mxu0 %v4815_v0 }
0x1220   :  { %v1397_v7 = vpop.f32.mrf.mxu0 }
0x1221   :  { %v1403_v9 = vadd.f32 %v1397_v7, %v5306_v28 }
0x1222   :  { %v3954_v11 = vpop.f32.mrf.mxu0 }
0x1223   :  { %v1404_v13 = vmul.f32 %v1403_v9, %v5050_v29 }
0x1224   :  { %v1400_v15 = vpop.f32.mrf.mxu0 }
0x1225   :  { %4533 = vtanh.f32 %v1404_v13 }
0x1226   :  { %v3955_v16 = vpop.f32.mrf.mxu0 }
0x1232   :  { %v4534_v17 = vpop.eup %4533 }
0x1233   :  { %v1406_v19 = vadd.f32 1.0, %v4534_v17 }
0x1235   :  { %v1407_v22 = vmul.f32 0.5, %v1406_v19 }
0x1237   :  { %v1408_v23 = vsel %vm5042_vm3, %v4534_v17, %v1407_v22 }
0x1238   :  { %1411 = vrot.lane.b32.xlu1 %v1408_v23, %s4807_s23  ;;  %1409 = vrot.lane.b32.xlu0 %v1408_v23, %s4820_s28 }
0x123c   :  { %1413 = vrot.lane.b32.xlu0 %v1408_v23, %s4819_s3 }
0x12aa   :  { %v1412_v25 = vpop.permute.xlu1 %1411  ;;  %v1410_v27 = vpop.permute.xlu0 %1409 }
0x12ab   :  { %v1416_v30 = vmul.f32 %v1412_v25, %v1408_v23  ;;  %v1415_v31 = vmul.f32 %v1410_v27, %v1359_v61 }
0x12ad   :  { %v1417_v32 = vadd.f32 %v1416_v30, %v1415_v31  ;;  %v5464_v30 = vld [vmem:[#allocation11 + $0x38] sm:$0xff]  }
0x12ae   :  { %v1414_v34 = vpop.permute.xlu0 %1413  ;;  %v4446_v31 = vld [vmem:[#allocation10 + $0x38] sm:$0xff]  }
0x12af   :  { %4535 = vtanh.f32 %v1417_v32 }
0x12bc   :  { %v4536_v33 = vpop.eup %4535 }
0x12bd   :  { %v1419_v36 = vmul.f32 %v4536_v33, %v1414_v34 }
0x12bf   :  { %v1420_v37 = vpack.c.bf16 %v1419_v36, %v1419_v36 }
0x12c1   :  { %v1638_v39 = vrot.slane %v1420_v37, 4  ;;  %3973 = vmatmul.mubr.bf16.vlgmr.msra.gmra.mxu1 %v1420_v37 }
0x12c2   :  { %3997 = vmatpush3.bf16.msra.mxu1 %v5212_v38  ;;  %4012 = vmatprep.mubr.msk.bf16.mxu1 %vm4816_vm0, %v4815_v0 }
0x12c3   :  { %v1653_v41 = vsel %vm906_vm7, %v1651_v5, %v1638_v39  ;;  %3998 = vmatprep.subr.bf16.mxu1 %v4815_v0 }
0x12c6   :  { %3999 = vmatpush3.bf16.msra.mxu1 %v5215_v40 }
0x12c7   :  { %4000 = vmatprep.subr.bf16.mxu1 %v4815_v0 }
0x12ca   :  { %4001 = vmatpush3.bf16.msra.mxu1 %v5223_v6 }
0x12cb   :  { %4002 = vmatprep.subr.bf16.mxu1 %v4815_v0 }
0x12ce   :  { %4003 = vmatpush3.bf16.msra.mxu1 %v5228_v47 }
0x12cf   :  { %4004 = vmatprep.subr.bf16.mxu1 %v4815_v0 }
0x12d2   :  { %4005 = vmatpush3.bf16.msra.mxu1 %v5233_v49 }
0x12d3   :  { %4006 = vmatprep.subr.bf16.mxu1 %v4815_v0 }
0x12d6   :  { %4007 = vmatpush3.bf16.msra.mxu1 %v5242_v18 }
0x12d7   :  { %4008 = vmatprep.subr.bf16.mxu1 %v4815_v0 }
0x12da   :  { %4009 = vmatpush3.bf16.msra.mxu1 %v5248_v53 }
0x12db   :  { %4010 = vmatprep.subr.bf16.mxu1 %v4815_v0 }
0x12de   :  { %4011 = vmatpush3.bf16.msra.mxu1 %v5253_v55 }
0x12df   :  { %4036 = vmatprep.subr.bf16.mxu1 %v4815_v0 }
0x1381   :  { %v1455_v38 = vpop.f32.mrf.mxu1 }
0x1382   :  { %v1462_v40 = vrot.slane %v1455_v38, 6 }
0x1383   :  { %v3974_v6 = vpop.f32.mrf.mxu1 }
0x1384   :  { %v1464_v47 = vadd.f32 %v1462_v40, %v5306_v28  ;;  %v4448_v40 = vld [vmem:[#allocation10 + $0x30] sm:$0xff]   ;;  %v5475_v6 = vld [vmem:[#allocation11 + $0x28] sm:$0xff]  }
0x1385   :  { %v1458_v49 = vpop.f32.mrf.mxu1 }
0x1386   :  { %v1465_v42 = vmul.f32 %v1464_v47, %v5050_v29  ;;  %v4450_v49 = vld [vmem:[#allocation10 + $0x28] sm:$0xff]  }
0x1387   :  { %v3975_v43 = vpop.f32.mrf.mxu1 }
0x1388   :  { %4537 = vtanh.f32 %v1465_v42  ;;  %v5480_v42 = vld [vmem:[#allocation11 + $0x20] sm:$0xff]  }
0x1395   :  { %v4538_v18 = vpop.eup %4537 }
0x1396   :  { %v1467_v44 = vadd.f32 1.0, %v4538_v18 }
0x1398   :  { %v1468_v45 = vmul.f32 0.5, %v1467_v44  ;;  %v5485_v44 = vld [vmem:[#allocation11 + $0x18] sm:$0xff]  }
0x139a   :  { %v1469_v53 = vsel %vm5042_vm3, %v4538_v18, %v1468_v45  ;;  %v4452_v18 = vld [vmem:[#allocation10 + $0x20] sm:$0xff]  }
0x139b   :  { %v1471_v2 = vrot.slane %v1469_v53, 2 }
0x139d   :  { %1473 = vrot.lane.b32.xlu0 %v1471_v2, %s4820_s28  ;;  %1475 = vrot.lane.b32.xlu1 %v1471_v2, %s4807_s23 }
0x13a1   :  { %1477 = vrot.lane.b32.xlu1 %v1471_v2, %s4819_s3  ;;  %v4454_v2 = vld [vmem:[#allocation10 + $0x18] sm:$0xff]  }
0x140f   :  { %v1476_v55 = vpop.permute.xlu1 %1475  ;;  %v1474_v4 = vpop.permute.xlu0 %1473 }
0x1410   :  { %v1481_v46 = vrot.slane %v1476_v55, 6  ;;  %v1479_v10 = vmul.f32 %v1474_v4, %v1417_v32  ;;  %v5467_v32 = vld [vmem:[#allocation11 + $0x30] sm:$0xff]   ;;  %v5500_v4 = vld [vmem:[#allocation11 + $0x8] sm:$0xff]  }
0x1411   :  { %v5494_v55 = vld [vmem:[#allocation11 + $0x10] sm:$0xff]  }
0x1412   :  { %v1483_v8 = vmul.f32 %v1481_v46, %v1469_v53  ;;  %v4456_v46 = vld [vmem:[#allocation10 + $0x10] sm:$0xff]  }
0x1413   :  { %v1478_v50 = vpop.permute.xlu1 %1477 }
0x1414   :  { %v1485_v35 = vrot.slane %v1483_v8, 2  ;;  %v4458_v8 = vld [vmem:[#allocation10 + $0x8] sm:$0xff]  }
0x1416   :  { %v1487_v48 = vadd.f32 %v1485_v35, %v1479_v10  ;;  %v5505_v10 = vld [vmem:[#allocation11] sm:$0xff]  }
0x1417   :  { %v4460_v35 = vld [vmem:[#allocation10] sm:$0xff]  }
0x1418   :  { %4539 = vtanh.f32 %v1487_v48 }
0x1425   :  { %v4540_v12 = vpop.eup %4539 }
0x1426   :  { %v1489_v14 = vmul.f32 %v4540_v12, %v1478_v50 }
0x1428   :  { %v1490_v52 = vpack.c.bf16 %v1489_v14, %v1489_v14 }
0x142a   :  { %v1640_v51 = vrot.slane %v1490_v52, 3  ;;  %3993 = vmatmul.mubr.bf16.vlgmr.msra.gmra.mxu0 %v1490_v52 }
0x142b   :  { %4032 = vmatprep.mubr.msk.bf16.mxu0 %vm4816_vm0, %v4815_v0  ;;  %4017 = vmatpush3.bf16.msra.mxu0 %v4446_v31 }
0x142c   :  { %v1655_v54 = vsel %vm909_vm8, %v1653_v41, %v1640_v51  ;;  %4018 = vmatprep.subr.bf16.mxu0 %v4815_v0 }
0x142f   :  { %4019 = vmatpush3.bf16.msra.mxu0 %v4448_v40 }
0x1430   :  { %4020 = vmatprep.subr.bf16.mxu0 %v4815_v0 }
0x1433   :  { %4021 = vmatpush3.bf16.msra.mxu0 %v4450_v49 }
0x1434   :  { %4022 = vmatprep.subr.bf16.mxu0 %v4815_v0 }
0x1437   :  { %4023 = vmatpush3.bf16.msra.mxu0 %v4452_v18 }
0x1438   :  { %4024 = vmatprep.subr.bf16.mxu0 %v4815_v0 }
0x143b   :  { %4025 = vmatpush3.bf16.msra.mxu0 %v4454_v2 }
0x143c   :  { %4026 = vmatprep.subr.bf16.mxu0 %v4815_v0 }
0x143f   :  { %4027 = vmatpush3.bf16.msra.mxu0 %v4456_v46 }
0x1440   :  { %4028 = vmatprep.subr.bf16.mxu0 %v4815_v0 }
0x1443   :  { %4029 = vmatpush3.bf16.msra.mxu0 %v4458_v8 }
0x1444   :  { %4030 = vmatprep.subr.bf16.mxu0 %v4815_v0 }
0x1447   :  { %4031 = vmatpush3.bf16.msra.mxu0 %v4460_v35 }
0x1448   :  { %4056 = vmatprep.subr.bf16.mxu0 %v4815_v0 }
0x14ea   :  { %v1525_v56 = vpop.f32.mrf.mxu0 }
0x14eb   :  { %v1532_v21 = vrot.slane %v1525_v56, 4 }
0x14ec   :  { %v3994_v57 = vpop.f32.mrf.mxu0 }
0x14ed   :  { %v1534_v58 = vadd.f32 %v1532_v21, %v5306_v28 }
0x14ee   :  { %v1528_v59 = vpop.f32.mrf.mxu0 }
0x14ef   :  { %v1535_v60 = vmul.f32 %v1534_v58, %v5050_v29 }
0x14f0   :  { %v3995_v61 = vpop.f32.mrf.mxu0 }
0x14f1   :  { %4541 = vtanh.f32 %v1535_v60 }
0x14fe   :  { %v4542_v62 = vpop.eup %4541 }
0x14ff   :  { %v1537_v63 = vadd.f32 1.0, %v4542_v62 }
0x1501   :  { %v1538_v1 = vmul.f32 0.5, %v1537_v63 }
0x1503   :  { %v1539_v26 = vsel %vm5042_vm3, %v4542_v62, %v1538_v1 }
0x1504   :  { %v1541_v3 = vrot.slane %v1539_v26, 4 }
0x1506   :  { %1543 = vrot.lane.b32.xlu1 %v1541_v3, %s4820_s28  ;;  %1545 = vrot.lane.b32.xlu0 %v1541_v3, %s4807_s23 }
0x150a   :  { %1547 = vrot.lane.b32.xlu0 %v1541_v3, %s4819_s3 }
0x1578   :  { %v1546_v5 = vpop.permute.xlu0 %1545  ;;  %v1544_v9 = vpop.permute.xlu1 %1543 }
0x1579   :  { %v1551_v7 = vrot.slane %v1546_v5, 4  ;;  %v1549_v13 = vmul.f32 %v1544_v9, %v1487_v48 }
0x157b   :  { %v1553_v11 = vmul.f32 %v1551_v7, %v1539_v26  ;;  %v3280_v26 = vld [vmem:[%s6003_s9] ss:$0 sm:$0xff] }
0x157c   :  { %v1548_v19 = vpop.permute.xlu0 %1547 }
0x157d   :  { %v1555_v15 = vrot.slane %v1553_v11, 4 }
0x157f   :  { %v5456_v16 = vadd.f32 %v1555_v15, %v1549_v13 }
0x1581   :  { %4543 = vtanh.f32 %v5456_v16 }
0x158e   :  { %v4544_v17 = vpop.eup %4543 }
0x158f   :  { %v1559_v22 = vmul.f32 %v4544_v17, %v1548_v19 }
0x1591   :  { %v1560_v23 = vpack.c.bf16 %v1559_v22, %v1559_v22 }
0x1593   :  { %v1642_v25 = vrot.slane %v1560_v23, 2  ;;  %4013 = vmatmul.mubr.bf16.vlgmr.msra.gmra.mxu1 %v1560_v23 }
0x1594   :  { %4052 = vmatprep.mubr.msk.bf16.mxu1 %vm4816_vm0, %v4815_v0  ;;  %4037 = vmatpush3.bf16.msra.mxu1 %v5464_v30 }
0x1595   :  { %v5462_v27 = vsel %vm912_vm9, %v1655_v54, %v1642_v25  ;;  %4038 = vmatprep.subr.bf16.mxu1 %v4815_v0 }
0x1598   :  { %4039 = vmatpush3.bf16.msra.mxu1 %v5467_v32 }
0x1599   :  { %4040 = vmatprep.subr.bf16.mxu1 %v4815_v0 }
0x159c   :  { %4041 = vmatpush3.bf16.msra.mxu1 %v5475_v6 }
0x159d   :  { %4042 = vmatprep.subr.bf16.mxu1 %v4815_v0 }
0x15a0   :  { %4043 = vmatpush3.bf16.msra.mxu1 %v5480_v42 }
0x15a1   :  { %4044 = vmatprep.subr.bf16.mxu1 %v4815_v0 }
0x15a4   :  { %4045 = vmatpush3.bf16.msra.mxu1 %v5485_v44 }
0x15a5   :  { %4046 = vmatprep.subr.bf16.mxu1 %v4815_v0 }
0x15a8   :  { %4047 = vmatpush3.bf16.msra.mxu1 %v5494_v55 }
0x15a9   :  { %4048 = vmatprep.subr.bf16.mxu1 %v4815_v0 }
0x15ac   :  { %4049 = vmatpush3.bf16.msra.mxu1 %v5500_v4 }
0x15ad   :  { %4050 = vmatprep.subr.bf16.mxu1 %v4815_v0 }
0x15b0   :  { %4051 = vmatpush3.bf16.msra.mxu1 %v5505_v10 }
0x15b1   :  { %4076 = vmatprep.subr.bf16.mxu1 %v4815_v0 }
0x15b3   :  { %4053 = vmatmul.mubr.bf16.vlgmr.msra.gmra.mxu1 %v4817_v20 }
0x15b4   :  { %4077 = vmatpush3.bf16.msra.mxu1 %v5464_v30  ;;  %4092 = vmatprep.mubr.msk.bf16.mxu1 %vm4816_vm0, %v4815_v0 }
0x15b5   :  { %4078 = vmatprep.subr.bf16.mxu1 %v4815_v0 }
0x15b8   :  { %4079 = vmatpush3.bf16.msra.mxu1 %v5467_v32 }
0x15b9   :  { %4080 = vmatprep.subr.bf16.mxu1 %v4815_v0 }
0x15bc   :  { %4081 = vmatpush3.bf16.msra.mxu1 %v5475_v6 }
0x15bd   :  { %4082 = vmatprep.subr.bf16.mxu1 %v4815_v0 }
0x15c0   :  { %4083 = vmatpush3.bf16.msra.mxu1 %v5480_v42 }
0x15c1   :  { %4084 = vmatprep.subr.bf16.mxu1 %v4815_v0 }
0x15c4   :  { %4085 = vmatpush3.bf16.msra.mxu1 %v5485_v44 }
0x15c5   :  { %4086 = vmatprep.subr.bf16.mxu1 %v4815_v0 }
0x15c8   :  { %4087 = vmatpush3.bf16.msra.mxu1 %v5494_v55 }
0x15c9   :  { %4088 = vmatprep.subr.bf16.mxu1 %v4815_v0 }
0x15cc   :  { %4089 = vmatpush3.bf16.msra.mxu1 %v5500_v4 }
0x15cd   :  { %4090 = vmatprep.subr.bf16.mxu1 %v4815_v0 }
0x15d0   :  { %4091 = vmatpush3.bf16.msra.mxu1 %v5505_v10 }
0x15d1   :  { %4116 = vmatprep.subr.bf16.mxu1 %v4815_v0 }
0x1653   :  { %v1595_v33 = vpop.f32.mrf.mxu1 }
0x1654   :  { %v1602_v34 = vrot.slane %v1595_v33, 2 }
0x1655   :  { %v4014_v36 = vpop.f32.mrf.mxu1 }
0x1656   :  { %v1604_v37 = vadd.f32 %v1602_v34, %v5306_v28 }
0x1657   :  { %v1598_v39 = vpop.f32.mrf.mxu1 }
0x1658   :  { %v1605_v41 = vmul.f32 %v1604_v37, %v5050_v29 }
0x1659   :  { %v4015_v38 = vpop.f32.mrf.mxu1 }
0x165a   :  { %4545 = vtanh.f32 %v1605_v41 }
0x1667   :  { %v4546_v47 = vpop.eup %4545 }
0x1668   :  { %v1607_v28 = vadd.f32 1.0, %v4546_v47 }
0x166a   :  { %v1608_v43 = vmul.f32 0.5, %v1607_v28 }
0x166c   :  { %v1609_v45 = vsel %vm5042_vm3, %v4546_v47, %v1608_v43 }
0x166d   :  { %v1611_v53 = vrot.slane %v1609_v45, 6 }
0x166f   :  { %1613 = vrot.lane.b32.xlu0 %v1611_v53, %s4820_s28  ;;  %1615 = vrot.lane.b32.xlu1 %v1611_v53, %s4807_s23 }
0x1673   :  { %1617 = vrot.lane.b32.xlu1 %v1611_v53, %s4819_s3  ;;  %v1871_v61 = vpop.f32.mrf.mxu1 }
0x1675   :  { %v4054_v62 = vpop.f32.mrf.mxu1 }
0x1677   :  { %v1874_v63 = vpop.f32.mrf.mxu1 }
0x1679   :  { %v4055_v1 = vpop.f32.mrf.mxu1 }
0x16e1   :  { %v1616_v48 = vpop.permute.xlu1 %1615  ;;  %v1614_v50 = vpop.permute.xlu0 %1613 }
0x16e2   :  { %v1621_v12 = vrot.slane %v1616_v48, 2  ;;  %v1619_v52 = vmul.f32 %v1614_v50, %v5456_v16 }
0x16e4   :  { %v1623_v14 = vmul.f32 %v1621_v12, %v1609_v45 }
0x16e5   :  { %v1618_v21 = vpop.permute.xlu1 %1617 }
0x16e6   :  { %v1625_v51 = vrot.slane %v1623_v14, 6 }
0x16e8   :  { %v1627_v54 = vadd.f32 %v1625_v51, %v1619_v52 }
0x16ea   :  { %4547 = vtanh.f32 %v1627_v54 }
0x16f7   :  { %v4548_v56 = vpop.eup %4547 }
0x16f8   :  { %v1629_v57 = vmul.f32 %v4548_v56, %v1618_v21 }
0x16fa   :  { %v1630_v58 = vpack.c.bf16 %v1629_v57, %v1629_v57 }
0x16fc   :  { %v1644_v59 = vrot.slane %v1630_v58, 1 }
0x16fe   :  { %v1659_v60 = vsel %vm915_vm10, %v5462_v27, %v1644_v59 }
0x16ff   :  { %4033 = vmatmul.mubr.bf16.vlgmr.msra.gmra.mxu0 %v1659_v60 }
0x1700   :  { %4057 = vmatpush3.bf16.msra.mxu0 %v5464_v30  ;;  %4072 = vmatprep.mubr.msk.bf16.mxu0 %vm4816_vm0, %v4815_v0 }
0x1701   :  { %4058 = vmatprep.subr.bf16.mxu0 %v4815_v0 }
0x1704   :  { %4059 = vmatpush3.bf16.msra.mxu0 %v5467_v32 }
0x1705   :  { %4060 = vmatprep.subr.bf16.mxu0 %v4815_v0 }
0x1708   :  { %4061 = vmatpush3.bf16.msra.mxu0 %v5475_v6 }
0x1709   :  { %4062 = vmatprep.subr.bf16.mxu0 %v4815_v0 }
0x170c   :  { %4063 = vmatpush3.bf16.msra.mxu0 %v5480_v42 }
0x170d   :  { %4064 = vmatprep.subr.bf16.mxu0 %v4815_v0 }
0x1710   :  { %4065 = vmatpush3.bf16.msra.mxu0 %v5485_v44 }
0x1711   :  { %4066 = vmatprep.subr.bf16.mxu0 %v4815_v0 }
0x1714   :  { %4067 = vmatpush3.bf16.msra.mxu0 %v5494_v55 }
0x1715   :  { %4068 = vmatprep.subr.bf16.mxu0 %v4815_v0 }
0x1718   :  { %4069 = vmatpush3.bf16.msra.mxu0 %v5500_v4 }
0x1719   :  { %4070 = vmatprep.subr.bf16.mxu0 %v4815_v0 }
0x171c   :  { %4071 = vmatpush3.bf16.msra.mxu0 %v5505_v10 }
0x171d   :  { %4096 = vmatprep.subr.bf16.mxu0 %v4815_v0 }
0x17bf   :  { %v1766_v3 = vpop.f32.mrf.mxu0 }
0x17c0   :  { %v5554_v5 = vadd.f32 %v3280_v26, %v1766_v3 }
0x17c1   :  { %v4034_v7 = vpop.f32.mrf.mxu0 }
0x17c2   :  { %v1877_v9 = vadd.f32 %v1871_v61, %v5554_v5 }
0x17c3   :  { %v1769_v11 = vpop.f32.mrf.mxu0 }
0x17c4   :  { %v1878_v13 = vmul.f32 %v1877_v9, %v5050_v29  ;;  %v5558_v15 = vadd.f32 %v3280_v26, %v1769_v11 }
0x17c5   :  { %v4035_v16 = vpop.f32.mrf.mxu0 }
0x17c6   :  { %4549 = vtanh.f32 %v1878_v13 }
0x17d3   :  { %v4550_v17 = vpop.eup %4549 }
0x17d4   :  { %v1880_v19 = vadd.f32 1.0, %v4550_v17 }
0x17d6   :  { %v1881_v22 = vmul.f32 0.5, %v1880_v19 }
0x17d8   :  { %v1882_v23 = vsel %vm5042_vm3, %v4550_v17, %v1881_v22 }
0x17d9   :  { %1885 = vrot.lane.b32.xlu1 %v1882_v23, %s4807_s23  ;;  %1883 = vrot.lane.b32.xlu0 %v1882_v23, %s4820_s28 }
0x17dd   :  { %1887 = vrot.lane.b32.xlu0 %v1882_v23, %s4819_s3 }
0x184b   :  { %v1886_v25 = vpop.permute.xlu1 %1885  ;;  %v1884_v27 = vpop.permute.xlu0 %1883 }
0x184c   :  { %v1890_v31 = vmul.f32 %v1886_v25, %v1882_v23  ;;  %v1889_v33 = vmul.f32 0.0, %v1884_v27 }
0x184e   :  { %v1891_v34 = vadd.f32 %v1890_v31, %v1889_v33 }
0x184f   :  { %v1888_v37 = vpop.permute.xlu0 %1887 }
0x1850   :  { %4551 = vtanh.f32 %v1891_v34 }
0x185d   :  { %v4552_v36 = vpop.eup %4551 }
0x185e   :  { %v1893_v39 = vmul.f32 %v4552_v36, %v1888_v37 }
0x1860   :  { %v5565_v41 = vpack.c.bf16 %v1893_v39, %v1893_v39 }
0x1862   :  { %4073 = vmatmul.mubr.bf16.vlgmr.msra.gmra.mxu0 %v5565_v41 }
0x1863   :  { %4097 = vmatpush3.bf16.msra.mxu0 %v5464_v30  ;;  %4112 = vmatprep.mubr.msk.bf16.mxu0 %vm4816_vm0, %v4815_v0 }
0x1864   :  { %4098 = vmatprep.subr.bf16.mxu0 %v4815_v0 }
0x1867   :  { %4099 = vmatpush3.bf16.msra.mxu0 %v5467_v32 }
0x1868   :  { %4100 = vmatprep.subr.bf16.mxu0 %v4815_v0 }
0x186b   :  { %4101 = vmatpush3.bf16.msra.mxu0 %v5475_v6 }
0x186c   :  { %4102 = vmatprep.subr.bf16.mxu0 %v4815_v0 }
0x186f   :  { %4103 = vmatpush3.bf16.msra.mxu0 %v5480_v42 }
0x1870   :  { %4104 = vmatprep.subr.bf16.mxu0 %v4815_v0 }
0x1873   :  { %4105 = vmatpush3.bf16.msra.mxu0 %v5485_v44 }
0x1874   :  { %4106 = vmatprep.subr.bf16.mxu0 %v4815_v0 }
0x1877   :  { %4107 = vmatpush3.bf16.msra.mxu0 %v5494_v55 }
0x1878   :  { %4108 = vmatprep.subr.bf16.mxu0 %v4815_v0 }
0x187b   :  { %4109 = vmatpush3.bf16.msra.mxu0 %v5500_v4 }
0x187c   :  { %4110 = vmatprep.subr.bf16.mxu0 %v4815_v0 }
0x187f   :  { %4111 = vmatpush3.bf16.msra.mxu0 %v5505_v10 }
0x1880   :  { %4136 = vmatprep.subr.bf16.mxu0 %v4815_v0 }
0x1922   :  { %v1929_v38 = vpop.f32.mrf.mxu0 }
0x1923   :  { %v1936_v40 = vrot.slane %v1929_v38, 6 }
0x1924   :  { %v4074_v47 = vpop.f32.mrf.mxu0 }
0x1925   :  { %v1938_v49 = vadd.f32 %v1936_v40, %v5554_v5 }
0x1926   :  { %v1932_v28 = vpop.f32.mrf.mxu0 }
0x1927   :  { %v1939_v43 = vmul.f32 %v1938_v49, %v5050_v29 }
0x1928   :  { %v4075_v18 = vpop.f32.mrf.mxu0 }
0x1929   :  { %4553 = vtanh.f32 %v1939_v43 }
0x1936   :  { %v4554_v45 = vpop.eup %4553 }
0x1937   :  { %v1941_v53 = vadd.f32 1.0, %v4554_v45 }
0x1939   :  { %v1942_v2 = vmul.f32 0.5, %v1941_v53 }
0x193b   :  { %v1943_v46 = vsel %vm5042_vm3, %v4554_v45, %v1942_v2 }
0x193c   :  { %v1945_v8 = vrot.slane %v1943_v46, 2 }
0x193e   :  { %1947 = vrot.lane.b32.xlu0 %v1945_v8, %s4820_s28  ;;  %1949 = vrot.lane.b32.xlu1 %v1945_v8, %s4807_s23 }
0x1942   :  { %1951 = vrot.lane.b32.xlu1 %v1945_v8, %s4819_s3 }
0x19b0   :  { %v1950_v35 = vpop.permute.xlu1 %1949  ;;  %v1948_v12 = vpop.permute.xlu0 %1947 }
0x19b1   :  { %v1955_v48 = vrot.slane %v1950_v35, 6  ;;  %v1953_v14 = vmul.f32 %v1948_v12, %v1891_v34 }
0x19b3   :  { %v1957_v50 = vmul.f32 %v1955_v48, %v1943_v46 }
0x19b4   :  { %v1952_v56 = vpop.permute.xlu1 %1951 }
0x19b5   :  { %v1959_v52 = vrot.slane %v1957_v50, 2 }
0x19b7   :  { %v1961_v51 = vadd.f32 %v1959_v52, %v1953_v14 }
0x19b9   :  { %4555 = vtanh.f32 %v1961_v51 }
0x19c6   :  { %v4556_v54 = vpop.eup %4555 }
0x19c7   :  { %v1963_v21 = vmul.f32 %v4556_v54, %v1952_v56 }
0x19c9   :  { %v1964_v57 = vpack.c.bf16 %v1963_v21, %v1963_v21 }
0x19cb   :  { %4093 = vmatmul.mubr.bf16.vlgmr.msra.gmra.mxu1 %v1964_v57  ;;  %v2374_v34 = vrot.slane %v1964_v57, 7 }
0x19cc   :  { %4117 = vmatpush3.bf16.msra.mxu1 %v5464_v30  ;;  %4132 = vmatprep.mubr.msk.bf16.mxu1 %vm4816_vm0, %v4815_v0 }
0x19cd   :  { %4118 = vmatprep.subr.bf16.mxu1 %v4815_v0  ;;  %v2389_v39 = vsel %vm896_vm4, %v5565_v41, %v2374_v34 }
0x19d0   :  { %4119 = vmatpush3.bf16.msra.mxu1 %v5467_v32 }
0x19d1   :  { %4120 = vmatprep.subr.bf16.mxu1 %v4815_v0 }
0x19d4   :  { %4121 = vmatpush3.bf16.msra.mxu1 %v5475_v6 }
0x19d5   :  { %4122 = vmatprep.subr.bf16.mxu1 %v4815_v0 }
0x19d8   :  { %4123 = vmatpush3.bf16.msra.mxu1 %v5480_v42 }
0x19d9   :  { %4124 = vmatprep.subr.bf16.mxu1 %v4815_v0 }
0x19dc   :  { %4125 = vmatpush3.bf16.msra.mxu1 %v5485_v44 }
0x19dd   :  { %4126 = vmatprep.subr.bf16.mxu1 %v4815_v0 }
0x19e0   :  { %4127 = vmatpush3.bf16.msra.mxu1 %v5494_v55 }
0x19e1   :  { %4128 = vmatprep.subr.bf16.mxu1 %v4815_v0 }
0x19e4   :  { %4129 = vmatpush3.bf16.msra.mxu1 %v5500_v4 }
0x19e5   :  { %4130 = vmatprep.subr.bf16.mxu1 %v4815_v0 }
0x19e8   :  { %4131 = vmatpush3.bf16.msra.mxu1 %v5505_v10 }
0x19e9   :  { %4156 = vmatprep.subr.bf16.mxu1 %v4815_v0 }
0x1a8b   :  { %v1999_v58 = vpop.f32.mrf.mxu1 }
0x1a8c   :  { %v2006_v59 = vrot.slane %v1999_v58, 4 }
0x1a8d   :  { %v4094_v60 = vpop.f32.mrf.mxu1 }
0x1a8e   :  { %v2008_v61 = vadd.f32 %v2006_v59, %v5554_v5 }
0x1a8f   :  { %v2002_v62 = vpop.f32.mrf.mxu1 }
0x1a90   :  { %v2009_v63 = vmul.f32 %v2008_v61, %v5050_v29 }
0x1a91   :  { %v4095_v1 = vpop.f32.mrf.mxu1 }
0x1a92   :  { %4557 = vtanh.f32 %v2009_v63 }
0x1a9f   :  { %v4558_v26 = vpop.eup %4557 }
0x1aa0   :  { %v2011_v3 = vadd.f32 1.0, %v4558_v26 }
0x1aa2   :  { %v2012_v7 = vmul.f32 0.5, %v2011_v3 }
0x1aa4   :  { %v2013_v9 = vsel %vm5042_vm3, %v4558_v26, %v2012_v7 }
0x1aa5   :  { %v2015_v11 = vrot.slane %v2013_v9, 4 }
0x1aa7   :  { %2017 = vrot.lane.b32.xlu1 %v2015_v11, %s4820_s28  ;;  %2019 = vrot.lane.b32.xlu0 %v2015_v11, %s4807_s23 }
0x1aab   :  { %2021 = vrot.lane.b32.xlu0 %v2015_v11, %s4819_s3 }
0x1b19   :  { %v2020_v13 = vpop.permute.xlu0 %2019  ;;  %v2018_v17 = vpop.permute.xlu1 %2017 }
0x1b1a   :  { %v2025_v16 = vrot.slane %v2020_v13, 4  ;;  %v2023_v22 = vmul.f32 %v2018_v17, %v1961_v51 }
0x1b1c   :  { %v2027_v19 = vmul.f32 %v2025_v16, %v2013_v9 }
0x1b1d   :  { %v2022_v31 = vpop.permute.xlu0 %2021 }
0x1b1e   :  { %v2029_v23 = vrot.slane %v2027_v19, 4 }
0x1b20   :  { %v2031_v25 = vadd.f32 %v2029_v23, %v2023_v22 }
0x1b22   :  { %4559 = vtanh.f32 %v2031_v25 }
0x1b2f   :  { %v4560_v27 = vpop.eup %4559 }
0x1b30   :  { %v2033_v33 = vmul.f32 %v4560_v27, %v2022_v31 }
0x1b32   :  { %v2034_v36 = vpack.c.bf16 %v2033_v33, %v2033_v33 }
0x1b34   :  { %v2376_v37 = vrot.slane %v2034_v36, 6  ;;  %4113 = vmatmul.mubr.bf16.vlgmr.msra.gmra.mxu0 %v2034_v36 }
0x1b35   :  { %4137 = vmatpush3.bf16.msra.mxu0 %v5464_v30  ;;  %4152 = vmatprep.mubr.msk.bf16.mxu0 %vm4816_vm0, %v4815_v0 }
0x1b36   :  { %v2391_v38 = vsel %vm900_vm5, %v2389_v39, %v2376_v37  ;;  %4138 = vmatprep.subr.bf16.mxu0 %v4815_v0 }
0x1b39   :  { %4139 = vmatpush3.bf16.msra.mxu0 %v5467_v32 }
0x1b3a   :  { %4140 = vmatprep.subr.bf16.mxu0 %v4815_v0 }
0x1b3d   :  { %4141 = vmatpush3.bf16.msra.mxu0 %v5475_v6 }
0x1b3e   :  { %4142 = vmatprep.subr.bf16.mxu0 %v4815_v0 }
0x1b41   :  { %4143 = vmatpush3.bf16.msra.mxu0 %v5480_v42 }
0x1b42   :  { %4144 = vmatprep.subr.bf16.mxu0 %v4815_v0 }
0x1b45   :  { %4145 = vmatpush3.bf16.msra.mxu0 %v5485_v44 }
0x1b46   :  { %4146 = vmatprep.subr.bf16.mxu0 %v4815_v0 }
0x1b49   :  { %4147 = vmatpush3.bf16.msra.mxu0 %v5494_v55 }
0x1b4a   :  { %4148 = vmatprep.subr.bf16.mxu0 %v4815_v0 }
0x1b4d   :  { %4149 = vmatpush3.bf16.msra.mxu0 %v5500_v4 }
0x1b4e   :  { %4150 = vmatprep.subr.bf16.mxu0 %v4815_v0 }
0x1b51   :  { %4151 = vmatpush3.bf16.msra.mxu0 %v5505_v10 }
0x1b52   :  { %4176 = vmatprep.subr.bf16.mxu0 %v4815_v0 }
0x1bf4   :  { %v2069_v41 = vpop.f32.mrf.mxu0 }
0x1bf5   :  { %v2076_v40 = vrot.slane %v2069_v41, 2 }
0x1bf6   :  { %v4114_v47 = vpop.f32.mrf.mxu0 }
0x1bf7   :  { %v2078_v49 = vadd.f32 %v2076_v40, %v5554_v5 }
0x1bf8   :  { %v2072_v28 = vpop.f32.mrf.mxu0 }
0x1bf9   :  { %v2079_v43 = vmul.f32 %v2078_v49, %v5050_v29 }
0x1bfa   :  { %v4115_v18 = vpop.f32.mrf.mxu0 }
0x1bfb   :  { %4561 = vtanh.f32 %v2079_v43 }
0x1c08   :  { %v4562_v45 = vpop.eup %4561 }
0x1c09   :  { %v2081_v53 = vadd.f32 1.0, %v4562_v45 }
0x1c0b   :  { %v2082_v2 = vmul.f32 0.5, %v2081_v53 }
0x1c0d   :  { %v2083_v46 = vsel %vm5042_vm3, %v4562_v45, %v2082_v2 }
0x1c0e   :  { %v2085_v8 = vrot.slane %v2083_v46, 6 }
0x1c10   :  { %2087 = vrot.lane.b32.xlu0 %v2085_v8, %s4820_s28  ;;  %2089 = vrot.lane.b32.xlu1 %v2085_v8, %s4807_s23 }
0x1c14   :  { %2091 = vrot.lane.b32.xlu1 %v2085_v8, %s4819_s3 }
0x1c82   :  { %v2090_v35 = vpop.permute.xlu1 %2089  ;;  %v2088_v48 = vpop.permute.xlu0 %2087 }
0x1c83   :  { %v2095_v5 = vrot.slane %v2090_v35, 2  ;;  %v2093_v50 = vmul.f32 %v2088_v48, %v2031_v25 }
0x1c85   :  { %v2097_v12 = vmul.f32 %v2095_v5, %v2083_v46 }
0x1c86   :  { %v2092_v54 = vpop.permute.xlu1 %2091 }
0x1c87   :  { %v2099_v14 = vrot.slane %v2097_v12, 6 }
0x1c89   :  { %v2101_v52 = vadd.f32 %v2099_v14, %v2093_v50 }
0x1c8b   :  { %4563 = vtanh.f32 %v2101_v52 }
0x1c98   :  { %v4564_v51 = vpop.eup %4563 }
0x1c99   :  { %v2103_v56 = vmul.f32 %v4564_v51, %v2092_v54 }
0x1c9b   :  { %v2104_v21 = vpack.c.bf16 %v2103_v56, %v2103_v56 }
0x1c9d   :  { %v2378_v57 = vrot.slane %v2104_v21, 5  ;;  %4133 = vmatmul.mubr.bf16.vlgmr.msra.gmra.mxu1 %v2104_v21 }
0x1c9e   :  { %4157 = vmatpush3.bf16.msra.mxu1 %v5464_v30  ;;  %4172 = vmatprep.mubr.msk.bf16.mxu1 %vm4816_vm0, %v4815_v0 }
0x1c9f   :  { %v2393_v58 = vsel %vm903_vm6, %v2391_v38, %v2378_v57  ;;  %4158 = vmatprep.subr.bf16.mxu1 %v4815_v0 }
0x1ca2   :  { %4159 = vmatpush3.bf16.msra.mxu1 %v5467_v32 }
0x1ca3   :  { %4160 = vmatprep.subr.bf16.mxu1 %v4815_v0 }
0x1ca6   :  { %4161 = vmatpush3.bf16.msra.mxu1 %v5475_v6 }
0x1ca7   :  { %4162 = vmatprep.subr.bf16.mxu1 %v4815_v0 }
0x1caa   :  { %4163 = vmatpush3.bf16.msra.mxu1 %v5480_v42 }
0x1cab   :  { %4164 = vmatprep.subr.bf16.mxu1 %v4815_v0 }
0x1cae   :  { %4165 = vmatpush3.bf16.msra.mxu1 %v5485_v44 }
0x1caf   :  { %4166 = vmatprep.subr.bf16.mxu1 %v4815_v0 }
0x1cb2   :  { %4167 = vmatpush3.bf16.msra.mxu1 %v5494_v55 }
0x1cb3   :  { %4168 = vmatprep.subr.bf16.mxu1 %v4815_v0 }
0x1cb6   :  { %4169 = vmatpush3.bf16.msra.mxu1 %v5500_v4 }
0x1cb7   :  { %4170 = vmatprep.subr.bf16.mxu1 %v4815_v0 }
0x1cba   :  { %4171 = vmatpush3.bf16.msra.mxu1 %v5505_v10 }
0x1cbb   :  { %4196 = vmatprep.subr.bf16.mxu1 %v4815_v0 }
0x1d5d   :  { %v2139_v59 = vpop.f32.mrf.mxu1 }
0x1d5e   :  { %v2145_v60 = vadd.f32 %v2139_v59, %v5558_v15 }
0x1d5f   :  { %v4134_v61 = vpop.f32.mrf.mxu1 }
0x1d60   :  { %v2146_v62 = vmul.f32 %v2145_v60, %v5050_v29 }
0x1d61   :  { %v2142_v63 = vpop.f32.mrf.mxu1 }
0x1d62   :  { %4565 = vtanh.f32 %v2146_v62 }
0x1d63   :  { %v4135_v1 = vpop.f32.mrf.mxu1 }
0x1d6f   :  { %v4566_v26 = vpop.eup %4565 }
0x1d70   :  { %v2148_v3 = vadd.f32 1.0, %v4566_v26 }
0x1d72   :  { %v2149_v7 = vmul.f32 0.5, %v2148_v3 }
0x1d74   :  { %v2150_v9 = vsel %vm5042_vm3, %v4566_v26, %v2149_v7 }
0x1d75   :  { %2153 = vrot.lane.b32.xlu1 %v2150_v9, %s4807_s23  ;;  %2151 = vrot.lane.b32.xlu0 %v2150_v9, %s4820_s28 }
0x1d79   :  { %2155 = vrot.lane.b32.xlu0 %v2150_v9, %s4819_s3 }
0x1de7   :  { %v2154_v11 = vpop.permute.xlu1 %2153  ;;  %v2152_v13 = vpop.permute.xlu0 %2151 }
0x1de8   :  { %v2158_v16 = vmul.f32 %v2154_v11, %v2150_v9  ;;  %v2157_v17 = vmul.f32 %v2152_v13, %v2101_v52 }
0x1dea   :  { %v2159_v19 = vadd.f32 %v2158_v16, %v2157_v17  ;;  %v5716_v16 = vld [vmem:[#allocation14 + $0x38] sm:$0xff]  }
0x1deb   :  { %v2156_v23 = vpop.permute.xlu0 %2155  ;;  %v4462_v17 = vld [vmem:[#allocation13 + $0x38] sm:$0xff]  }
0x1dec   :  { %4567 = vtanh.f32 %v2159_v19 }
0x1df9   :  { %v4568_v22 = vpop.eup %4567 }
0x1dfa   :  { %v2161_v25 = vmul.f32 %v4568_v22, %v2156_v23 }
0x1dfc   :  { %v2162_v27 = vpack.c.bf16 %v2161_v25, %v2161_v25 }
0x1dfe   :  { %v2380_v31 = vrot.slane %v2162_v27, 4  ;;  %4153 = vmatmul.mubr.bf16.vlgmr.msra.gmra.mxu0 %v2162_v27 }
0x1dff   :  { %4177 = vmatpush3.bf16.msra.mxu0 %v5464_v30  ;;  %4192 = vmatprep.mubr.msk.bf16.mxu0 %vm4816_vm0, %v4815_v0 }
0x1e00   :  { %v2395_v33 = vsel %vm906_vm7, %v2393_v58, %v2380_v31  ;;  %4178 = vmatprep.subr.bf16.mxu0 %v4815_v0 }
0x1e03   :  { %4179 = vmatpush3.bf16.msra.mxu0 %v5467_v32 }
0x1e04   :  { %4180 = vmatprep.subr.bf16.mxu0 %v4815_v0 }
0x1e07   :  { %4181 = vmatpush3.bf16.msra.mxu0 %v5475_v6 }
0x1e08   :  { %4182 = vmatprep.subr.bf16.mxu0 %v4815_v0 }
0x1e0b   :  { %4183 = vmatpush3.bf16.msra.mxu0 %v5480_v42 }
0x1e0c   :  { %4184 = vmatprep.subr.bf16.mxu0 %v4815_v0 }
0x1e0f   :  { %4185 = vmatpush3.bf16.msra.mxu0 %v5485_v44 }
0x1e10   :  { %4186 = vmatprep.subr.bf16.mxu0 %v4815_v0 }
0x1e13   :  { %4187 = vmatpush3.bf16.msra.mxu0 %v5494_v55 }
0x1e14   :  { %4188 = vmatprep.subr.bf16.mxu0 %v4815_v0 }
0x1e17   :  { %4189 = vmatpush3.bf16.msra.mxu0 %v5500_v4 }
0x1e18   :  { %4190 = vmatprep.subr.bf16.mxu0 %v4815_v0 }
0x1e1b   :  { %4191 = vmatpush3.bf16.msra.mxu0 %v5505_v10 }
0x1e1c   :  { %4216 = vmatprep.subr.bf16.mxu0 %v4815_v0 }
0x1ebe   :  { %v2197_v30 = vpop.f32.mrf.mxu0 }
0x1ebf   :  { %v2204_v32 = vrot.slane %v2197_v30, 6 }
0x1ec0   :  { %v4154_v6 = vpop.f32.mrf.mxu0 }
0x1ec1   :  { %v2206_v42 = vadd.f32 %v2204_v32, %v5558_v15  ;;  %v4464_v32 = vld [vmem:[#allocation13 + $0x30] sm:$0xff]   ;;  %v5727_v6 = vld [vmem:[#allocation14 + $0x28] sm:$0xff]  }
0x1ec2   :  { %v2200_v44 = vpop.f32.mrf.mxu0 }
0x1ec3   :  { %v2207_v34 = vmul.f32 %v2206_v42, %v5050_v29  ;;  %v4466_v44 = vld [vmem:[#allocation13 + $0x28] sm:$0xff]  }
0x1ec4   :  { %v4155_v36 = vpop.f32.mrf.mxu0 }
0x1ec5   :  { %4569 = vtanh.f32 %v2207_v34  ;;  %v5732_v34 = vld [vmem:[#allocation14 + $0x20] sm:$0xff]  }
0x1ed2   :  { %v4570_v55 = vpop.eup %4569 }
0x1ed3   :  { %v2209_v37 = vadd.f32 1.0, %v4570_v55 }
0x1ed5   :  { %v2210_v39 = vmul.f32 0.5, %v2209_v37  ;;  %v5737_v37 = vld [vmem:[#allocation14 + $0x18] sm:$0xff]  }
0x1ed7   :  { %v2211_v4 = vsel %vm5042_vm3, %v4570_v55, %v2210_v39  ;;  %v4468_v55 = vld [vmem:[#allocation13 + $0x20] sm:$0xff]  }
0x1ed8   :  { %v2213_v38 = vrot.slane %v2211_v4, 2 }
0x1eda   :  { %2215 = vrot.lane.b32.xlu0 %v2213_v38, %s4820_s28  ;;  %2217 = vrot.lane.b32.xlu1 %v2213_v38, %s4807_s23 }
0x1ede   :  { %2219 = vrot.lane.b32.xlu1 %v2213_v38, %s4819_s3  ;;  %v4470_v38 = vld [vmem:[#allocation13 + $0x18] sm:$0xff]  }
0x1f4c   :  { %v2218_v10 = vpop.permute.xlu1 %2217  ;;  %v2216_v40 = vpop.permute.xlu0 %2215 }
0x1f4d   :  { %v2223_v41 = vrot.slane %v2218_v10, 6  ;;  %v2221_v49 = vmul.f32 %v2216_v40, %v2159_v19  ;;  %v5719_v19 = vld [vmem:[#allocation14 + $0x30] sm:$0xff]   ;;  %v5752_v40 = vld [vmem:[#allocation14 + $0x8] sm:$0xff]  }
0x1f4e   :  { %v5746_v10 = vld [vmem:[#allocation14 + $0x10] sm:$0xff]  }
0x1f4f   :  { %v2225_v47 = vmul.f32 %v2223_v41, %v2211_v4  ;;  %v4472_v41 = vld [vmem:[#allocation13 + $0x10] sm:$0xff]  }
0x1f50   :  { %v2220_v45 = vpop.permute.xlu1 %2219 }
0x1f51   :  { %v2227_v28 = vrot.slane %v2225_v47, 2  ;;  %v4474_v47 = vld [vmem:[#allocation13 + $0x8] sm:$0xff]  }
0x1f53   :  { %v2229_v43 = vadd.f32 %v2227_v28, %v2221_v49  ;;  %v5757_v49 = vld [vmem:[#allocation14] sm:$0xff]  }
0x1f54   :  { %v4476_v28 = vld [vmem:[#allocation13] sm:$0xff]  }
0x1f55   :  { %4571 = vtanh.f32 %v2229_v43 }
0x1f62   :  { %v4572_v18 = vpop.eup %4571 }
0x1f63   :  { %v2231_v53 = vmul.f32 %v4572_v18, %v2220_v45 }
0x1f65   :  { %v2232_v2 = vpack.c.bf16 %v2231_v53, %v2231_v53 }
0x1f67   :  { %v2382_v46 = vrot.slane %v2232_v2, 3  ;;  %4173 = vmatmul.mubr.bf16.vlgmr.msra.gmra.mxu1 %v2232_v2 }
0x1f68   :  { %4212 = vmatprep.mubr.msk.bf16.mxu1 %vm4816_vm0, %v4815_v0  ;;  %4197 = vmatpush3.bf16.msra.mxu1 %v4462_v17 }
0x1f69   :  { %v2397_v8 = vsel %vm909_vm8, %v2395_v33, %v2382_v46  ;;  %4198 = vmatprep.subr.bf16.mxu1 %v4815_v0 }
0x1f6c   :  { %4199 = vmatpush3.bf16.msra.mxu1 %v4464_v32 }
0x1f6d   :  { %4200 = vmatprep.subr.bf16.mxu1 %v4815_v0 }
0x1f70   :  { %4201 = vmatpush3.bf16.msra.mxu1 %v4466_v44 }
0x1f71   :  { %4202 = vmatprep.subr.bf16.mxu1 %v4815_v0 }
0x1f74   :  { %4203 = vmatpush3.bf16.msra.mxu1 %v4468_v55 }
0x1f75   :  { %4204 = vmatprep.subr.bf16.mxu1 %v4815_v0 }
0x1f78   :  { %4205 = vmatpush3.bf16.msra.mxu1 %v4470_v38 }
0x1f79   :  { %4206 = vmatprep.subr.bf16.mxu1 %v4815_v0 }
0x1f7c   :  { %4207 = vmatpush3.bf16.msra.mxu1 %v4472_v41 }
0x1f7d   :  { %4208 = vmatprep.subr.bf16.mxu1 %v4815_v0 }
0x1f80   :  { %4209 = vmatpush3.bf16.msra.mxu1 %v4474_v47 }
0x1f81   :  { %4210 = vmatprep.subr.bf16.mxu1 %v4815_v0 }
0x1f84   :  { %4211 = vmatpush3.bf16.msra.mxu1 %v4476_v28 }
0x1f85   :  { %4236 = vmatprep.subr.bf16.mxu1 %v4815_v0 }
0x2027   :  { %v2267_v35 = vpop.f32.mrf.mxu1 }
0x2028   :  { %v2274_v5 = vrot.slane %v2267_v35, 4 }
0x2029   :  { %v4174_v48 = vpop.f32.mrf.mxu1 }
0x202a   :  { %v2276_v12 = vadd.f32 %v2274_v5, %v5558_v15 }
0x202b   :  { %v2270_v50 = vpop.f32.mrf.mxu1 }
0x202c   :  { %v2277_v14 = vmul.f32 %v2276_v12, %v5050_v29 }
0x202d   :  { %v4175_v52 = vpop.f32.mrf.mxu1 }
0x202e   :  { %4573 = vtanh.f32 %v2277_v14 }
0x203b   :  { %v4574_v51 = vpop.eup %4573 }
0x203c   :  { %v2279_v54 = vadd.f32 1.0, %v4574_v51 }
0x203e   :  { %v2280_v56 = vmul.f32 0.5, %v2279_v54 }
0x2040   :  { %v2281_v21 = vsel %vm5042_vm3, %v4574_v51, %v2280_v56  ;;  %v3297_v56 = vld [vmem:[%s6006_s12] ss:$0 sm:$0xff] }
0x2041   :  { %v2283_v57 = vrot.slane %v2281_v21, 4 }
0x2043   :  { %2285 = vrot.lane.b32.xlu1 %v2283_v57, %s4820_s28  ;;  %2287 = vrot.lane.b32.xlu0 %v2283_v57, %s4807_s23 }
0x2047   :  { %2289 = vrot.lane.b32.xlu0 %v2283_v57, %s4819_s3 }
0x20b5   :  { %v2288_v58 = vpop.permute.xlu0 %2287  ;;  %v2286_v60 = vpop.permute.xlu1 %2285 }
0x20b6   :  { %v2293_v59 = vrot.slane %v2288_v58, 4  ;;  %v2291_v62 = vmul.f32 %v2286_v60, %v2229_v43 }
0x20b8   :  { %v2295_v61 = vmul.f32 %v2293_v59, %v2281_v21 }
0x20b9   :  { %v2290_v3 = vpop.permute.xlu0 %2289 }
0x20ba   :  { %v2297_v63 = vrot.slane %v2295_v61, 4 }
0x20bc   :  { %v5708_v1 = vadd.f32 %v2297_v63, %v2291_v62 }
0x20be   :  { %4575 = vtanh.f32 %v5708_v1 }
0x20cb   :  { %v4576_v26 = vpop.eup %4575 }
0x20cc   :  { %v2301_v7 = vmul.f32 %v4576_v26, %v2290_v3 }
0x20ce   :  { %v2302_v9 = vpack.c.bf16 %v2301_v7, %v2301_v7 }
0x20d0   :  { %v2384_v11 = vrot.slane %v2302_v9, 2  ;;  %4193 = vmatmul.mubr.bf16.vlgmr.msra.gmra.mxu0 %v2302_v9 }
0x20d1   :  { %4232 = vmatprep.mubr.msk.bf16.mxu0 %vm4816_vm0, %v4815_v0  ;;  %4217 = vmatpush3.bf16.msra.mxu0 %v5716_v16 }
0x20d2   :  { %v5714_v13 = vsel %vm912_vm9, %v2397_v8, %v2384_v11  ;;  %4218 = vmatprep.subr.bf16.mxu0 %v4815_v0 }
0x20d5   :  { %4219 = vmatpush3.bf16.msra.mxu0 %v5719_v19 }
0x20d6   :  { %4220 = vmatprep.subr.bf16.mxu0 %v4815_v0 }
0x20d9   :  { %4221 = vmatpush3.bf16.msra.mxu0 %v5727_v6 }
0x20da   :  { %4222 = vmatprep.subr.bf16.mxu0 %v4815_v0 }
0x20dd   :  { %4223 = vmatpush3.bf16.msra.mxu0 %v5732_v34 }
0x20de   :  { %4224 = vmatprep.subr.bf16.mxu0 %v4815_v0 }
0x20e1   :  { %4225 = vmatpush3.bf16.msra.mxu0 %v5737_v37 }
0x20e2   :  { %4226 = vmatprep.subr.bf16.mxu0 %v4815_v0 }
0x20e5   :  { %4227 = vmatpush3.bf16.msra.mxu0 %v5746_v10 }
0x20e6   :  { %4228 = vmatprep.subr.bf16.mxu0 %v4815_v0 }
0x20e9   :  { %4229 = vmatpush3.bf16.msra.mxu0 %v5752_v40 }
0x20ea   :  { %4230 = vmatprep.subr.bf16.mxu0 %v4815_v0 }
0x20ed   :  { %4231 = vmatpush3.bf16.msra.mxu0 %v5757_v49 }
0x20ee   :  { %4256 = vmatprep.subr.bf16.mxu0 %v4815_v0 }
0x20f0   :  { %4233 = vmatmul.mubr.bf16.vlgmr.msra.gmra.mxu0 %v4817_v20 }
0x20f1   :  { %4257 = vmatpush3.bf16.msra.mxu0 %v5716_v16  ;;  %4272 = vmatprep.mubr.msk.bf16.mxu0 %vm4816_vm0, %v4815_v0 }
0x20f2   :  { %4258 = vmatprep.subr.bf16.mxu0 %v4815_v0 }
0x20f5   :  { %4259 = vmatpush3.bf16.msra.mxu0 %v5719_v19 }
0x20f6   :  { %4260 = vmatprep.subr.bf16.mxu0 %v4815_v0 }
0x20f9   :  { %4261 = vmatpush3.bf16.msra.mxu0 %v5727_v6 }
0x20fa   :  { %4262 = vmatprep.subr.bf16.mxu0 %v4815_v0 }
0x20fd   :  { %4263 = vmatpush3.bf16.msra.mxu0 %v5732_v34 }
0x20fe   :  { %4264 = vmatprep.subr.bf16.mxu0 %v4815_v0 }
0x2101   :  { %4265 = vmatpush3.bf16.msra.mxu0 %v5737_v37 }
0x2102   :  { %4266 = vmatprep.subr.bf16.mxu0 %v4815_v0 }
0x2105   :  { %4267 = vmatpush3.bf16.msra.mxu0 %v5746_v10 }
0x2106   :  { %4268 = vmatprep.subr.bf16.mxu0 %v4815_v0 }
0x2109   :  { %4269 = vmatpush3.bf16.msra.mxu0 %v5752_v40 }
0x210a   :  { %4270 = vmatprep.subr.bf16.mxu0 %v4815_v0 }
0x210d   :  { %4271 = vmatpush3.bf16.msra.mxu0 %v5757_v49 }
0x210e   :  { %4296 = vmatprep.subr.bf16.mxu0 %v4815_v0 }
0x2190   :  { %v2337_v22 = vpop.f32.mrf.mxu0 }
0x2191   :  { %v2344_v23 = vrot.slane %v2337_v22, 2 }
0x2192   :  { %v4194_v25 = vpop.f32.mrf.mxu0 }
0x2193   :  { %v2346_v27 = vadd.f32 %v2344_v23, %v5558_v15 }
0x2194   :  { %v2340_v31 = vpop.f32.mrf.mxu0 }
0x2195   :  { %v2347_v33 = vmul.f32 %v2346_v27, %v5050_v29 }
0x2196   :  { %v4195_v30 = vpop.f32.mrf.mxu0 }
0x2197   :  { %4577 = vtanh.f32 %v2347_v33 }
0x21a4   :  { %v4578_v42 = vpop.eup %4577 }
0x21a5   :  { %v2349_v15 = vadd.f32 1.0, %v4578_v42 }
0x21a7   :  { %v2350_v36 = vmul.f32 0.5, %v2349_v15 }
0x21a9   :  { %v2351_v39 = vsel %vm5042_vm3, %v4578_v42, %v2350_v36 }
0x21aa   :  { %v2353_v4 = vrot.slane %v2351_v39, 6 }
0x21ac   :  { %2355 = vrot.lane.b32.xlu0 %v2353_v4, %s4820_s28  ;;  %2357 = vrot.lane.b32.xlu1 %v2353_v4, %s4807_s23 }
0x21b0   :  { %2359 = vrot.lane.b32.xlu1 %v2353_v4, %s4819_s3  ;;  %v2613_v14 = vpop.f32.mrf.mxu0 }
0x21b2   :  { %v4234_v52 = vpop.f32.mrf.mxu0 }
0x21b4   :  { %v2616_v51 = vpop.f32.mrf.mxu0 }
0x21b6   :  { %v4235_v54 = vpop.f32.mrf.mxu0 }
0x221e   :  { %v2358_v20 = vpop.permute.xlu1 %2357  ;;  %v2356_v18 = vpop.permute.xlu0 %2355 }
0x221f   :  { %v2363_v43 = vrot.slane %v2358_v20, 2  ;;  %v2361_v53 = vmul.f32 %v2356_v18, %v5708_v1 }
0x2221   :  { %v2365_v45 = vmul.f32 %v2363_v43, %v2351_v39 }
0x2222   :  { %v2360_v35 = vpop.permute.xlu1 %2359 }
0x2223   :  { %v2367_v2 = vrot.slane %v2365_v45, 6 }
0x2225   :  { %v2369_v46 = vadd.f32 %v2367_v2, %v2361_v53 }
0x2227   :  { %4579 = vtanh.f32 %v2369_v46 }
0x2234   :  { %v4580_v8 = vpop.eup %4579 }
0x2235   :  { %v2371_v5 = vmul.f32 %v4580_v8, %v2360_v35 }
0x2237   :  { %v2372_v48 = vpack.c.bf16 %v2371_v5, %v2371_v5 }
0x2239   :  { %v2386_v12 = vrot.slane %v2372_v48, 1 }
0x223b   :  { %v2401_v50 = vsel %vm915_vm10, %v5714_v13, %v2386_v12 }
0x223c   :  { %4213 = vmatmul.mubr.bf16.vlgmr.msra.gmra.mxu1 %v2401_v50 }
0x223d   :  { %4237 = vmatpush3.bf16.msra.mxu1 %v5716_v16  ;;  %4252 = vmatprep.mubr.msk.bf16.mxu1 %vm4816_vm0, %v4815_v0 }
0x223e   :  { %4238 = vmatprep.subr.bf16.mxu1 %v4815_v0 }
0x2241   :  { %4239 = vmatpush3.bf16.msra.mxu1 %v5719_v19 }
0x2242   :  { %4240 = vmatprep.subr.bf16.mxu1 %v4815_v0 }
0x2245   :  { %4241 = vmatpush3.bf16.msra.mxu1 %v5727_v6 }
0x2246   :  { %4242 = vmatprep.subr.bf16.mxu1 %v4815_v0 }
0x2249   :  { %4243 = vmatpush3.bf16.msra.mxu1 %v5732_v34 }
0x224a   :  { %4244 = vmatprep.subr.bf16.mxu1 %v4815_v0 }
0x224d   :  { %4245 = vmatpush3.bf16.msra.mxu1 %v5737_v37 }
0x224e   :  { %4246 = vmatprep.subr.bf16.mxu1 %v4815_v0 }
0x2251   :  { %4247 = vmatpush3.bf16.msra.mxu1 %v5746_v10 }
0x2252   :  { %4248 = vmatprep.subr.bf16.mxu1 %v4815_v0 }
0x2255   :  { %4249 = vmatpush3.bf16.msra.mxu1 %v5752_v40 }
0x2256   :  { %4250 = vmatprep.subr.bf16.mxu1 %v4815_v0 }
0x2259   :  { %4251 = vmatpush3.bf16.msra.mxu1 %v5757_v49 }
0x225a   :  { %4276 = vmatprep.subr.bf16.mxu1 %v4815_v0 }
0x22fc   :  { %v2508_v21 = vpop.f32.mrf.mxu1 }
0x22fd   :  { %v5806_v57 = vadd.f32 %v3297_v56, %v2508_v21 }
0x22fe   :  { %v4214_v58 = vpop.f32.mrf.mxu1 }
0x22ff   :  { %v2619_v59 = vadd.f32 %v2613_v14, %v5806_v57 }
0x2300   :  { %v2511_v60 = vpop.f32.mrf.mxu1 }
0x2301   :  { %v2620_v61 = vmul.f32 %v2619_v59, %v5050_v29  ;;  %v5810_v62 = vadd.f32 %v3297_v56, %v2511_v60 }
0x2302   :  { %v4215_v63 = vpop.f32.mrf.mxu1 }
0x2303   :  { %4581 = vtanh.f32 %v2620_v61 }
0x2310   :  { %v4582_v1 = vpop.eup %4581 }
0x2311   :  { %v2622_v26 = vadd.f32 1.0, %v4582_v1 }
0x2313   :  { %v2623_v3 = vmul.f32 0.5, %v2622_v26 }
0x2315   :  { %v2624_v7 = vsel %vm5042_vm3, %v4582_v1, %v2623_v3 }
0x2316   :  { %2627 = vrot.lane.b32.xlu1 %v2624_v7, %s4807_s23  ;;  %2625 = vrot.lane.b32.xlu0 %v2624_v7, %s4820_s28 }
0x231a   :  { %2629 = vrot.lane.b32.xlu0 %v2624_v7, %s4819_s3 }
0x2388   :  { %v2628_v9 = vpop.permute.xlu1 %2627  ;;  %v2626_v11 = vpop.permute.xlu0 %2625 }
0x2389   :  { %v2632_v13 = vmul.f32 %v2628_v9, %v2624_v7  ;;  %v2631_v17 = vmul.f32 0.0, %v2626_v11 }
0x238b   :  { %v2633_v22 = vadd.f32 %v2632_v13, %v2631_v17 }
0x238c   :  { %v2630_v25 = vpop.permute.xlu0 %2629 }
0x238d   :  { %4583 = vtanh.f32 %v2633_v22 }
0x239a   :  { %v4584_v23 = vpop.eup %4583 }
0x239b   :  { %v2635_v27 = vmul.f32 %v4584_v23, %v2630_v25 }
0x239d   :  { %v2636_v31 = vpack.c.bf16 %v2635_v27, %v2635_v27 }
0x239f   :  { %4253 = vmatmul.mubr.bf16.vlgmr.msra.gmra.mxu1 %v2636_v31 }
0x23a0   :  { %4277 = vmatpush3.bf16.msra.mxu1 %v5716_v16  ;;  %4292 = vmatprep.mubr.msk.bf16.mxu1 %vm4816_vm0, %v4815_v0 }
0x23a1   :  { %4278 = vmatprep.subr.bf16.mxu1 %v4815_v0 }
0x23a4   :  { %4279 = vmatpush3.bf16.msra.mxu1 %v5719_v19 }
0x23a5   :  { %4280 = vmatprep.subr.bf16.mxu1 %v4815_v0 }
0x23a8   :  { %4281 = vmatpush3.bf16.msra.mxu1 %v5727_v6 }
0x23a9   :  { %4282 = vmatprep.subr.bf16.mxu1 %v4815_v0 }
0x23ac   :  { %4283 = vmatpush3.bf16.msra.mxu1 %v5732_v34 }
0x23ad   :  { %4284 = vmatprep.subr.bf16.mxu1 %v4815_v0 }
0x23b0   :  { %4285 = vmatpush3.bf16.msra.mxu1 %v5737_v37 }
0x23b1   :  { %4286 = vmatprep.subr.bf16.mxu1 %v4815_v0 }
0x23b4   :  { %4287 = vmatpush3.bf16.msra.mxu1 %v5746_v10 }
0x23b5   :  { %4288 = vmatprep.subr.bf16.mxu1 %v4815_v0 }
0x23b8   :  { %4289 = vmatpush3.bf16.msra.mxu1 %v5752_v40 }
0x23b9   :  { %4290 = vmatprep.subr.bf16.mxu1 %v4815_v0 }
0x23bc   :  { %4291 = vmatpush3.bf16.msra.mxu1 %v5757_v49 }
0x23bd   :  { %4316 = vmatprep.subr.bf16.mxu1 %v4815_v0 }
0x245f   :  { %v2671_v33 = vpop.f32.mrf.mxu1 }
0x2460   :  { %v2678_v30 = vrot.slane %v2671_v33, 6 }
0x2461   :  { %v4254_v32 = vpop.f32.mrf.mxu1 }
0x2462   :  { %v2680_v42 = vadd.f32 %v2678_v30, %v5806_v57 }
0x2463   :  { %v2674_v44 = vpop.f32.mrf.mxu1 }
0x2464   :  { %v2681_v15 = vmul.f32 %v2680_v42, %v5050_v29 }
0x2465   :  { %v4255_v36 = vpop.f32.mrf.mxu1 }
0x2466   :  { %4585 = vtanh.f32 %v2681_v15 }
0x2473   :  { %v4586_v55 = vpop.eup %4585 }
0x2474   :  { %v2683_v39 = vadd.f32 1.0, %v4586_v55 }
0x2476   :  { %v2684_v4 = vmul.f32 0.5, %v2683_v39 }
0x2478   :  { %v2685_v38 = vsel %vm5042_vm3, %v4586_v55, %v2684_v4 }
0x2479   :  { %v2687_v41 = vrot.slane %v2685_v38, 2 }
0x247b   :  { %2689 = vrot.lane.b32.xlu0 %v2687_v41, %s4820_s28  ;;  %2691 = vrot.lane.b32.xlu1 %v2687_v41, %s4807_s23 }
0x247f   :  { %2693 = vrot.lane.b32.xlu1 %v2687_v41, %s4819_s3 }
0x24ed   :  { %v2692_v47 = vpop.permute.xlu1 %2691  ;;  %v2690_v20 = vpop.permute.xlu0 %2689 }
0x24ee   :  { %v2697_v28 = vrot.slane %v2692_v47, 6  ;;  %v2695_v18 = vmul.f32 %v2690_v20, %v2633_v22 }
0x24f0   :  { %v2699_v43 = vmul.f32 %v2697_v28, %v2685_v38 }
0x24f1   :  { %v2694_v46 = vpop.permute.xlu1 %2693 }
0x24f2   :  { %v2701_v45 = vrot.slane %v2699_v43, 2 }
0x24f4   :  { %v2703_v53 = vadd.f32 %v2701_v45, %v2695_v18 }
0x24f6   :  { %4587 = vtanh.f32 %v2703_v53 }
0x2503   :  { %v4588_v2 = vpop.eup %4587 }
0x2504   :  { %v2705_v8 = vmul.f32 %v4588_v2, %v2694_v46 }
0x2506   :  { %v2706_v35 = vpack.c.bf16 %v2705_v8, %v2705_v8 }
0x2508   :  { %4273 = vmatmul.mubr.bf16.vlgmr.msra.gmra.mxu0 %v2706_v35 }
0x2509   :  { %4297 = vmatpush3.bf16.msra.mxu0 %v5716_v16  ;;  %4312 = vmatprep.mubr.msk.bf16.mxu0 %vm4816_vm0, %v4815_v0 }
0x250a   :  { %4298 = vmatprep.subr.bf16.mxu0 %v4815_v0 }
0x250d   :  { %4299 = vmatpush3.bf16.msra.mxu0 %v5719_v19 }
0x250e   :  { %4300 = vmatprep.subr.bf16.mxu0 %v4815_v0 }
0x2511   :  { %4301 = vmatpush3.bf16.msra.mxu0 %v5727_v6 }
0x2512   :  { %4302 = vmatprep.subr.bf16.mxu0 %v4815_v0 }
0x2515   :  { %4303 = vmatpush3.bf16.msra.mxu0 %v5732_v34 }
0x2516   :  { %4304 = vmatprep.subr.bf16.mxu0 %v4815_v0 }
0x2519   :  { %4305 = vmatpush3.bf16.msra.mxu0 %v5737_v37 }
0x251a   :  { %4306 = vmatprep.subr.bf16.mxu0 %v4815_v0 }
0x251d   :  { %4307 = vmatpush3.bf16.msra.mxu0 %v5746_v10 }
0x251e   :  { %4308 = vmatprep.subr.bf16.mxu0 %v4815_v0 }
0x2521   :  { %4309 = vmatpush3.bf16.msra.mxu0 %v5752_v40 }
0x2522   :  { %4310 = vmatprep.subr.bf16.mxu0 %v4815_v0 }
0x2525   :  { %4311 = vmatpush3.bf16.msra.mxu0 %v5757_v49 }
0x2526   :  { %4336 = vmatprep.subr.bf16.mxu0 %v4815_v0 }
0x25c8   :  { %v2741_v5 = vpop.f32.mrf.mxu0 }
0x25c9   :  { %v2748_v48 = vrot.slane %v2741_v5, 4 }
0x25ca   :  { %v4274_v12 = vpop.f32.mrf.mxu0 }
0x25cb   :  { %v2750_v50 = vadd.f32 %v2748_v48, %v5806_v57 }
0x25cc   :  { %v2744_v14 = vpop.f32.mrf.mxu0 }
0x25cd   :  { %v2751_v52 = vmul.f32 %v2750_v50, %v5050_v29 }
0x25ce   :  { %v4275_v51 = vpop.f32.mrf.mxu0 }
0x25cf   :  { %4589 = vtanh.f32 %v2751_v52 }
0x25dc   :  { %v4590_v54 = vpop.eup %4589 }
0x25dd   :  { %v2753_v56 = vadd.f32 1.0, %v4590_v54 }
0x25df   :  { %v2754_v21 = vmul.f32 0.5, %v2753_v56 }
0x25e1   :  { %v2755_v58 = vsel %vm5042_vm3, %v4590_v54, %v2754_v21 }
0x25e2   :  { %v2757_v59 = vrot.slane %v2755_v58, 4 }
0x25e4   :  { %2759 = vrot.lane.b32.xlu1 %v2757_v59, %s4820_s28  ;;  %2761 = vrot.lane.b32.xlu0 %v2757_v59, %s4807_s23 }
0x25e8   :  { %2763 = vrot.lane.b32.xlu0 %v2757_v59, %s4819_s3 }
0x2656   :  { %v2762_v60 = vpop.permute.xlu0 %2761  ;;  %v2760_v63 = vpop.permute.xlu1 %2759 }
0x2657   :  { %v2767_v61 = vrot.slane %v2762_v60, 4  ;;  %v2765_v26 = vmul.f32 %v2760_v63, %v2703_v53 }
0x2659   :  { %v2769_v1 = vmul.f32 %v2767_v61, %v2755_v58 }
0x265a   :  { %v2764_v11 = vpop.permute.xlu0 %2763 }
0x265b   :  { %v2771_v3 = vrot.slane %v2769_v1, 4 }
0x265d   :  { %v2773_v7 = vadd.f32 %v2771_v3, %v2765_v26 }
0x265f   :  { %4591 = vtanh.f32 %v2773_v7 }
0x266c   :  { %v4592_v9 = vpop.eup %4591 }
0x266d   :  { %v2775_v13 = vmul.f32 %v4592_v9, %v2764_v11 }
0x266f   :  { %v2776_v17 = vpack.c.bf16 %v2775_v13, %v2775_v13 }
0x2671   :  { %4293 = vmatmul.mubr.bf16.vlgmr.msra.gmra.mxu1 %v2776_v17 }
0x2672   :  { %4317 = vmatpush3.bf16.msra.mxu1 %v5716_v16  ;;  %4332 = vmatprep.mubr.msk.bf16.mxu1 %vm4816_vm0, %v4815_v0 }
0x2673   :  { %4318 = vmatprep.subr.bf16.mxu1 %v4815_v0 }
0x2676   :  { %4319 = vmatpush3.bf16.msra.mxu1 %v5719_v19 }
0x2677   :  { %4320 = vmatprep.subr.bf16.mxu1 %v4815_v0 }
0x267a   :  { %4321 = vmatpush3.bf16.msra.mxu1 %v5727_v6 }
0x267b   :  { %4322 = vmatprep.subr.bf16.mxu1 %v4815_v0 }
0x267e   :  { %4323 = vmatpush3.bf16.msra.mxu1 %v5732_v34 }
0x267f   :  { %4324 = vmatprep.subr.bf16.mxu1 %v4815_v0 }
0x2682   :  { %4325 = vmatpush3.bf16.msra.mxu1 %v5737_v37 }
0x2683   :  { %4326 = vmatprep.subr.bf16.mxu1 %v4815_v0 }
0x2686   :  { %4327 = vmatpush3.bf16.msra.mxu1 %v5746_v10 }
0x2687   :  { %4328 = vmatprep.subr.bf16.mxu1 %v4815_v0 }
0x268a   :  { %4329 = vmatpush3.bf16.msra.mxu1 %v5752_v40 }
0x268b   :  { %4330 = vmatprep.subr.bf16.mxu1 %v4815_v0 }
0x268e   :  { %4331 = vmatpush3.bf16.msra.mxu1 %v5757_v49 }
0x268f   :  { %4356 = vmatprep.subr.bf16.mxu1 %v4815_v0 }
0x2731   :  { %v2811_v22 = vpop.f32.mrf.mxu1 }
0x2732   :  { %v2818_v23 = vrot.slane %v2811_v22, 2 }
0x2733   :  { %v4294_v25 = vpop.f32.mrf.mxu1 }
0x2734   :  { %v2820_v27 = vadd.f32 %v2818_v23, %v5806_v57 }
0x2735   :  { %v2814_v31 = vpop.f32.mrf.mxu1 }
0x2736   :  { %v2821_v33 = vmul.f32 %v2820_v27, %v5050_v29 }
0x2737   :  { %v4295_v30 = vpop.f32.mrf.mxu1 }
0x2738   :  { %4593 = vtanh.f32 %v2821_v33 }
0x2745   :  { %v4594_v32 = vpop.eup %4593 }
0x2746   :  { %v2823_v42 = vadd.f32 1.0, %v4594_v32 }
0x2748   :  { %v2824_v44 = vmul.f32 0.5, %v2823_v42 }
0x274a   :  { %v2825_v15 = vsel %vm5042_vm3, %v4594_v32, %v2824_v44 }
0x274b   :  { %v2827_v36 = vrot.slane %v2825_v15, 6 }
0x274d   :  { %2829 = vrot.lane.b32.xlu0 %v2827_v36, %s4820_s28  ;;  %2831 = vrot.lane.b32.xlu1 %v2827_v36, %s4807_s23 }
0x2751   :  { %2833 = vrot.lane.b32.xlu1 %v2827_v36, %s4819_s3 }
0x27bf   :  { %v2832_v55 = vpop.permute.xlu1 %2831  ;;  %v2830_v39 = vpop.permute.xlu0 %2829 }
0x27c0   :  { %v2837_v57 = vrot.slane %v2832_v55, 2  ;;  %v2835_v38 = vmul.f32 %v2830_v39, %v2773_v7 }
0x27c2   :  { %v2839_v4 = vmul.f32 %v2837_v57, %v2825_v15 }
0x27c3   :  { %v2834_v20 = vpop.permute.xlu1 %2833 }
0x27c4   :  { %v2841_v41 = vrot.slane %v2839_v4, 6 }
0x27c6   :  { %v2843_v47 = vadd.f32 %v2841_v41, %v2835_v38 }
0x27c8   :  { %4595 = vtanh.f32 %v2843_v47 }
0x27d5   :  { %v4596_v28 = vpop.eup %4595 }
0x27d6   :  { %v2845_v43 = vmul.f32 %v4596_v28, %v2834_v20 }
0x27d8   :  { %v2846_v18 = vpack.c.bf16 %v2845_v43, %v2845_v43 }
0x27da   :  { %4313 = vmatmul.mubr.bf16.vlgmr.msra.gmra.mxu0 %v2846_v18 }
0x27db   :  { %4337 = vmatpush3.bf16.msra.mxu0 %v5716_v16  ;;  %4352 = vmatprep.mubr.msk.bf16.mxu0 %vm4816_vm0, %v4815_v0 }
0x27dc   :  { %4338 = vmatprep.subr.bf16.mxu0 %v4815_v0 }
0x27df   :  { %4339 = vmatpush3.bf16.msra.mxu0 %v5719_v19 }
0x27e0   :  { %4340 = vmatprep.subr.bf16.mxu0 %v4815_v0 }
0x27e3   :  { %4341 = vmatpush3.bf16.msra.mxu0 %v5727_v6 }
0x27e4   :  { %4342 = vmatprep.subr.bf16.mxu0 %v4815_v0 }
0x27e7   :  { %4343 = vmatpush3.bf16.msra.mxu0 %v5732_v34 }
0x27e8   :  { %4344 = vmatprep.subr.bf16.mxu0 %v4815_v0 }
0x27eb   :  { %4345 = vmatpush3.bf16.msra.mxu0 %v5737_v37 }
0x27ec   :  { %4346 = vmatprep.subr.bf16.mxu0 %v4815_v0 }
0x27ef   :  { %4347 = vmatpush3.bf16.msra.mxu0 %v5746_v10 }
0x27f0   :  { %4348 = vmatprep.subr.bf16.mxu0 %v4815_v0 }
0x27f3   :  { %4349 = vmatpush3.bf16.msra.mxu0 %v5752_v40 }
0x27f4   :  { %4350 = vmatprep.subr.bf16.mxu0 %v4815_v0 }
0x27f7   :  { %4351 = vmatpush3.bf16.msra.mxu0 %v5757_v49 }
0x27f8   :  { %4376 = vmatprep.subr.bf16.mxu0 %v4815_v0 }
0x289a   :  { %v2881_v45 = vpop.f32.mrf.mxu0 }
0x289b   :  { %v2887_v53 = vadd.f32 %v2881_v45, %v5810_v62 }
0x289c   :  { %v4314_v2 = vpop.f32.mrf.mxu0 }
0x289d   :  { %v2888_v46 = vmul.f32 %v2887_v53, %v5050_v29 }
0x289e   :  { %v2884_v8 = vpop.f32.mrf.mxu0 }
0x289f   :  { %4597 = vtanh.f32 %v2888_v46 }
0x28a0   :  { %v4315_v35 = vpop.f32.mrf.mxu0 }
0x28a1   :  { %v4477_v35 = vld [vmem:[%s6007_s13 + $0x38] sm:$0xff]  }
0x28ac   :  { %v4598_v5 = vpop.eup %4597 }
0x28ad   :  { %v2890_v48 = vadd.f32 1.0, %v4598_v5 }
0x28af   :  { %v2891_v12 = vmul.f32 0.5, %v2890_v48 }
0x28b1   :  { %v2892_v50 = vsel %vm5042_vm3, %v4598_v5, %v2891_v12  ;;  %v4478_v5 = vld [vmem:[%s6007_s13 + $0x30] sm:$0xff]  }
0x28b2   :  { %2895 = vrot.lane.b32.xlu1 %v2892_v50, %s4807_s23  ;;  %2893 = vrot.lane.b32.xlu0 %v2892_v50, %s4820_s28 }
0x28b6   :  { %2897 = vrot.lane.b32.xlu0 %v2892_v50, %s4819_s3 }
0x2924   :  { %v2896_v14 = vpop.permute.xlu1 %2895  ;;  %v2894_v52 = vpop.permute.xlu0 %2893 }
0x2925   :  { %v2900_v51 = vmul.f32 %v2896_v14, %v2892_v50  ;;  %v2899_v54 = vmul.f32 %v2894_v52, %v2843_v47 }
0x2927   :  { %v2901_v56 = vadd.f32 %v2900_v51, %v2899_v54 }
0x2928   :  { %v2898_v58 = vpop.permute.xlu0 %2897 }
0x2929   :  { %4599 = vtanh.f32 %v2901_v56 }
0x2936   :  { %v4600_v21 = vpop.eup %4599 }
0x2937   :  { %v2903_v59 = vmul.f32 %v4600_v21, %v2898_v58 }
0x2939   :  { %v2904_v60 = vpack.c.bf16 %v2903_v59, %v2903_v59  ;;  %v4480_v59 = vld [vmem:[%s6007_s13 + $0x20] sm:$0xff]  }
0x293b   :  { %4333 = vmatmul.mubr.bf16.vlgmr.msra.gmra.mxu1 %v2904_v60 }
0x293c   :  { %4357 = vmatpush3.bf16.msra.mxu1 %v5716_v16  ;;  %4372 = vmatprep.mubr.msk.bf16.mxu1 %vm4816_vm0, %v4815_v0 }
0x293d   :  { %4358 = vmatprep.subr.bf16.mxu1 %v4815_v0 }
0x2940   :  { %4359 = vmatpush3.bf16.msra.mxu1 %v5719_v19 }
0x2941   :  { %4360 = vmatprep.subr.bf16.mxu1 %v4815_v0 }
0x2944   :  { %4361 = vmatpush3.bf16.msra.mxu1 %v5727_v6 }
0x2945   :  { %4362 = vmatprep.subr.bf16.mxu1 %v4815_v0 }
0x2948   :  { %4363 = vmatpush3.bf16.msra.mxu1 %v5732_v34 }
0x2949   :  { %4364 = vmatprep.subr.bf16.mxu1 %v4815_v0 }
0x294c   :  { %4365 = vmatpush3.bf16.msra.mxu1 %v5737_v37 }
0x294d   :  { %4366 = vmatprep.subr.bf16.mxu1 %v4815_v0 }
0x2950   :  { %4367 = vmatpush3.bf16.msra.mxu1 %v5746_v10 }
0x2951   :  { %4368 = vmatprep.subr.bf16.mxu1 %v4815_v0 }
0x2954   :  { %4369 = vmatpush3.bf16.msra.mxu1 %v5752_v40 }
0x2955   :  { %4370 = vmatprep.subr.bf16.mxu1 %v4815_v0 }
0x2958   :  { %4371 = vmatpush3.bf16.msra.mxu1 %v5757_v49 }
0x29fb   :  { %v2939_v16 = vpop.f32.mrf.mxu1 }
0x29fc   :  { %v2946_v19 = vrot.slane %v2939_v16, 6 }
0x29fd   :  { %v4334_v6 = vpop.f32.mrf.mxu1 }
0x29fe   :  { %v2948_v34 = vadd.f32 %v2946_v19, %v5810_v62  ;;  %v4482_v19 = vld [vmem:[%s6007_s13 + $0x10] sm:$0xff]   ;;  %v4484_v6 = vld [vmem:[%s6007_s13] sm:$0xff]  }
0x29ff   :  { %v2942_v61 = vpop.f32.mrf.mxu1 }
0x2a00   :  { %v2949_v37 = vmul.f32 %v2948_v34, %v5050_v29 }
0x2a01   :  { %v4335_v63 = vpop.f32.mrf.mxu1 }
0x2a02   :  { %4601 = vtanh.f32 %v2949_v37 }
0x2a0f   :  { %v4602_v1 = vpop.eup %4601 }
0x2a10   :  { %v2951_v10 = vadd.f32 1.0, %v4602_v1 }
0x2a12   :  { %v2952_v26 = vmul.f32 0.5, %v2951_v10 }
0x2a14   :  { %v2953_v40 = vsel %vm5042_vm3, %v4602_v1, %v2952_v26 }
0x2a15   :  { %v2955_v3 = vrot.slane %v2953_v40, 2 }
0x2a17   :  { %2957 = vrot.lane.b32.xlu0 %v2955_v3, %s4820_s28  ;;  %2959 = vrot.lane.b32.xlu1 %v2955_v3, %s4807_s23 }
0x2a1b   :  { %2961 = vrot.lane.b32.xlu1 %v2955_v3, %s4819_s3 }
0x2a89   :  { %v2960_v49 = vpop.permute.xlu1 %2959  ;;  %v2958_v9 = vpop.permute.xlu0 %2957 }
0x2a8a   :  { %v2965_v7 = vrot.slane %v2960_v49, 6  ;;  %v2963_v13 = vmul.f32 %v2958_v9, %v2901_v56  ;;  %v4479_v56 = vld [vmem:[%s6007_s13 + $0x28] sm:$0xff]  }
0x2a8c   :  { %v2967_v11 = vmul.f32 %v2965_v7, %v2953_v40 }
0x2a8d   :  { %v2962_v25 = vpop.permute.xlu1 %2961 }
0x2a8e   :  { %v2969_v17 = vrot.slane %v2967_v11, 2 }
0x2a90   :  { %v2971_v22 = vadd.f32 %v2969_v17, %v2963_v13 }
0x2a92   :  { %4603 = vtanh.f32 %v2971_v22 }
0x2a9f   :  { %v4604_v23 = vpop.eup %4603 }
0x2aa0   :  { %v2973_v27 = vmul.f32 %v4604_v23, %v2962_v25 }
0x2aa2   :  { %v2974_v31 = vpack.c.bf16 %v2973_v27, %v2973_v27 }
0x2aa4   :  { %4353 = vmatmul.mubr.bf16.vlgmr.msra.gmra.mxu0 %v2974_v31 }
0x2aa5   :  { %4392 = vmatprep.mubr.msk.bf16.mxu0 %vm4816_vm0, %v4815_v0  ;;  %4377 = vmatpush3.bf16.msra.mxu0 %v4477_v35 }
0x2aa6   :  { %4378 = vmatprep.subr.bf16.mxu0 %v4815_v0 }
0x2aa9   :  { %4379 = vmatpush3.bf16.msra.mxu0 %v4478_v5 }
0x2aaa   :  { %4380 = vmatprep.subr.bf16.mxu0 %v4815_v0 }
0x2aad   :  { %4381 = vmatpush3.bf16.msra.mxu0 %v4479_v56 }
0x2aae   :  { %4382 = vmatprep.subr.bf16.mxu0 %v4815_v0 }
0x2ab1   :  { %4383 = vmatpush3.bf16.msra.mxu0 %v4480_v59 }
0x2ab2   :  { %4384 = vmatprep.subr.bf16.mxu0 %v4815_v0 }
0x2b64   :  { %v3009_v33 = vpop.f32.mrf.mxu0 }
0x2b65   :  { %v3016_v30 = vrot.slane %v3009_v33, 4 }
0x2b66   :  { %v4354_v32 = vpop.f32.mrf.mxu0 }
0x2b67   :  { %v3018_v42 = vadd.f32 %v3016_v30, %v5810_v62 }
0x2b68   :  { %v3012_v44 = vpop.f32.mrf.mxu0 }
0x2b69   :  { %v3019_v15 = vmul.f32 %v3018_v42, %v5050_v29 }
0x2b6a   :  { %v4355_v36 = vpop.f32.mrf.mxu0 }
0x2b6b   :  { %4605 = vtanh.f32 %v3019_v15 }
0x2b78   :  { %v4606_v55 = vpop.eup %4605 }
0x2b79   :  { %v3021_v57 = vadd.f32 1.0, %v4606_v55 }
0x2b7b   :  { %v3022_v39 = vmul.f32 0.5, %v3021_v57 }
0x2b7d   :  { %v3023_v4 = vsel %vm5042_vm3, %v4606_v55, %v3022_v39 }
0x2b7e   :  { %v3025_v38 = vrot.slane %v3023_v4, 4 }
0x2b80   :  { %3027 = vrot.lane.b32.xlu1 %v3025_v38, %s4820_s28  ;;  %3029 = vrot.lane.b32.xlu0 %v3025_v38, %s4807_s23 }
0x2b84   :  { %3031 = vrot.lane.b32.xlu0 %v3025_v38, %s4819_s3 }
0x2bf2   :  { %v3030_v41 = vpop.permute.xlu0 %3029  ;;  %v3028_v28 = vpop.permute.xlu1 %3027 }
0x2bf3   :  { %v3035_v47 = vrot.slane %v3030_v41, 4  ;;  %v3033_v43 = vmul.f32 %v3028_v28, %v2971_v22 }
0x2bf5   :  { %v3037_v20 = vmul.f32 %v3035_v47, %v3023_v4 }
0x2bf6   :  { %v3032_v2 = vpop.permute.xlu0 %3031 }
0x2bf7   :  { %v3039_v18 = vrot.slane %v3037_v20, 4 }
0x2bf9   :  { %v3041_v45 = vadd.f32 %v3039_v18, %v3033_v43 }
0x2bfb   :  { %4607 = vtanh.f32 %v3041_v45 }
0x2c08   :  { %v4608_v53 = vpop.eup %4607 }
0x2c09   :  { %v3043_v46 = vmul.f32 %v4608_v53, %v3032_v2 }
0x2c0b   :  { %v3044_v8 = vpack.c.bf16 %v3043_v46, %v3043_v46 }
0x2c0d   :  { %4373 = vmatmul.mubr.bf16.vlgmr.msra.gmra.mxu1 %v3044_v8 }
0x2ccd   :  { %v3079_v48 = vpop.f32.mrf.mxu1 }
0x2cce   :  { %v3086_v12 = vrot.slane %v3079_v48, 2 }
0x2ccf   :  { %v4374_v50 = vpop.f32.mrf.mxu1 }
0x2cd0   :  { %v3088_v14 = vadd.f32 %v3086_v12, %v5810_v62  ;;  %v4481_v62 = vld [vmem:[%s6007_s13 + $0x18] sm:$0xff]   ;;  %s3233_s13 = sshll.u32 %s4821_s0, 4  ;;  %s3234_s13 = int_to_ptr.vmem [resolvable:$true] %s3233_s13 }
0x2cd1   :  { %v3082_v52 = vpop.f32.mrf.mxu1  ;;  %4385 = vmatpush3.bf16.msra.mxu0 %v4481_v62  ;;  %s4773_s27 = scalar_lea.vmem %s3234_s13, 32  ;;  %p4778_p13 = scmp.lt.s32.totalorder %s3234_s13, %s3234_s13 }
0x2cd2   :  { %v3089_v51 = vmul.f32 %v3088_v14, %v5050_v29  ;;  %4386 = vmatprep.subr.bf16.mxu0 %v4815_v0  ;;  %p4774_p12 = scmp.ne.s32.totalorder %s3234_s13, %s4773_s27  ;;  %p4779_p0 = scmp.lt.s32.totalorder %s4773_s27, %s4773_s27 }
0x2cd3   :  { %v4375_v54 = vpop.f32.mrf.mxu1 }
0x2cd4   :  { %4609 = vtanh.f32 %v3089_v51  ;;  %p4780_p1 = por %p4779_p0, %p4778_p13 }
0x2cd5   :  { %4387 = vmatpush3.bf16.msra.mxu0 %v4482_v19 }
0x2cd6   :  { %4388 = vmatprep.subr.bf16.mxu0 %v4815_v0  ;;  %p4781_p2 = pnand %p4780_p1, %p4774_p12 }
0x2cd9   :  { %4389 = vmatpush3.bf16.msra.mxu0 %v4483_v24 }
0x2cda   :  { %4390 = vmatprep.subr.bf16.mxu0 %v4815_v0  ;;  %v3314_v0 = vld [vmem:[%s6008_s14] ss:$0 sm:$0xff] }
0x2cdd   :  { %4391 = vmatpush3.bf16.msra.mxu0 %v4484_v6 }
0x2ce1   :  { %v4610_v21 = vpop.eup %4609 }
0x2ce2   :  { %v3091_v58 = vadd.f32 1.0, %v4610_v21 }
0x2ce4   :  { %v3092_v60 = vmul.f32 0.5, %v3091_v58 }
0x2ce6   :  { %v3093_v29 = vsel %vm5042_vm3, %v4610_v21, %v3092_v60 }
0x2ce7   :  { %v3095_v16 = vrot.slane %v3093_v29, 6 }
0x2ce9   :  { %3097 = vrot.lane.b32.xlu0 %v3095_v16, %s4820_s28  ;;  %3099 = vrot.lane.b32.xlu1 %v3095_v16, %s4807_s23 }
0x2ced   :  { %3101 = vrot.lane.b32.xlu1 %v3095_v16, %s4819_s3 }
0x2d5b   :  { %v3100_v34 = vpop.permute.xlu1 %3099  ;;  %v3098_v37 = vpop.permute.xlu0 %3097 }
0x2d5c   :  { %v3105_v61 = vrot.slane %v3100_v34, 2  ;;  %v3103_v1 = vmul.f32 %v3098_v37, %v3041_v45 }
0x2d5e   :  { %v3107_v63 = vmul.f32 %v3105_v61, %v3093_v29 }
0x2d5f   :  { %v3102_v3 = vpop.permute.xlu1 %3101 }
0x2d60   :  { %v3109_v10 = vrot.slane %v3107_v63, 6 }
0x2d62   :  { %v3111_v26 = vadd.f32 %v3109_v10, %v3103_v1 }
0x2d64   :  { %4611 = vtanh.f32 %v3111_v26 }
0x2d71   :  { %v4612_v40 = vpop.eup %4611 }
0x2d72   :  { %v3113_v49 = vmul.f32 %v4612_v40, %v3102_v3 }
0x2d74   :  { %v3114_v7 = vpack.c.bf16 %v3113_v49, %v3113_v49 }
0x2d76   :  { %4393 = vmatmul.mubr.bf16.vlgmr.msra.gmra.mxu0 %v3114_v7 }
0x2e36   :  { %v3220_v9 = vpop.f32.mrf.mxu0 }
0x2e37   :  { %v3221_v11 = vadd.f32 %v3314_v0, %v3220_v9 }
0x2e38   :  { %v4394_v13 = vpop.f32.mrf.mxu0 }
0x2e39   :  { %3226 = vst [vmem:[#allocation16] sm:$0x3] %v3221_v11 }
0x2e3a   :  { %v3223_v17 = vpop.f32.mrf.mxu0 }
0x2e3b   :  { %4784 = shalt.err (!%p4781_p2)
}
0x2e3c   :  { %3236 = dma.vmem_to_hbm [thread:$0]  %s3234_s13, 32, %s6009_s15, [#allocation4]   ;;  %v4395_v22 = vpop.f32.mrf.mxu0 }
0x2e3d   :  { %4803 = dma.done.wait [#allocation4], 32  }
0x2e3e   :  { %4804 = vsyncadd [#allocation4], 4294967264 }
0x2e3f   :  { %3240 = vsyncpa [#allocation3], 1 }
0x2e40   :  { %3241 = vsyncpa [#allocation6], 1 }
0x2e41   :  { %3242 = vsyncpa [#allocation9], 1 }
0x2e42   :  { %3243 = vsyncpa [#allocation12], 1 }
0x2e43   :  { %3244 = vsyncpa [#allocation15], 1 }
0x2e44   :  { %3245 = vsyncpa [#allocation4], 1 }

</bundles_post_ra>
